<compile_context>
chip_gen: v7x
topology: tpu7x:2x2x1
jax: 0.10.0
libtpu: 0.0.40
codegen_flags: <defaults>
</compile_context>

<pallas_src>
import functools

import jax
import jax.numpy as jnp
from jax import lax
from jax.experimental import pallas as pl
from jax.experimental.pallas import tpu as pltpu


def _fused_lstm_kernel(*refs, num_layers, hp, seq_len):
    """All layers, all timesteps, one kernel invocation (no grid).

    refs layout:
      [x,
       w_fused[0..L-1],              # (K_l, 4*hp), rows ordered [W_hh ; W_ih]
       b_fused[0..L-1],              # (1, 4*hp)
       h0, c0,                       # (L, B, hp)
       H_seq_out, h_fin_out, c_fin_out,
       seq_scratch]                  # (T, B, hp) VMEM
    """
    x_ref = refs[0]
    w_refs = refs[1:1 + num_layers]
    b_refs = refs[1 + num_layers:1 + 2 * num_layers]
    h0_ref = refs[1 + 2 * num_layers]
    c0_ref = refs[2 + 2 * num_layers]
    hseq_ref = refs[3 + 2 * num_layers]
    hfin_ref = refs[4 + 2 * num_layers]
    cfin_ref = refs[5 + 2 * num_layers]
    seq_sc = refs[6 + 2 * num_layers]

    for layer in range(num_layers):
        in_ref = x_ref if layer == 0 else seq_sc
        out_ref = hseq_ref if layer == num_layers - 1 else seq_sc
        w = w_refs[layer][...]            # (hp + Din, 4*hp)
        b = b_refs[layer][...]            # (1, 4*hp)

        def step(t, carry, w=w, b=b, in_ref=in_ref, out_ref=out_ref):
            h, c = carry
            xt = in_ref[t]                                     # (B, Din)
            lhs = jnp.concatenate([h, xt], axis=-1)            # (B, hp + Din)
            gates = jnp.dot(lhs, w,
                            preferred_element_type=jnp.float32) + b  # (B, 4*hp)
            i_g = jax.nn.sigmoid(gates[:, 0 * hp:1 * hp])
            f_g = jax.nn.sigmoid(gates[:, 1 * hp:2 * hp])
            g_g = jnp.tanh(gates[:, 2 * hp:3 * hp])
            o_g = jax.nn.sigmoid(gates[:, 3 * hp:4 * hp])
            c_n = f_g * c + i_g * g_g
            h_n = o_g * jnp.tanh(c_n)
            out_ref[t] = h_n
            return h_n, c_n

        h_f, c_f = lax.fori_loop(0, seq_len, step,
                                 (h0_ref[layer], c0_ref[layer]),
                                 unroll=True)
        hfin_ref[layer] = h_f        # written once, in the layer epilogue
        cfin_ref[layer] = c_f


def _pad_gate_cols(a, hidden_sz, hp):
    """Pad trailing 4*hidden_sz gate axis to 4*hp, per-gate (lane-aligned)."""
    lead = a.shape[:-1]
    a4 = a.reshape(lead + (4, hidden_sz))
    pad = [(0, 0)] * len(lead) + [(0, 0), (0, hp - hidden_sz)]
    return jnp.pad(a4, pad).reshape(lead + (4 * hp,))


def _fuse_layer_weights(w_ih, w_hh, hidden_sz, hp, pad_input_rows):
    """Build the (K, 4*hp) fused weight with row order [W_hh ; W_ih]."""
    w_hh_p = _pad_gate_cols(w_hh, hidden_sz, hp)
    w_hh_p = jnp.pad(w_hh_p, ((0, hp - hidden_sz), (0, 0)))  # h carried hp-wide
    w_ih_p = _pad_gate_cols(w_ih, hidden_sz, hp)
    if pad_input_rows:   # layers >= 1: their input is the padded previous-layer h
        w_ih_p = jnp.pad(w_ih_p, ((0, hp - w_ih.shape[0]), (0, 0)))
    return jnp.concatenate([w_hh_p, w_ih_p], axis=0).astype(jnp.float32)


def lstm_forward(x, params, h0, c0, hidden_sz):
    """x: (T, B, D); h0/c0: (L, B, hidden_sz) -> (H_seq, (h_fin, c_fin))."""
    T, B, _ = x.shape
    L = len(params)
    hp = ((hidden_sz + 127) // 128) * 128     # lane-aligned hidden width

    fused_w, fused_b = [], []
    for layer, (w_ih, w_hh, b_ih, b_hh) in enumerate(params):
        fused_w.append(_fuse_layer_weights(w_ih, w_hh, hidden_sz, hp,
                                           pad_input_rows=layer > 0))
        fused_b.append(_pad_gate_cols((b_ih + b_hh).reshape(1, -1),
                                      hidden_sz, hp).astype(jnp.float32))

    pad_h = ((0, 0), (0, 0), (0, hp - hidden_sz))
    h0p = jnp.pad(h0.astype(jnp.float32), pad_h)
    c0p = jnp.pad(c0.astype(jnp.float32), pad_h)

    kernel = functools.partial(_fused_lstm_kernel,
                               num_layers=L, hp=hp, seq_len=T)
    vmem = pl.BlockSpec(memory_space=pltpu.MemorySpace.VMEM)
    out_shapes = (
        jax.ShapeDtypeStruct((T, B, hp), jnp.float32),   # last-layer H sequence
        jax.ShapeDtypeStruct((L, B, hp), jnp.float32),   # final h per layer
        jax.ShapeDtypeStruct((L, B, hp), jnp.float32),   # final c per layer
    )

    hseq_p, hfin_p, cfin_p = pl.pallas_call(
        kernel,
        out_shape=out_shapes,
        in_specs=[vmem] * (2 * L + 3),
        out_specs=(vmem, vmem, vmem),
        scratch_shapes=[pltpu.VMEM((T, B, hp), jnp.float32)],
        compiler_params=pltpu.CompilerParams(
            vmem_limit_bytes=32 * 1024 * 1024),
    )(x.astype(jnp.float32), *fused_w, *fused_b, h0p, c0p)

    return (hseq_p[..., :hidden_sz],
            (hfin_p[..., :hidden_sz], cfin_p[..., :hidden_sz]))


class LSTMNew:
    """JAX/Pallas port of the PyTorch LSTMNew module (forward only)."""

    def __init__(self, input_sz, hidden_sz, num_layers=1, key=None):
        assert hidden_sz == 100, (
            "torch.split(out, 100, dim=-1) in the reference module only "
            "yields 4 gates when hidden_sz == 100")
        self.num_layers = num_layers
        self.hidden_sz = hidden_sz
        if key is None:
            key = jax.random.PRNGKey(0)
        self.params = []
        for layer in range(num_layers):
            d_in = input_sz if layer == 0 else hidden_sz
            key, k1, k2 = jax.random.split(key, 3)
            w_ih = jax.random.normal(k1, (d_in, 4 * hidden_sz), jnp.float32)
            w_hh = jax.random.normal(k2, (hidden_sz, 4 * hidden_sz), jnp.float32)
            b_ih = jnp.zeros((4 * hidden_sz,), jnp.float32)
            b_hh = jnp.zeros((4 * hidden_sz,), jnp.float32)
            self.params.append((w_ih, w_hh, b_ih, b_hh))

    def __call__(self, x, h_t, c_t):
        # x: (T, B, input_sz); h_t, c_t: (num_layers, B, hidden_sz)
        return lstm_forward(x, self.params, h_t, c_t, self.hidden_sz)


def _reference_lstm(params, hidden_sz, x, h_t, c_t):
    """Pure-JAX reference matching the PyTorch semantics (f32 matmuls)."""
    T = x.shape[0]
    layer_in = x
    H = None
    h_fin, c_fin = [], []
    hi = jax.lax.Precision.HIGHEST
    for layer, (w_ih, w_hh, b_ih, b_hh) in enumerate(params):
        h, c = h_t[layer], c_t[layer]
        outs = []
        for t in range(T):
            out = (jnp.dot(layer_in[t], w_ih, precision=hi)
                   + jnp.dot(h, w_hh, precision=hi) + b_ih + b_hh)
            i = jax.nn.sigmoid(out[:, 0 * hidden_sz:1 * hidden_sz])
            f = jax.nn.sigmoid(out[:, 1 * hidden_sz:2 * hidden_sz])
            g = jnp.tanh(out[:, 2 * hidden_sz:3 * hidden_sz])
            o = jax.nn.sigmoid(out[:, 3 * hidden_sz:4 * hidden_sz])
            c = f * c + i * g
            h = o * jnp.tanh(c)
            outs.append(h)
        H = jnp.stack(outs, axis=0)
        layer_in = H
        h_fin.append(h)
        c_fin.append(c)
    return H, (jnp.stack(h_fin), jnp.stack(c_fin))


if __name__ == "__main__":
    T, B, input_sz, hidden_sz, num_layers = 8, 2, 16, 100, 2

    key = jax.random.PRNGKey(0)
    kx, kh, kc, kp = jax.random.split(key, 4)
    x = jax.random.normal(kx, (T, B, input_sz), jnp.float32)
    h0 = jax.random.normal(kh, (num_layers, B, hidden_sz), jnp.float32)
    c0 = jax.random.normal(kc, (num_layers, B, hidden_sz), jnp.float32)

    model = LSTMNew(input_sz, hidden_sz, num_layers=num_layers, key=kp)

    H, (h_fin, c_fin) = model(x, h0, c0)
    H = jax.block_until_ready(H)
    h_fin = jax.block_until_ready(h_fin)
    c_fin = jax.block_until_ready(c_fin)

    # correctness check against a pure-JAX reference
    H_ref, (h_ref, c_ref) = _reference_lstm(model.params, hidden_sz, x, h0, c0)
    assert jnp.allclose(H, H_ref, atol=2e-4, rtol=2e-4), \
        float(jnp.max(jnp.abs(H - H_ref)))
    assert jnp.allclose(h_fin, h_ref, atol=2e-4, rtol=2e-4)
    assert jnp.allclose(c_fin, c_ref, atol=2e-4, rtol=2e-4)

    print("KERNEL_OK")
</pallas_src>

<mosaic_0001>
module attributes {stable_mosaic.version = 11 : i64} {
  func.func @_fused_lstm_kernel(%arg0: memref<8x2x16xf32, #tpu.memory_space<vmem>>, %arg1: memref<144x512xf32, #tpu.memory_space<vmem>>, %arg2: memref<256x512xf32, #tpu.memory_space<vmem>>, %arg3: memref<1x512xf32, #tpu.memory_space<vmem>>, %arg4: memref<1x512xf32, #tpu.memory_space<vmem>>, %arg5: memref<2x2x128xf32, #tpu.memory_space<vmem>>, %arg6: memref<2x2x128xf32, #tpu.memory_space<vmem>>, %arg7: memref<8x2x128xf32, #tpu.memory_space<vmem>>, %arg8: memref<2x2x128xf32, #tpu.memory_space<vmem>>, %arg9: memref<2x2x128xf32, #tpu.memory_space<vmem>>, %arg10: memref<8x2x128xf32, #tpu.memory_space<vmem>>) attributes {dimension_semantics = [], scalar_prefetch = 0 : i64, scratch_operands = 1 : i64, tpu.core_type = #tpu.core_type<tc>} {
    %c0 = arith.constant 0 : index
    %c0_0 = arith.constant 0 : index
    %0 = vector.load %arg1[%c0, %c0_0] : memref<144x512xf32, #tpu.memory_space<vmem>>, vector<144x512xf32>
    %c0_1 = arith.constant 0 : index
    %c0_2 = arith.constant 0 : index
    %1 = vector.load %arg3[%c0_1, %c0_2] : memref<1x512xf32, #tpu.memory_space<vmem>>, vector<1x512xf32>
    %c0_3 = arith.constant 0 : index
    %c0_4 = arith.constant 0 : index
    %c0_5 = arith.constant 0 : index
    %2 = vector.load %arg5[%c0_3, %c0_4, %c0_5] : memref<2x2x128xf32, #tpu.memory_space<vmem>>, vector<1x2x128xf32>
    %3 = vector.shape_cast %2 : vector<1x2x128xf32> to vector<2x128xf32>
    %c0_6 = arith.constant 0 : index
    %c0_7 = arith.constant 0 : index
    %c0_8 = arith.constant 0 : index
    %4 = vector.load %arg6[%c0_6, %c0_7, %c0_8] : memref<2x2x128xf32, #tpu.memory_space<vmem>>, vector<1x2x128xf32>
    %5 = vector.shape_cast %4 : vector<1x2x128xf32> to vector<2x128xf32>
    %c0_i32 = arith.constant 0 : i32
    %6 = arith.index_cast %c0_i32 : i32 to index
    %c0_9 = arith.constant 0 : index
    %c0_10 = arith.constant 0 : index
    %7 = vector.load %arg0[%6, %c0_9, %c0_10] : memref<8x2x16xf32, #tpu.memory_space<vmem>>, vector<1x2x16xf32>
    %8 = vector.shape_cast %7 : vector<1x2x16xf32> to vector<2x16xf32>
    %9 = tpu.concatenate %3, %8 in 1 : vector<2x128xf32>, vector<2x16xf32> -> vector<2x144xf32>
    %cst = arith.constant dense<0.000000e+00> : vector<2x512xf32>
    %10 = tpu.matmul %9, %0, %cst {dimension_numbers = #tpu.dot_dimension_numbers<[1], [0], [0], [1], [0, 0, 1, 1], [], []>} : vector<2x144xf32>, vector<144x512xf32>, vector<2x512xf32> -> vector<2x512xf32>
    %11 = vector.broadcast %1 : vector<1x512xf32> to vector<2x512xf32>
    %12 = arith.addf %10, %11 : vector<2x512xf32>
    %13 = vector.extract_strided_slice %12 {offsets = [0, 0], sizes = [2, 128], strides = [1, 1]} : vector<2x512xf32> to vector<2x128xf32>
    %14 = arith.negf %13 : vector<2x128xf32>
    %15 = math.exp %14 : vector<2x128xf32>
    %cst_11 = arith.constant 1.000000e+00 : f32
    %16 = vector.broadcast %cst_11 : f32 to vector<2x128xf32>
    %17 = arith.addf %16, %15 : vector<2x128xf32>
    %18 = arith.divf %16, %17 : vector<2x128xf32>
    %19 = vector.extract_strided_slice %12 {offsets = [0, 128], sizes = [2, 128], strides = [1, 1]} : vector<2x512xf32> to vector<2x128xf32>
    %20 = arith.negf %19 : vector<2x128xf32>
    %21 = math.exp %20 : vector<2x128xf32>
    %cst_12 = arith.constant 1.000000e+00 : f32
    %22 = vector.broadcast %cst_12 : f32 to vector<2x128xf32>
    %23 = arith.addf %22, %21 : vector<2x128xf32>
    %24 = arith.divf %22, %23 : vector<2x128xf32>
    %25 = vector.extract_strided_slice %12 {offsets = [0, 256], sizes = [2, 128], strides = [1, 1]} : vector<2x512xf32> to vector<2x128xf32>
    %26 = math.tanh %25 : vector<2x128xf32>
    %27 = vector.extract_strided_slice %12 {offsets = [0, 384], sizes = [2, 128], strides = [1, 1]} : vector<2x512xf32> to vector<2x128xf32>
    %28 = arith.negf %27 : vector<2x128xf32>
    %29 = math.exp %28 : vector<2x128xf32>
    %cst_13 = arith.constant 1.000000e+00 : f32
    %30 = vector.broadcast %cst_13 : f32 to vector<2x128xf32>
    %31 = arith.addf %30, %29 : vector<2x128xf32>
    %32 = arith.divf %30, %31 : vector<2x128xf32>
    %33 = arith.mulf %24, %5 : vector<2x128xf32>
    %34 = arith.mulf %18, %26 : vector<2x128xf32>
    %35 = arith.addf %33, %34 : vector<2x128xf32>
    %36 = math.tanh %35 : vector<2x128xf32>
    %37 = arith.mulf %32, %36 : vector<2x128xf32>
    %38 = arith.index_cast %c0_i32 : i32 to index
    %c0_14 = arith.constant 0 : index
    %c0_15 = arith.constant 0 : index
    %39 = vector.load %arg10[%38, %c0_14, %c0_15] : memref<8x2x128xf32, #tpu.memory_space<vmem>>, vector<1x2x128xf32>
    %40 = vector.shape_cast %39 : vector<1x2x128xf32> to vector<2x128xf32>
    %41 = vector.shape_cast %37 : vector<2x128xf32> to vector<1x2x128xf32>
    tpu.vector_store %arg10[%38, %c0_14, %c0_15], %41 {strides = array<i32>} : memref<8x2x128xf32, #tpu.memory_space<vmem>>, vector<1x2x128xf32>,
    %c1_i32 = arith.constant 1 : i32
    %42 = arith.index_cast %c1_i32 : i32 to index
    %c0_16 = arith.constant 0 : index
    %c0_17 = arith.constant 0 : index
    %43 = vector.load %arg0[%42, %c0_16, %c0_17] : memref<8x2x16xf32, #tpu.memory_space<vmem>>, vector<1x2x16xf32>
    %44 = vector.shape_cast %43 : vector<1x2x16xf32> to vector<2x16xf32>
    %45 = tpu.concatenate %37, %44 in 1 : vector<2x128xf32>, vector<2x16xf32> -> vector<2x144xf32>
    %cst_18 = arith.constant dense<0.000000e+00> : vector<2x512xf32>
    %46 = tpu.matmul %45, %0, %cst_18 {dimension_numbers = #tpu.dot_dimension_numbers<[1], [0], [0], [1], [0, 0, 1, 1], [], []>} : vector<2x144xf32>, vector<144x512xf32>, vector<2x512xf32> -> vector<2x512xf32>
    %47 = vector.broadcast %1 : vector<1x512xf32> to vector<2x512xf32>
    %48 = arith.addf %46, %47 : vector<2x512xf32>
    %49 = vector.extract_strided_slice %48 {offsets = [0, 0], sizes = [2, 128], strides = [1, 1]} : vector<2x512xf32> to vector<2x128xf32>
    %50 = arith.negf %49 : vector<2x128xf32>
    %51 = math.exp %50 : vector<2x128xf32>
    %cst_19 = arith.constant 1.000000e+00 : f32
    %52 = vector.broadcast %cst_19 : f32 to vector<2x128xf32>
    %53 = arith.addf %52, %51 : vector<2x128xf32>
    %54 = arith.divf %52, %53 : vector<2x128xf32>
    %55 = vector.extract_strided_slice %48 {offsets = [0, 128], sizes = [2, 128], strides = [1, 1]} : vector<2x512xf32> to vector<2x128xf32>
    %56 = arith.negf %55 : vector<2x128xf32>
    %57 = math.exp %56 : vector<2x128xf32>
    %cst_20 = arith.constant 1.000000e+00 : f32
    %58 = vector.broadcast %cst_20 : f32 to vector<2x128xf32>
    %59 = arith.addf %58, %57 : vector<2x128xf32>
    %60 = arith.divf %58, %59 : vector<2x128xf32>
    %61 = vector.extract_strided_slice %48 {offsets = [0, 256], sizes = [2, 128], strides = [1, 1]} : vector<2x512xf32> to vector<2x128xf32>
    %62 = math.tanh %61 : vector<2x128xf32>
    %63 = vector.extract_strided_slice %48 {offsets = [0, 384], sizes = [2, 128], strides = [1, 1]} : vector<2x512xf32> to vector<2x128xf32>
    %64 = arith.negf %63 : vector<2x128xf32>
    %65 = math.exp %64 : vector<2x128xf32>
    %cst_21 = arith.constant 1.000000e+00 : f32
    %66 = vector.broadcast %cst_21 : f32 to vector<2x128xf32>
    %67 = arith.addf %66, %65 : vector<2x128xf32>
    %68 = arith.divf %66, %67 : vector<2x128xf32>
    %69 = arith.mulf %60, %35 : vector<2x128xf32>
    %70 = arith.mulf %54, %62 : vector<2x128xf32>
    %71 = arith.addf %69, %70 : vector<2x128xf32>
    %72 = math.tanh %71 : vector<2x128xf32>
    %73 = arith.mulf %68, %72 : vector<2x128xf32>
    %74 = arith.index_cast %c1_i32 : i32 to index
    %c0_22 = arith.constant 0 : index
    %c0_23 = arith.constant 0 : index
    %75 = vector.load %arg10[%74, %c0_22, %c0_23] : memref<8x2x128xf32, #tpu.memory_space<vmem>>, vector<1x2x128xf32>
    %76 = vector.shape_cast %75 : vector<1x2x128xf32> to vector<2x128xf32>
    %77 = vector.shape_cast %73 : vector<2x128xf32> to vector<1x2x128xf32>
    tpu.vector_store %arg10[%74, %c0_22, %c0_23], %77 {strides = array<i32>} : memref<8x2x128xf32, #tpu.memory_space<vmem>>, vector<1x2x128xf32>,
    %c2_i32 = arith.constant 2 : i32
    %78 = arith.index_cast %c2_i32 : i32 to index
    %c0_24 = arith.constant 0 : index
    %c0_25 = arith.constant 0 : index
    %79 = vector.load %arg0[%78, %c0_24, %c0_25] : memref<8x2x16xf32, #tpu.memory_space<vmem>>, vector<1x2x16xf32>
    %80 = vector.shape_cast %79 : vector<1x2x16xf32> to vector<2x16xf32>
    %81 = tpu.concatenate %73, %80 in 1 : vector<2x128xf32>, vector<2x16xf32> -> vector<2x144xf32>
    %cst_26 = arith.constant dense<0.000000e+00> : vector<2x512xf32>
    %82 = tpu.matmul %81, %0, %cst_26 {dimension_numbers = #tpu.dot_dimension_numbers<[1], [0], [0], [1], [0, 0, 1, 1], [], []>} : vector<2x144xf32>, vector<144x512xf32>, vector<2x512xf32> -> vector<2x512xf32>
    %83 = vector.broadcast %1 : vector<1x512xf32> to vector<2x512xf32>
    %84 = arith.addf %82, %83 : vector<2x512xf32>
    %85 = vector.extract_strided_slice %84 {offsets = [0, 0], sizes = [2, 128], strides = [1, 1]} : vector<2x512xf32> to vector<2x128xf32>
    %86 = arith.negf %85 : vector<2x128xf32>
    %87 = math.exp %86 : vector<2x128xf32>
    %cst_27 = arith.constant 1.000000e+00 : f32
    %88 = vector.broadcast %cst_27 : f32 to vector<2x128xf32>
    %89 = arith.addf %88, %87 : vector<2x128xf32>
    %90 = arith.divf %88, %89 : vector<2x128xf32>
    %91 = vector.extract_strided_slice %84 {offsets = [0, 128], sizes = [2, 128], strides = [1, 1]} : vector<2x512xf32> to vector<2x128xf32>
    %92 = arith.negf %91 : vector<2x128xf32>
    %93 = math.exp %92 : vector<2x128xf32>
    %cst_28 = arith.constant 1.000000e+00 : f32
    %94 = vector.broadcast %cst_28 : f32 to vector<2x128xf32>
    %95 = arith.addf %94, %93 : vector<2x128xf32>
    %96 = arith.divf %94, %95 : vector<2x128xf32>
    %97 = vector.extract_strided_slice %84 {offsets = [0, 256], sizes = [2, 128], strides = [1, 1]} : vector<2x512xf32> to vector<2x128xf32>
    %98 = math.tanh %97 : vector<2x128xf32>
    %99 = vector.extract_strided_slice %84 {offsets = [0, 384], sizes = [2, 128], strides = [1, 1]} : vector<2x512xf32> to vector<2x128xf32>
    %100 = arith.negf %99 : vector<2x128xf32>
    %101 = math.exp %100 : vector<2x128xf32>
    %cst_29 = arith.constant 1.000000e+00 : f32
    %102 = vector.broadcast %cst_29 : f32 to vector<2x128xf32>
    %103 = arith.addf %102, %101 : vector<2x128xf32>
    %104 = arith.divf %102, %103 : vector<2x128xf32>
    %105 = arith.mulf %96, %71 : vector<2x128xf32>
    %106 = arith.mulf %90, %98 : vector<2x128xf32>
    %107 = arith.addf %105, %106 : vector<2x128xf32>
    %108 = math.tanh %107 : vector<2x128xf32>
    %109 = arith.mulf %104, %108 : vector<2x128xf32>
    %110 = arith.index_cast %c2_i32 : i32 to index
    %c0_30 = arith.constant 0 : index
    %c0_31 = arith.constant 0 : index
    %111 = vector.load %arg10[%110, %c0_30, %c0_31] : memref<8x2x128xf32, #tpu.memory_space<vmem>>, vector<1x2x128xf32>
    %112 = vector.shape_cast %111 : vector<1x2x128xf32> to vector<2x128xf32>
    %113 = vector.shape_cast %109 : vector<2x128xf32> to vector<1x2x128xf32>
    tpu.vector_store %arg10[%110, %c0_30, %c0_31], %113 {strides = array<i32>} : memref<8x2x128xf32, #tpu.memory_space<vmem>>, vector<1x2x128xf32>,
    %c3_i32 = arith.constant 3 : i32
    %114 = arith.index_cast %c3_i32 : i32 to index
    %c0_32 = arith.constant 0 : index
    %c0_33 = arith.constant 0 : index
    %115 = vector.load %arg0[%114, %c0_32, %c0_33] : memref<8x2x16xf32, #tpu.memory_space<vmem>>, vector<1x2x16xf32>
    %116 = vector.shape_cast %115 : vector<1x2x16xf32> to vector<2x16xf32>
    %117 = tpu.concatenate %109, %116 in 1 : vector<2x128xf32>, vector<2x16xf32> -> vector<2x144xf32>
    %cst_34 = arith.constant dense<0.000000e+00> : vector<2x512xf32>
    %118 = tpu.matmul %117, %0, %cst_34 {dimension_numbers = #tpu.dot_dimension_numbers<[1], [0], [0], [1], [0, 0, 1, 1], [], []>} : vector<2x144xf32>, vector<144x512xf32>, vector<2x512xf32> -> vector<2x512xf32>
    %119 = vector.broadcast %1 : vector<1x512xf32> to vector<2x512xf32>
    %120 = arith.addf %118, %119 : vector<2x512xf32>
    %121 = vector.extract_strided_slice %120 {offsets = [0, 0], sizes = [2, 128], strides = [1, 1]} : vector<2x512xf32> to vector<2x128xf32>
    %122 = arith.negf %121 : vector<2x128xf32>
    %123 = math.exp %122 : vector<2x128xf32>
    %cst_35 = arith.constant 1.000000e+00 : f32
    %124 = vector.broadcast %cst_35 : f32 to vector<2x128xf32>
    %125 = arith.addf %124, %123 : vector<2x128xf32>
    %126 = arith.divf %124, %125 : vector<2x128xf32>
    %127 = vector.extract_strided_slice %120 {offsets = [0, 128], sizes = [2, 128], strides = [1, 1]} : vector<2x512xf32> to vector<2x128xf32>
    %128 = arith.negf %127 : vector<2x128xf32>
    %129 = math.exp %128 : vector<2x128xf32>
    %cst_36 = arith.constant 1.000000e+00 : f32
    %130 = vector.broadcast %cst_36 : f32 to vector<2x128xf32>
    %131 = arith.addf %130, %129 : vector<2x128xf32>
    %132 = arith.divf %130, %131 : vector<2x128xf32>
    %133 = vector.extract_strided_slice %120 {offsets = [0, 256], sizes = [2, 128], strides = [1, 1]} : vector<2x512xf32> to vector<2x128xf32>
    %134 = math.tanh %133 : vector<2x128xf32>
    %135 = vector.extract_strided_slice %120 {offsets = [0, 384], sizes = [2, 128], strides = [1, 1]} : vector<2x512xf32> to vector<2x128xf32>
    %136 = arith.negf %135 : vector<2x128xf32>
    %137 = math.exp %136 : vector<2x128xf32>
    %cst_37 = arith.constant 1.000000e+00 : f32
    %138 = vector.broadcast %cst_37 : f32 to vector<2x128xf32>
    %139 = arith.addf %138, %137 : vector<2x128xf32>
    %140 = arith.divf %138, %139 : vector<2x128xf32>
    %141 = arith.mulf %132, %107 : vector<2x128xf32>
    %142 = arith.mulf %126, %134 : vector<2x128xf32>
    %143 = arith.addf %141, %142 : vector<2x128xf32>
    %144 = math.tanh %143 : vector<2x128xf32>
    %145 = arith.mulf %140, %144 : vector<2x128xf32>
    %146 = arith.index_cast %c3_i32 : i32 to index
    %c0_38 = arith.constant 0 : index
    %c0_39 = arith.constant 0 : index
    %147 = vector.load %arg10[%146, %c0_38, %c0_39] : memref<8x2x128xf32, #tpu.memory_space<vmem>>, vector<1x2x128xf32>
    %148 = vector.shape_cast %147 : vector<1x2x128xf32> to vector<2x128xf32>
    %149 = vector.shape_cast %145 : vector<2x128xf32> to vector<1x2x128xf32>
    tpu.vector_store %arg10[%146, %c0_38, %c0_39], %149 {strides = array<i32>} : memref<8x2x128xf32, #tpu.memory_space<vmem>>, vector<1x2x128xf32>,
    %c4_i32 = arith.constant 4 : i32
    %150 = arith.index_cast %c4_i32 : i32 to index
    %c0_40 = arith.constant 0 : index
    %c0_41 = arith.constant 0 : index
    %151 = vector.load %arg0[%150, %c0_40, %c0_41] : memref<8x2x16xf32, #tpu.memory_space<vmem>>, vector<1x2x16xf32>
    %152 = vector.shape_cast %151 : vector<1x2x16xf32> to vector<2x16xf32>
    %153 = tpu.concatenate %145, %152 in 1 : vector<2x128xf32>, vector<2x16xf32> -> vector<2x144xf32>
    %cst_42 = arith.constant dense<0.000000e+00> : vector<2x512xf32>
    %154 = tpu.matmul %153, %0, %cst_42 {dimension_numbers = #tpu.dot_dimension_numbers<[1], [0], [0], [1], [0, 0, 1, 1], [], []>} : vector<2x144xf32>, vector<144x512xf32>, vector<2x512xf32> -> vector<2x512xf32>
    %155 = vector.broadcast %1 : vector<1x512xf32> to vector<2x512xf32>
    %156 = arith.addf %154, %155 : vector<2x512xf32>
    %157 = vector.extract_strided_slice %156 {offsets = [0, 0], sizes = [2, 128], strides = [1, 1]} : vector<2x512xf32> to vector<2x128xf32>
    %158 = arith.negf %157 : vector<2x128xf32>
    %159 = math.exp %158 : vector<2x128xf32>
    %cst_43 = arith.constant 1.000000e+00 : f32
    %160 = vector.broadcast %cst_43 : f32 to vector<2x128xf32>
    %161 = arith.addf %160, %159 : vector<2x128xf32>
    %162 = arith.divf %160, %161 : vector<2x128xf32>
    %163 = vector.extract_strided_slice %156 {offsets = [0, 128], sizes = [2, 128], strides = [1, 1]} : vector<2x512xf32> to vector<2x128xf32>
    %164 = arith.negf %163 : vector<2x128xf32>
    %165 = math.exp %164 : vector<2x128xf32>
    %cst_44 = arith.constant 1.000000e+00 : f32
    %166 = vector.broadcast %cst_44 : f32 to vector<2x128xf32>
    %167 = arith.addf %166, %165 : vector<2x128xf32>
    %168 = arith.divf %166, %167 : vector<2x128xf32>
    %169 = vector.extract_strided_slice %156 {offsets = [0, 256], sizes = [2, 128], strides = [1, 1]} : vector<2x512xf32> to vector<2x128xf32>
    %170 = math.tanh %169 : vector<2x128xf32>
    %171 = vector.extract_strided_slice %156 {offsets = [0, 384], sizes = [2, 128], strides = [1, 1]} : vector<2x512xf32> to vector<2x128xf32>
    %172 = arith.negf %171 : vector<2x128xf32>
    %173 = math.exp %172 : vector<2x128xf32>
    %cst_45 = arith.constant 1.000000e+00 : f32
    %174 = vector.broadcast %cst_45 : f32 to vector<2x128xf32>
    %175 = arith.addf %174, %173 : vector<2x128xf32>
    %176 = arith.divf %174, %175 : vector<2x128xf32>
    %177 = arith.mulf %168, %143 : vector<2x128xf32>
    %178 = arith.mulf %162, %170 : vector<2x128xf32>
    %179 = arith.addf %177, %178 : vector<2x128xf32>
    %180 = math.tanh %179 : vector<2x128xf32>
    %181 = arith.mulf %176, %180 : vector<2x128xf32>
    %182 = arith.index_cast %c4_i32 : i32 to index
    %c0_46 = arith.constant 0 : index
    %c0_47 = arith.constant 0 : index
    %183 = vector.load %arg10[%182, %c0_46, %c0_47] : memref<8x2x128xf32, #tpu.memory_space<vmem>>, vector<1x2x128xf32>
    %184 = vector.shape_cast %183 : vector<1x2x128xf32> to vector<2x128xf32>
    %185 = vector.shape_cast %181 : vector<2x128xf32> to vector<1x2x128xf32>
    tpu.vector_store %arg10[%182, %c0_46, %c0_47], %185 {strides = array<i32>} : memref<8x2x128xf32, #tpu.memory_space<vmem>>, vector<1x2x128xf32>,
    %c5_i32 = arith.constant 5 : i32
    %186 = arith.index_cast %c5_i32 : i32 to index
    %c0_48 = arith.constant 0 : index
    %c0_49 = arith.constant 0 : index
    %187 = vector.load %arg0[%186, %c0_48, %c0_49] : memref<8x2x16xf32, #tpu.memory_space<vmem>>, vector<1x2x16xf32>
    %188 = vector.shape_cast %187 : vector<1x2x16xf32> to vector<2x16xf32>
    %189 = tpu.concatenate %181, %188 in 1 : vector<2x128xf32>, vector<2x16xf32> -> vector<2x144xf32>
    %cst_50 = arith.constant dense<0.000000e+00> : vector<2x512xf32>
    %190 = tpu.matmul %189, %0, %cst_50 {dimension_numbers = #tpu.dot_dimension_numbers<[1], [0], [0], [1], [0, 0, 1, 1], [], []>} : vector<2x144xf32>, vector<144x512xf32>, vector<2x512xf32> -> vector<2x512xf32>
    %191 = vector.broadcast %1 : vector<1x512xf32> to vector<2x512xf32>
    %192 = arith.addf %190, %191 : vector<2x512xf32>
    %193 = vector.extract_strided_slice %192 {offsets = [0, 0], sizes = [2, 128], strides = [1, 1]} : vector<2x512xf32> to vector<2x128xf32>
    %194 = arith.negf %193 : vector<2x128xf32>
    %195 = math.exp %194 : vector<2x128xf32>
    %cst_51 = arith.constant 1.000000e+00 : f32
    %196 = vector.broadcast %cst_51 : f32 to vector<2x128xf32>
    %197 = arith.addf %196, %195 : vector<2x128xf32>
    %198 = arith.divf %196, %197 : vector<2x128xf32>
    %199 = vector.extract_strided_slice %192 {offsets = [0, 128], sizes = [2, 128], strides = [1, 1]} : vector<2x512xf32> to vector<2x128xf32>
    %200 = arith.negf %199 : vector<2x128xf32>
    %201 = math.exp %200 : vector<2x128xf32>
    %cst_52 = arith.constant 1.000000e+00 : f32
    %202 = vector.broadcast %cst_52 : f32 to vector<2x128xf32>
    %203 = arith.addf %202, %201 : vector<2x128xf32>
    %204 = arith.divf %202, %203 : vector<2x128xf32>
    %205 = vector.extract_strided_slice %192 {offsets = [0, 256], sizes = [2, 128], strides = [1, 1]} : vector<2x512xf32> to vector<2x128xf32>
    %206 = math.tanh %205 : vector<2x128xf32>
    %207 = vector.extract_strided_slice %192 {offsets = [0, 384], sizes = [2, 128], strides = [1, 1]} : vector<2x512xf32> to vector<2x128xf32>
    %208 = arith.negf %207 : vector<2x128xf32>
    %209 = math.exp %208 : vector<2x128xf32>
    %cst_53 = arith.constant 1.000000e+00 : f32
    %210 = vector.broadcast %cst_53 : f32 to vector<2x128xf32>
    %211 = arith.addf %210, %209 : vector<2x128xf32>
    %212 = arith.divf %210, %211 : vector<2x128xf32>
    %213 = arith.mulf %204, %179 : vector<2x128xf32>
    %214 = arith.mulf %198, %206 : vector<2x128xf32>
    %215 = arith.addf %213, %214 : vector<2x128xf32>
    %216 = math.tanh %215 : vector<2x128xf32>
    %217 = arith.mulf %212, %216 : vector<2x128xf32>
    %218 = arith.index_cast %c5_i32 : i32 to index
    %c0_54 = arith.constant 0 : index
    %c0_55 = arith.constant 0 : index
    %219 = vector.load %arg10[%218, %c0_54, %c0_55] : memref<8x2x128xf32, #tpu.memory_space<vmem>>, vector<1x2x128xf32>
    %220 = vector.shape_cast %219 : vector<1x2x128xf32> to vector<2x128xf32>
    %221 = vector.shape_cast %217 : vector<2x128xf32> to vector<1x2x128xf32>
    tpu.vector_store %arg10[%218, %c0_54, %c0_55], %221 {strides = array<i32>} : memref<8x2x128xf32, #tpu.memory_space<vmem>>, vector<1x2x128xf32>,
    %c6_i32 = arith.constant 6 : i32
    %222 = arith.index_cast %c6_i32 : i32 to index
    %c0_56 = arith.constant 0 : index
    %c0_57 = arith.constant 0 : index
    %223 = vector.load %arg0[%222, %c0_56, %c0_57] : memref<8x2x16xf32, #tpu.memory_space<vmem>>, vector<1x2x16xf32>
    %224 = vector.shape_cast %223 : vector<1x2x16xf32> to vector<2x16xf32>
    %225 = tpu.concatenate %217, %224 in 1 : vector<2x128xf32>, vector<2x16xf32> -> vector<2x144xf32>
    %cst_58 = arith.constant dense<0.000000e+00> : vector<2x512xf32>
    %226 = tpu.matmul %225, %0, %cst_58 {dimension_numbers = #tpu.dot_dimension_numbers<[1], [0], [0], [1], [0, 0, 1, 1], [], []>} : vector<2x144xf32>, vector<144x512xf32>, vector<2x512xf32> -> vector<2x512xf32>
    %227 = vector.broadcast %1 : vector<1x512xf32> to vector<2x512xf32>
    %228 = arith.addf %226, %227 : vector<2x512xf32>
    %229 = vector.extract_strided_slice %228 {offsets = [0, 0], sizes = [2, 128], strides = [1, 1]} : vector<2x512xf32> to vector<2x128xf32>
    %230 = arith.negf %229 : vector<2x128xf32>
    %231 = math.exp %230 : vector<2x128xf32>
    %cst_59 = arith.constant 1.000000e+00 : f32
    %232 = vector.broadcast %cst_59 : f32 to vector<2x128xf32>
    %233 = arith.addf %232, %231 : vector<2x128xf32>
    %234 = arith.divf %232, %233 : vector<2x128xf32>
    %235 = vector.extract_strided_slice %228 {offsets = [0, 128], sizes = [2, 128], strides = [1, 1]} : vector<2x512xf32> to vector<2x128xf32>
    %236 = arith.negf %235 : vector<2x128xf32>
    %237 = math.exp %236 : vector<2x128xf32>
    %cst_60 = arith.constant 1.000000e+00 : f32
    %238 = vector.broadcast %cst_60 : f32 to vector<2x128xf32>
    %239 = arith.addf %238, %237 : vector<2x128xf32>
    %240 = arith.divf %238, %239 : vector<2x128xf32>
    %241 = vector.extract_strided_slice %228 {offsets = [0, 256], sizes = [2, 128], strides = [1, 1]} : vector<2x512xf32> to vector<2x128xf32>
    %242 = math.tanh %241 : vector<2x128xf32>
    %243 = vector.extract_strided_slice %228 {offsets = [0, 384], sizes = [2, 128], strides = [1, 1]} : vector<2x512xf32> to vector<2x128xf32>
    %244 = arith.negf %243 : vector<2x128xf32>
    %245 = math.exp %244 : vector<2x128xf32>
    %cst_61 = arith.constant 1.000000e+00 : f32
    %246 = vector.broadcast %cst_61 : f32 to vector<2x128xf32>
    %247 = arith.addf %246, %245 : vector<2x128xf32>
    %248 = arith.divf %246, %247 : vector<2x128xf32>
    %249 = arith.mulf %240, %215 : vector<2x128xf32>
    %250 = arith.mulf %234, %242 : vector<2x128xf32>
    %251 = arith.addf %249, %250 : vector<2x128xf32>
    %252 = math.tanh %251 : vector<2x128xf32>
    %253 = arith.mulf %248, %252 : vector<2x128xf32>
    %254 = arith.index_cast %c6_i32 : i32 to index
    %c0_62 = arith.constant 0 : index
    %c0_63 = arith.constant 0 : index
    %255 = vector.load %arg10[%254, %c0_62, %c0_63] : memref<8x2x128xf32, #tpu.memory_space<vmem>>, vector<1x2x128xf32>
    %256 = vector.shape_cast %255 : vector<1x2x128xf32> to vector<2x128xf32>
    %257 = vector.shape_cast %253 : vector<2x128xf32> to vector<1x2x128xf32>
    tpu.vector_store %arg10[%254, %c0_62, %c0_63], %257 {strides = array<i32>} : memref<8x2x128xf32, #tpu.memory_space<vmem>>, vector<1x2x128xf32>,
    %c7_i32 = arith.constant 7 : i32
    %258 = arith.index_cast %c7_i32 : i32 to index
    %c0_64 = arith.constant 0 : index
    %c0_65 = arith.constant 0 : index
    %259 = vector.load %arg0[%258, %c0_64, %c0_65] : memref<8x2x16xf32, #tpu.memory_space<vmem>>, vector<1x2x16xf32>
    %260 = vector.shape_cast %259 : vector<1x2x16xf32> to vector<2x16xf32>
    %261 = tpu.concatenate %253, %260 in 1 : vector<2x128xf32>, vector<2x16xf32> -> vector<2x144xf32>
    %cst_66 = arith.constant dense<0.000000e+00> : vector<2x512xf32>
    %262 = tpu.matmul %261, %0, %cst_66 {dimension_numbers = #tpu.dot_dimension_numbers<[1], [0], [0], [1], [0, 0, 1, 1], [], []>} : vector<2x144xf32>, vector<144x512xf32>, vector<2x512xf32> -> vector<2x512xf32>
    %263 = vector.broadcast %1 : vector<1x512xf32> to vector<2x512xf32>
    %264 = arith.addf %262, %263 : vector<2x512xf32>
    %265 = vector.extract_strided_slice %264 {offsets = [0, 0], sizes = [2, 128], strides = [1, 1]} : vector<2x512xf32> to vector<2x128xf32>
    %266 = arith.negf %265 : vector<2x128xf32>
    %267 = math.exp %266 : vector<2x128xf32>
    %cst_67 = arith.constant 1.000000e+00 : f32
    %268 = vector.broadcast %cst_67 : f32 to vector<2x128xf32>
    %269 = arith.addf %268, %267 : vector<2x128xf32>
    %270 = arith.divf %268, %269 : vector<2x128xf32>
    %271 = vector.extract_strided_slice %264 {offsets = [0, 128], sizes = [2, 128], strides = [1, 1]} : vector<2x512xf32> to vector<2x128xf32>
    %272 = arith.negf %271 : vector<2x128xf32>
    %273 = math.exp %272 : vector<2x128xf32>
    %cst_68 = arith.constant 1.000000e+00 : f32
    %274 = vector.broadcast %cst_68 : f32 to vector<2x128xf32>
    %275 = arith.addf %274, %273 : vector<2x128xf32>
    %276 = arith.divf %274, %275 : vector<2x128xf32>
    %277 = vector.extract_strided_slice %264 {offsets = [0, 256], sizes = [2, 128], strides = [1, 1]} : vector<2x512xf32> to vector<2x128xf32>
    %278 = math.tanh %277 : vector<2x128xf32>
    %279 = vector.extract_strided_slice %264 {offsets = [0, 384], sizes = [2, 128], strides = [1, 1]} : vector<2x512xf32> to vector<2x128xf32>
    %280 = arith.negf %279 : vector<2x128xf32>
    %281 = math.exp %280 : vector<2x128xf32>
    %cst_69 = arith.constant 1.000000e+00 : f32
    %282 = vector.broadcast %cst_69 : f32 to vector<2x128xf32>
    %283 = arith.addf %282, %281 : vector<2x128xf32>
    %284 = arith.divf %282, %283 : vector<2x128xf32>
    %285 = arith.mulf %276, %251 : vector<2x128xf32>
    %286 = arith.mulf %270, %278 : vector<2x128xf32>
    %287 = arith.addf %285, %286 : vector<2x128xf32>
    %288 = math.tanh %287 : vector<2x128xf32>
    %289 = arith.mulf %284, %288 : vector<2x128xf32>
    %290 = arith.index_cast %c7_i32 : i32 to index
    %c0_70 = arith.constant 0 : index
    %c0_71 = arith.constant 0 : index
    %291 = vector.load %arg10[%290, %c0_70, %c0_71] : memref<8x2x128xf32, #tpu.memory_space<vmem>>, vector<1x2x128xf32>
    %292 = vector.shape_cast %291 : vector<1x2x128xf32> to vector<2x128xf32>
    %293 = vector.shape_cast %289 : vector<2x128xf32> to vector<1x2x128xf32>
    tpu.vector_store %arg10[%290, %c0_70, %c0_71], %293 {strides = array<i32>} : memref<8x2x128xf32, #tpu.memory_space<vmem>>, vector<1x2x128xf32>,
    %c8_i32 = arith.constant 8 : i32
    %c0_72 = arith.constant 0 : index
    %c0_73 = arith.constant 0 : index
    %c0_74 = arith.constant 0 : index
    %294 = vector.load %arg8[%c0_72, %c0_73, %c0_74] : memref<2x2x128xf32, #tpu.memory_space<vmem>>, vector<1x2x128xf32>
    %295 = vector.shape_cast %294 : vector<1x2x128xf32> to vector<2x128xf32>
    %296 = vector.shape_cast %289 : vector<2x128xf32> to vector<1x2x128xf32>
    tpu.vector_store %arg8[%c0_72, %c0_73, %c0_74], %296 {strides = array<i32>} : memref<2x2x128xf32, #tpu.memory_space<vmem>>, vector<1x2x128xf32>,
    %c0_75 = arith.constant 0 : index
    %c0_76 = arith.constant 0 : index
    %c0_77 = arith.constant 0 : index
    %297 = vector.load %arg9[%c0_75, %c0_76, %c0_77] : memref<2x2x128xf32, #tpu.memory_space<vmem>>, vector<1x2x128xf32>
    %298 = vector.shape_cast %297 : vector<1x2x128xf32> to vector<2x128xf32>
    %299 = vector.shape_cast %287 : vector<2x128xf32> to vector<1x2x128xf32>
    tpu.vector_store %arg9[%c0_75, %c0_76, %c0_77], %299 {strides = array<i32>} : memref<2x2x128xf32, #tpu.memory_space<vmem>>, vector<1x2x128xf32>,
    %c0_78 = arith.constant 0 : index
    %c0_79 = arith.constant 0 : index
    %300 = vector.load %arg2[%c0_78, %c0_79] : memref<256x512xf32, #tpu.memory_space<vmem>>, vector<256x512xf32>
    %c0_80 = arith.constant 0 : index
    %c0_81 = arith.constant 0 : index
    %301 = vector.load %arg4[%c0_80, %c0_81] : memref<1x512xf32, #tpu.memory_space<vmem>>, vector<1x512xf32>
    %c1 = arith.constant 1 : index
    %c0_82 = arith.constant 0 : index
    %c0_83 = arith.constant 0 : index
    %302 = vector.load %arg5[%c1, %c0_82, %c0_83] : memref<2x2x128xf32, #tpu.memory_space<vmem>>, vector<1x2x128xf32>
    %303 = vector.shape_cast %302 : vector<1x2x128xf32> to vector<2x128xf32>
    %c1_84 = arith.constant 1 : index
    %c0_85 = arith.constant 0 : index
    %c0_86 = arith.constant 0 : index
    %304 = vector.load %arg6[%c1_84, %c0_85, %c0_86] : memref<2x2x128xf32, #tpu.memory_space<vmem>>, vector<1x2x128xf32>
    %305 = vector.shape_cast %304 : vector<1x2x128xf32> to vector<2x128xf32>
    %c0_i32_87 = arith.constant 0 : i32
    %306 = arith.index_cast %c0_i32_87 : i32 to index
    %c0_88 = arith.constant 0 : index
    %c0_89 = arith.constant 0 : index
    %307 = vector.load %arg10[%306, %c0_88, %c0_89] : memref<8x2x128xf32, #tpu.memory_space<vmem>>, vector<1x2x128xf32>
    %308 = vector.shape_cast %307 : vector<1x2x128xf32> to vector<2x128xf32>
    %309 = tpu.concatenate %303, %308 in 1 : vector<2x128xf32>, vector<2x128xf32> -> vector<2x256xf32>
    %cst_90 = arith.constant dense<0.000000e+00> : vector<2x512xf32>
    %310 = tpu.matmul %309, %300, %cst_90 {dimension_numbers = #tpu.dot_dimension_numbers<[1], [0], [0], [1], [0, 0, 1, 1], [], []>} : vector<2x256xf32>, vector<256x512xf32>, vector<2x512xf32> -> vector<2x512xf32>
    %311 = vector.broadcast %301 : vector<1x512xf32> to vector<2x512xf32>
    %312 = arith.addf %310, %311 : vector<2x512xf32>
    %313 = vector.extract_strided_slice %312 {offsets = [0, 0], sizes = [2, 128], strides = [1, 1]} : vector<2x512xf32> to vector<2x128xf32>
    %314 = arith.negf %313 : vector<2x128xf32>
    %315 = math.exp %314 : vector<2x128xf32>
    %cst_91 = arith.constant 1.000000e+00 : f32
    %316 = vector.broadcast %cst_91 : f32 to vector<2x128xf32>
    %317 = arith.addf %316, %315 : vector<2x128xf32>
    %318 = arith.divf %316, %317 : vector<2x128xf32>
    %319 = vector.extract_strided_slice %312 {offsets = [0, 128], sizes = [2, 128], strides = [1, 1]} : vector<2x512xf32> to vector<2x128xf32>
    %320 = arith.negf %319 : vector<2x128xf32>
    %321 = math.exp %320 : vector<2x128xf32>
    %cst_92 = arith.constant 1.000000e+00 : f32
    %322 = vector.broadcast %cst_92 : f32 to vector<2x128xf32>
    %323 = arith.addf %322, %321 : vector<2x128xf32>
    %324 = arith.divf %322, %323 : vector<2x128xf32>
    %325 = vector.extract_strided_slice %312 {offsets = [0, 256], sizes = [2, 128], strides = [1, 1]} : vector<2x512xf32> to vector<2x128xf32>
    %326 = math.tanh %325 : vector<2x128xf32>
    %327 = vector.extract_strided_slice %312 {offsets = [0, 384], sizes = [2, 128], strides = [1, 1]} : vector<2x512xf32> to vector<2x128xf32>
    %328 = arith.negf %327 : vector<2x128xf32>
    %329 = math.exp %328 : vector<2x128xf32>
    %cst_93 = arith.constant 1.000000e+00 : f32
    %330 = vector.broadcast %cst_93 : f32 to vector<2x128xf32>
    %331 = arith.addf %330, %329 : vector<2x128xf32>
    %332 = arith.divf %330, %331 : vector<2x128xf32>
    %333 = arith.mulf %324, %305 : vector<2x128xf32>
    %334 = arith.mulf %318, %326 : vector<2x128xf32>
    %335 = arith.addf %333, %334 : vector<2x128xf32>
    %336 = math.tanh %335 : vector<2x128xf32>
    %337 = arith.mulf %332, %336 : vector<2x128xf32>
    %338 = arith.index_cast %c0_i32_87 : i32 to index
    %c0_94 = arith.constant 0 : index
    %c0_95 = arith.constant 0 : index
    %339 = vector.load %arg7[%338, %c0_94, %c0_95] : memref<8x2x128xf32, #tpu.memory_space<vmem>>, vector<1x2x128xf32>
    %340 = vector.shape_cast %339 : vector<1x2x128xf32> to vector<2x128xf32>
    %341 = vector.shape_cast %337 : vector<2x128xf32> to vector<1x2x128xf32>
    tpu.vector_store %arg7[%338, %c0_94, %c0_95], %341 {strides = array<i32>} : memref<8x2x128xf32, #tpu.memory_space<vmem>>, vector<1x2x128xf32>,
    %c1_i32_96 = arith.constant 1 : i32
    %342 = arith.index_cast %c1_i32_96 : i32 to index
    %c0_97 = arith.constant 0 : index
    %c0_98 = arith.constant 0 : index
    %343 = vector.load %arg10[%342, %c0_97, %c0_98] : memref<8x2x128xf32, #tpu.memory_space<vmem>>, vector<1x2x128xf32>
    %344 = vector.shape_cast %343 : vector<1x2x128xf32> to vector<2x128xf32>
    %345 = tpu.concatenate %337, %344 in 1 : vector<2x128xf32>, vector<2x128xf32> -> vector<2x256xf32>
    %cst_99 = arith.constant dense<0.000000e+00> : vector<2x512xf32>
    %346 = tpu.matmul %345, %300, %cst_99 {dimension_numbers = #tpu.dot_dimension_numbers<[1], [0], [0], [1], [0, 0, 1, 1], [], []>} : vector<2x256xf32>, vector<256x512xf32>, vector<2x512xf32> -> vector<2x512xf32>
    %347 = vector.broadcast %301 : vector<1x512xf32> to vector<2x512xf32>
    %348 = arith.addf %346, %347 : vector<2x512xf32>
    %349 = vector.extract_strided_slice %348 {offsets = [0, 0], sizes = [2, 128], strides = [1, 1]} : vector<2x512xf32> to vector<2x128xf32>
    %350 = arith.negf %349 : vector<2x128xf32>
    %351 = math.exp %350 : vector<2x128xf32>
    %cst_100 = arith.constant 1.000000e+00 : f32
    %352 = vector.broadcast %cst_100 : f32 to vector<2x128xf32>
    %353 = arith.addf %352, %351 : vector<2x128xf32>
    %354 = arith.divf %352, %353 : vector<2x128xf32>
    %355 = vector.extract_strided_slice %348 {offsets = [0, 128], sizes = [2, 128], strides = [1, 1]} : vector<2x512xf32> to vector<2x128xf32>
    %356 = arith.negf %355 : vector<2x128xf32>
    %357 = math.exp %356 : vector<2x128xf32>
    %cst_101 = arith.constant 1.000000e+00 : f32
    %358 = vector.broadcast %cst_101 : f32 to vector<2x128xf32>
    %359 = arith.addf %358, %357 : vector<2x128xf32>
    %360 = arith.divf %358, %359 : vector<2x128xf32>
    %361 = vector.extract_strided_slice %348 {offsets = [0, 256], sizes = [2, 128], strides = [1, 1]} : vector<2x512xf32> to vector<2x128xf32>
    %362 = math.tanh %361 : vector<2x128xf32>
    %363 = vector.extract_strided_slice %348 {offsets = [0, 384], sizes = [2, 128], strides = [1, 1]} : vector<2x512xf32> to vector<2x128xf32>
    %364 = arith.negf %363 : vector<2x128xf32>
    %365 = math.exp %364 : vector<2x128xf32>
    %cst_102 = arith.constant 1.000000e+00 : f32
    %366 = vector.broadcast %cst_102 : f32 to vector<2x128xf32>
    %367 = arith.addf %366, %365 : vector<2x128xf32>
    %368 = arith.divf %366, %367 : vector<2x128xf32>
    %369 = arith.mulf %360, %335 : vector<2x128xf32>
    %370 = arith.mulf %354, %362 : vector<2x128xf32>
    %371 = arith.addf %369, %370 : vector<2x128xf32>
    %372 = math.tanh %371 : vector<2x128xf32>
    %373 = arith.mulf %368, %372 : vector<2x128xf32>
    %374 = arith.index_cast %c1_i32_96 : i32 to index
    %c0_103 = arith.constant 0 : index
    %c0_104 = arith.constant 0 : index
    %375 = vector.load %arg7[%374, %c0_103, %c0_104] : memref<8x2x128xf32, #tpu.memory_space<vmem>>, vector<1x2x128xf32>
    %376 = vector.shape_cast %375 : vector<1x2x128xf32> to vector<2x128xf32>
    %377 = vector.shape_cast %373 : vector<2x128xf32> to vector<1x2x128xf32>
    tpu.vector_store %arg7[%374, %c0_103, %c0_104], %377 {strides = array<i32>} : memref<8x2x128xf32, #tpu.memory_space<vmem>>, vector<1x2x128xf32>,
    %c2_i32_105 = arith.constant 2 : i32
    %378 = arith.index_cast %c2_i32_105 : i32 to index
    %c0_106 = arith.constant 0 : index
    %c0_107 = arith.constant 0 : index
    %379 = vector.load %arg10[%378, %c0_106, %c0_107] : memref<8x2x128xf32, #tpu.memory_space<vmem>>, vector<1x2x128xf32>
    %380 = vector.shape_cast %379 : vector<1x2x128xf32> to vector<2x128xf32>
    %381 = tpu.concatenate %373, %380 in 1 : vector<2x128xf32>, vector<2x128xf32> -> vector<2x256xf32>
    %cst_108 = arith.constant dense<0.000000e+00> : vector<2x512xf32>
    %382 = tpu.matmul %381, %300, %cst_108 {dimension_numbers = #tpu.dot_dimension_numbers<[1], [0], [0], [1], [0, 0, 1, 1], [], []>} : vector<2x256xf32>, vector<256x512xf32>, vector<2x512xf32> -> vector<2x512xf32>
    %383 = vector.broadcast %301 : vector<1x512xf32> to vector<2x512xf32>
    %384 = arith.addf %382, %383 : vector<2x512xf32>
    %385 = vector.extract_strided_slice %384 {offsets = [0, 0], sizes = [2, 128], strides = [1, 1]} : vector<2x512xf32> to vector<2x128xf32>
    %386 = arith.negf %385 : vector<2x128xf32>
    %387 = math.exp %386 : vector<2x128xf32>
    %cst_109 = arith.constant 1.000000e+00 : f32
    %388 = vector.broadcast %cst_109 : f32 to vector<2x128xf32>
    %389 = arith.addf %388, %387 : vector<2x128xf32>
    %390 = arith.divf %388, %389 : vector<2x128xf32>
    %391 = vector.extract_strided_slice %384 {offsets = [0, 128], sizes = [2, 128], strides = [1, 1]} : vector<2x512xf32> to vector<2x128xf32>
    %392 = arith.negf %391 : vector<2x128xf32>
    %393 = math.exp %392 : vector<2x128xf32>
    %cst_110 = arith.constant 1.000000e+00 : f32
    %394 = vector.broadcast %cst_110 : f32 to vector<2x128xf32>
    %395 = arith.addf %394, %393 : vector<2x128xf32>
    %396 = arith.divf %394, %395 : vector<2x128xf32>
    %397 = vector.extract_strided_slice %384 {offsets = [0, 256], sizes = [2, 128], strides = [1, 1]} : vector<2x512xf32> to vector<2x128xf32>
    %398 = math.tanh %397 : vector<2x128xf32>
    %399 = vector.extract_strided_slice %384 {offsets = [0, 384], sizes = [2, 128], strides = [1, 1]} : vector<2x512xf32> to vector<2x128xf32>
    %400 = arith.negf %399 : vector<2x128xf32>
    %401 = math.exp %400 : vector<2x128xf32>
    %cst_111 = arith.constant 1.000000e+00 : f32
    %402 = vector.broadcast %cst_111 : f32 to vector<2x128xf32>
    %403 = arith.addf %402, %401 : vector<2x128xf32>
    %404 = arith.divf %402, %403 : vector<2x128xf32>
    %405 = arith.mulf %396, %371 : vector<2x128xf32>
    %406 = arith.mulf %390, %398 : vector<2x128xf32>
    %407 = arith.addf %405, %406 : vector<2x128xf32>
    %408 = math.tanh %407 : vector<2x128xf32>
    %409 = arith.mulf %404, %408 : vector<2x128xf32>
    %410 = arith.index_cast %c2_i32_105 : i32 to index
    %c0_112 = arith.constant 0 : index
    %c0_113 = arith.constant 0 : index
    %411 = vector.load %arg7[%410, %c0_112, %c0_113] : memref<8x2x128xf32, #tpu.memory_space<vmem>>, vector<1x2x128xf32>
    %412 = vector.shape_cast %411 : vector<1x2x128xf32> to vector<2x128xf32>
    %413 = vector.shape_cast %409 : vector<2x128xf32> to vector<1x2x128xf32>
    tpu.vector_store %arg7[%410, %c0_112, %c0_113], %413 {strides = array<i32>} : memref<8x2x128xf32, #tpu.memory_space<vmem>>, vector<1x2x128xf32>,
    %c3_i32_114 = arith.constant 3 : i32
    %414 = arith.index_cast %c3_i32_114 : i32 to index
    %c0_115 = arith.constant 0 : index
    %c0_116 = arith.constant 0 : index
    %415 = vector.load %arg10[%414, %c0_115, %c0_116] : memref<8x2x128xf32, #tpu.memory_space<vmem>>, vector<1x2x128xf32>
    %416 = vector.shape_cast %415 : vector<1x2x128xf32> to vector<2x128xf32>
    %417 = tpu.concatenate %409, %416 in 1 : vector<2x128xf32>, vector<2x128xf32> -> vector<2x256xf32>
    %cst_117 = arith.constant dense<0.000000e+00> : vector<2x512xf32>
    %418 = tpu.matmul %417, %300, %cst_117 {dimension_numbers = #tpu.dot_dimension_numbers<[1], [0], [0], [1], [0, 0, 1, 1], [], []>} : vector<2x256xf32>, vector<256x512xf32>, vector<2x512xf32> -> vector<2x512xf32>
    %419 = vector.broadcast %301 : vector<1x512xf32> to vector<2x512xf32>
    %420 = arith.addf %418, %419 : vector<2x512xf32>
    %421 = vector.extract_strided_slice %420 {offsets = [0, 0], sizes = [2, 128], strides = [1, 1]} : vector<2x512xf32> to vector<2x128xf32>
    %422 = arith.negf %421 : vector<2x128xf32>
    %423 = math.exp %422 : vector<2x128xf32>
    %cst_118 = arith.constant 1.000000e+00 : f32
    %424 = vector.broadcast %cst_118 : f32 to vector<2x128xf32>
    %425 = arith.addf %424, %423 : vector<2x128xf32>
    %426 = arith.divf %424, %425 : vector<2x128xf32>
    %427 = vector.extract_strided_slice %420 {offsets = [0, 128], sizes = [2, 128], strides = [1, 1]} : vector<2x512xf32> to vector<2x128xf32>
    %428 = arith.negf %427 : vector<2x128xf32>
    %429 = math.exp %428 : vector<2x128xf32>
    %cst_119 = arith.constant 1.000000e+00 : f32
    %430 = vector.broadcast %cst_119 : f32 to vector<2x128xf32>
    %431 = arith.addf %430, %429 : vector<2x128xf32>
    %432 = arith.divf %430, %431 : vector<2x128xf32>
    %433 = vector.extract_strided_slice %420 {offsets = [0, 256], sizes = [2, 128], strides = [1, 1]} : vector<2x512xf32> to vector<2x128xf32>
    %434 = math.tanh %433 : vector<2x128xf32>
    %435 = vector.extract_strided_slice %420 {offsets = [0, 384], sizes = [2, 128], strides = [1, 1]} : vector<2x512xf32> to vector<2x128xf32>
    %436 = arith.negf %435 : vector<2x128xf32>
    %437 = math.exp %436 : vector<2x128xf32>
    %cst_120 = arith.constant 1.000000e+00 : f32
    %438 = vector.broadcast %cst_120 : f32 to vector<2x128xf32>
    %439 = arith.addf %438, %437 : vector<2x128xf32>
    %440 = arith.divf %438, %439 : vector<2x128xf32>
    %441 = arith.mulf %432, %407 : vector<2x128xf32>
    %442 = arith.mulf %426, %434 : vector<2x128xf32>
    %443 = arith.addf %441, %442 : vector<2x128xf32>
    %444 = math.tanh %443 : vector<2x128xf32>
    %445 = arith.mulf %440, %444 : vector<2x128xf32>
    %446 = arith.index_cast %c3_i32_114 : i32 to index
    %c0_121 = arith.constant 0 : index
    %c0_122 = arith.constant 0 : index
    %447 = vector.load %arg7[%446, %c0_121, %c0_122] : memref<8x2x128xf32, #tpu.memory_space<vmem>>, vector<1x2x128xf32>
    %448 = vector.shape_cast %447 : vector<1x2x128xf32> to vector<2x128xf32>
    %449 = vector.shape_cast %445 : vector<2x128xf32> to vector<1x2x128xf32>
    tpu.vector_store %arg7[%446, %c0_121, %c0_122], %449 {strides = array<i32>} : memref<8x2x128xf32, #tpu.memory_space<vmem>>, vector<1x2x128xf32>,
    %c4_i32_123 = arith.constant 4 : i32
    %450 = arith.index_cast %c4_i32_123 : i32 to index
    %c0_124 = arith.constant 0 : index
    %c0_125 = arith.constant 0 : index
    %451 = vector.load %arg10[%450, %c0_124, %c0_125] : memref<8x2x128xf32, #tpu.memory_space<vmem>>, vector<1x2x128xf32>
    %452 = vector.shape_cast %451 : vector<1x2x128xf32> to vector<2x128xf32>
    %453 = tpu.concatenate %445, %452 in 1 : vector<2x128xf32>, vector<2x128xf32> -> vector<2x256xf32>
    %cst_126 = arith.constant dense<0.000000e+00> : vector<2x512xf32>
    %454 = tpu.matmul %453, %300, %cst_126 {dimension_numbers = #tpu.dot_dimension_numbers<[1], [0], [0], [1], [0, 0, 1, 1], [], []>} : vector<2x256xf32>, vector<256x512xf32>, vector<2x512xf32> -> vector<2x512xf32>
    %455 = vector.broadcast %301 : vector<1x512xf32> to vector<2x512xf32>
    %456 = arith.addf %454, %455 : vector<2x512xf32>
    %457 = vector.extract_strided_slice %456 {offsets = [0, 0], sizes = [2, 128], strides = [1, 1]} : vector<2x512xf32> to vector<2x128xf32>
    %458 = arith.negf %457 : vector<2x128xf32>
    %459 = math.exp %458 : vector<2x128xf32>
    %cst_127 = arith.constant 1.000000e+00 : f32
    %460 = vector.broadcast %cst_127 : f32 to vector<2x128xf32>
    %461 = arith.addf %460, %459 : vector<2x128xf32>
    %462 = arith.divf %460, %461 : vector<2x128xf32>
    %463 = vector.extract_strided_slice %456 {offsets = [0, 128], sizes = [2, 128], strides = [1, 1]} : vector<2x512xf32> to vector<2x128xf32>
    %464 = arith.negf %463 : vector<2x128xf32>
    %465 = math.exp %464 : vector<2x128xf32>
    %cst_128 = arith.constant 1.000000e+00 : f32
    %466 = vector.broadcast %cst_128 : f32 to vector<2x128xf32>
    %467 = arith.addf %466, %465 : vector<2x128xf32>
    %468 = arith.divf %466, %467 : vector<2x128xf32>
    %469 = vector.extract_strided_slice %456 {offsets = [0, 256], sizes = [2, 128], strides = [1, 1]} : vector<2x512xf32> to vector<2x128xf32>
    %470 = math.tanh %469 : vector<2x128xf32>
    %471 = vector.extract_strided_slice %456 {offsets = [0, 384], sizes = [2, 128], strides = [1, 1]} : vector<2x512xf32> to vector<2x128xf32>
    %472 = arith.negf %471 : vector<2x128xf32>
    %473 = math.exp %472 : vector<2x128xf32>
    %cst_129 = arith.constant 1.000000e+00 : f32
    %474 = vector.broadcast %cst_129 : f32 to vector<2x128xf32>
    %475 = arith.addf %474, %473 : vector<2x128xf32>
    %476 = arith.divf %474, %475 : vector<2x128xf32>
    %477 = arith.mulf %468, %443 : vector<2x128xf32>
    %478 = arith.mulf %462, %470 : vector<2x128xf32>
    %479 = arith.addf %477, %478 : vector<2x128xf32>
    %480 = math.tanh %479 : vector<2x128xf32>
    %481 = arith.mulf %476, %480 : vector<2x128xf32>
    %482 = arith.index_cast %c4_i32_123 : i32 to index
    %c0_130 = arith.constant 0 : index
    %c0_131 = arith.constant 0 : index
    %483 = vector.load %arg7[%482, %c0_130, %c0_131] : memref<8x2x128xf32, #tpu.memory_space<vmem>>, vector<1x2x128xf32>
    %484 = vector.shape_cast %483 : vector<1x2x128xf32> to vector<2x128xf32>
    %485 = vector.shape_cast %481 : vector<2x128xf32> to vector<1x2x128xf32>
    tpu.vector_store %arg7[%482, %c0_130, %c0_131], %485 {strides = array<i32>} : memref<8x2x128xf32, #tpu.memory_space<vmem>>, vector<1x2x128xf32>,
    %c5_i32_132 = arith.constant 5 : i32
    %486 = arith.index_cast %c5_i32_132 : i32 to index
    %c0_133 = arith.constant 0 : index
    %c0_134 = arith.constant 0 : index
    %487 = vector.load %arg10[%486, %c0_133, %c0_134] : memref<8x2x128xf32, #tpu.memory_space<vmem>>, vector<1x2x128xf32>
    %488 = vector.shape_cast %487 : vector<1x2x128xf32> to vector<2x128xf32>
    %489 = tpu.concatenate %481, %488 in 1 : vector<2x128xf32>, vector<2x128xf32> -> vector<2x256xf32>
    %cst_135 = arith.constant dense<0.000000e+00> : vector<2x512xf32>
    %490 = tpu.matmul %489, %300, %cst_135 {dimension_numbers = #tpu.dot_dimension_numbers<[1], [0], [0], [1], [0, 0, 1, 1], [], []>} : vector<2x256xf32>, vector<256x512xf32>, vector<2x512xf32> -> vector<2x512xf32>
    %491 = vector.broadcast %301 : vector<1x512xf32> to vector<2x512xf32>
    %492 = arith.addf %490, %491 : vector<2x512xf32>
    %493 = vector.extract_strided_slice %492 {offsets = [0, 0], sizes = [2, 128], strides = [1, 1]} : vector<2x512xf32> to vector<2x128xf32>
    %494 = arith.negf %493 : vector<2x128xf32>
    %495 = math.exp %494 : vector<2x128xf32>
    %cst_136 = arith.constant 1.000000e+00 : f32
    %496 = vector.broadcast %cst_136 : f32 to vector<2x128xf32>
    %497 = arith.addf %496, %495 : vector<2x128xf32>
    %498 = arith.divf %496, %497 : vector<2x128xf32>
    %499 = vector.extract_strided_slice %492 {offsets = [0, 128], sizes = [2, 128], strides = [1, 1]} : vector<2x512xf32> to vector<2x128xf32>
    %500 = arith.negf %499 : vector<2x128xf32>
    %501 = math.exp %500 : vector<2x128xf32>
    %cst_137 = arith.constant 1.000000e+00 : f32
    %502 = vector.broadcast %cst_137 : f32 to vector<2x128xf32>
    %503 = arith.addf %502, %501 : vector<2x128xf32>
    %504 = arith.divf %502, %503 : vector<2x128xf32>
    %505 = vector.extract_strided_slice %492 {offsets = [0, 256], sizes = [2, 128], strides = [1, 1]} : vector<2x512xf32> to vector<2x128xf32>
    %506 = math.tanh %505 : vector<2x128xf32>
    %507 = vector.extract_strided_slice %492 {offsets = [0, 384], sizes = [2, 128], strides = [1, 1]} : vector<2x512xf32> to vector<2x128xf32>
    %508 = arith.negf %507 : vector<2x128xf32>
    %509 = math.exp %508 : vector<2x128xf32>
    %cst_138 = arith.constant 1.000000e+00 : f32
    %510 = vector.broadcast %cst_138 : f32 to vector<2x128xf32>
    %511 = arith.addf %510, %509 : vector<2x128xf32>
    %512 = arith.divf %510, %511 : vector<2x128xf32>
    %513 = arith.mulf %504, %479 : vector<2x128xf32>
    %514 = arith.mulf %498, %506 : vector<2x128xf32>
    %515 = arith.addf %513, %514 : vector<2x128xf32>
    %516 = math.tanh %515 : vector<2x128xf32>
    %517 = arith.mulf %512, %516 : vector<2x128xf32>
    %518 = arith.index_cast %c5_i32_132 : i32 to index
    %c0_139 = arith.constant 0 : index
    %c0_140 = arith.constant 0 : index
    %519 = vector.load %arg7[%518, %c0_139, %c0_140] : memref<8x2x128xf32, #tpu.memory_space<vmem>>, vector<1x2x128xf32>
    %520 = vector.shape_cast %519 : vector<1x2x128xf32> to vector<2x128xf32>
    %521 = vector.shape_cast %517 : vector<2x128xf32> to vector<1x2x128xf32>
    tpu.vector_store %arg7[%518, %c0_139, %c0_140], %521 {strides = array<i32>} : memref<8x2x128xf32, #tpu.memory_space<vmem>>, vector<1x2x128xf32>,
    %c6_i32_141 = arith.constant 6 : i32
    %522 = arith.index_cast %c6_i32_141 : i32 to index
    %c0_142 = arith.constant 0 : index
    %c0_143 = arith.constant 0 : index
    %523 = vector.load %arg10[%522, %c0_142, %c0_143] : memref<8x2x128xf32, #tpu.memory_space<vmem>>, vector<1x2x128xf32>
    %524 = vector.shape_cast %523 : vector<1x2x128xf32> to vector<2x128xf32>
    %525 = tpu.concatenate %517, %524 in 1 : vector<2x128xf32>, vector<2x128xf32> -> vector<2x256xf32>
    %cst_144 = arith.constant dense<0.000000e+00> : vector<2x512xf32>
    %526 = tpu.matmul %525, %300, %cst_144 {dimension_numbers = #tpu.dot_dimension_numbers<[1], [0], [0], [1], [0, 0, 1, 1], [], []>} : vector<2x256xf32>, vector<256x512xf32>, vector<2x512xf32> -> vector<2x512xf32>
    %527 = vector.broadcast %301 : vector<1x512xf32> to vector<2x512xf32>
    %528 = arith.addf %526, %527 : vector<2x512xf32>
    %529 = vector.extract_strided_slice %528 {offsets = [0, 0], sizes = [2, 128], strides = [1, 1]} : vector<2x512xf32> to vector<2x128xf32>
    %530 = arith.negf %529 : vector<2x128xf32>
    %531 = math.exp %530 : vector<2x128xf32>
    %cst_145 = arith.constant 1.000000e+00 : f32
    %532 = vector.broadcast %cst_145 : f32 to vector<2x128xf32>
    %533 = arith.addf %532, %531 : vector<2x128xf32>
    %534 = arith.divf %532, %533 : vector<2x128xf32>
    %535 = vector.extract_strided_slice %528 {offsets = [0, 128], sizes = [2, 128], strides = [1, 1]} : vector<2x512xf32> to vector<2x128xf32>
    %536 = arith.negf %535 : vector<2x128xf32>
    %537 = math.exp %536 : vector<2x128xf32>
    %cst_146 = arith.constant 1.000000e+00 : f32
    %538 = vector.broadcast %cst_146 : f32 to vector<2x128xf32>
    %539 = arith.addf %538, %537 : vector<2x128xf32>
    %540 = arith.divf %538, %539 : vector<2x128xf32>
    %541 = vector.extract_strided_slice %528 {offsets = [0, 256], sizes = [2, 128], strides = [1, 1]} : vector<2x512xf32> to vector<2x128xf32>
    %542 = math.tanh %541 : vector<2x128xf32>
    %543 = vector.extract_strided_slice %528 {offsets = [0, 384], sizes = [2, 128], strides = [1, 1]} : vector<2x512xf32> to vector<2x128xf32>
    %544 = arith.negf %543 : vector<2x128xf32>
    %545 = math.exp %544 : vector<2x128xf32>
    %cst_147 = arith.constant 1.000000e+00 : f32
    %546 = vector.broadcast %cst_147 : f32 to vector<2x128xf32>
    %547 = arith.addf %546, %545 : vector<2x128xf32>
    %548 = arith.divf %546, %547 : vector<2x128xf32>
    %549 = arith.mulf %540, %515 : vector<2x128xf32>
    %550 = arith.mulf %534, %542 : vector<2x128xf32>
    %551 = arith.addf %549, %550 : vector<2x128xf32>
    %552 = math.tanh %551 : vector<2x128xf32>
    %553 = arith.mulf %548, %552 : vector<2x128xf32>
    %554 = arith.index_cast %c6_i32_141 : i32 to index
    %c0_148 = arith.constant 0 : index
    %c0_149 = arith.constant 0 : index
    %555 = vector.load %arg7[%554, %c0_148, %c0_149] : memref<8x2x128xf32, #tpu.memory_space<vmem>>, vector<1x2x128xf32>
    %556 = vector.shape_cast %555 : vector<1x2x128xf32> to vector<2x128xf32>
    %557 = vector.shape_cast %553 : vector<2x128xf32> to vector<1x2x128xf32>
    tpu.vector_store %arg7[%554, %c0_148, %c0_149], %557 {strides = array<i32>} : memref<8x2x128xf32, #tpu.memory_space<vmem>>, vector<1x2x128xf32>,
    %c7_i32_150 = arith.constant 7 : i32
    %558 = arith.index_cast %c7_i32_150 : i32 to index
    %c0_151 = arith.constant 0 : index
    %c0_152 = arith.constant 0 : index
    %559 = vector.load %arg10[%558, %c0_151, %c0_152] : memref<8x2x128xf32, #tpu.memory_space<vmem>>, vector<1x2x128xf32>
    %560 = vector.shape_cast %559 : vector<1x2x128xf32> to vector<2x128xf32>
    %561 = tpu.concatenate %553, %560 in 1 : vector<2x128xf32>, vector<2x128xf32> -> vector<2x256xf32>
    %cst_153 = arith.constant dense<0.000000e+00> : vector<2x512xf32>
    %562 = tpu.matmul %561, %300, %cst_153 {dimension_numbers = #tpu.dot_dimension_numbers<[1], [0], [0], [1], [0, 0, 1, 1], [], []>} : vector<2x256xf32>, vector<256x512xf32>, vector<2x512xf32> -> vector<2x512xf32>
    %563 = vector.broadcast %301 : vector<1x512xf32> to vector<2x512xf32>
    %564 = arith.addf %562, %563 : vector<2x512xf32>
    %565 = vector.extract_strided_slice %564 {offsets = [0, 0], sizes = [2, 128], strides = [1, 1]} : vector<2x512xf32> to vector<2x128xf32>
    %566 = arith.negf %565 : vector<2x128xf32>
    %567 = math.exp %566 : vector<2x128xf32>
    %cst_154 = arith.constant 1.000000e+00 : f32
    %568 = vector.broadcast %cst_154 : f32 to vector<2x128xf32>
    %569 = arith.addf %568, %567 : vector<2x128xf32>
    %570 = arith.divf %568, %569 : vector<2x128xf32>
    %571 = vector.extract_strided_slice %564 {offsets = [0, 128], sizes = [2, 128], strides = [1, 1]} : vector<2x512xf32> to vector<2x128xf32>
    %572 = arith.negf %571 : vector<2x128xf32>
    %573 = math.exp %572 : vector<2x128xf32>
    %cst_155 = arith.constant 1.000000e+00 : f32
    %574 = vector.broadcast %cst_155 : f32 to vector<2x128xf32>
    %575 = arith.addf %574, %573 : vector<2x128xf32>
    %576 = arith.divf %574, %575 : vector<2x128xf32>
    %577 = vector.extract_strided_slice %564 {offsets = [0, 256], sizes = [2, 128], strides = [1, 1]} : vector<2x512xf32> to vector<2x128xf32>
    %578 = math.tanh %577 : vector<2x128xf32>
    %579 = vector.extract_strided_slice %564 {offsets = [0, 384], sizes = [2, 128], strides = [1, 1]} : vector<2x512xf32> to vector<2x128xf32>
    %580 = arith.negf %579 : vector<2x128xf32>
    %581 = math.exp %580 : vector<2x128xf32>
    %cst_156 = arith.constant 1.000000e+00 : f32
    %582 = vector.broadcast %cst_156 : f32 to vector<2x128xf32>
    %583 = arith.addf %582, %581 : vector<2x128xf32>
    %584 = arith.divf %582, %583 : vector<2x128xf32>
    %585 = arith.mulf %576, %551 : vector<2x128xf32>
    %586 = arith.mulf %570, %578 : vector<2x128xf32>
    %587 = arith.addf %585, %586 : vector<2x128xf32>
    %588 = math.tanh %587 : vector<2x128xf32>
    %589 = arith.mulf %584, %588 : vector<2x128xf32>
    %590 = arith.index_cast %c7_i32_150 : i32 to index
    %c0_157 = arith.constant 0 : index
    %c0_158 = arith.constant 0 : index
    %591 = vector.load %arg7[%590, %c0_157, %c0_158] : memref<8x2x128xf32, #tpu.memory_space<vmem>>, vector<1x2x128xf32>
    %592 = vector.shape_cast %591 : vector<1x2x128xf32> to vector<2x128xf32>
    %593 = vector.shape_cast %589 : vector<2x128xf32> to vector<1x2x128xf32>
    tpu.vector_store %arg7[%590, %c0_157, %c0_158], %593 {strides = array<i32>} : memref<8x2x128xf32, #tpu.memory_space<vmem>>, vector<1x2x128xf32>,
    %c8_i32_159 = arith.constant 8 : i32
    %c1_160 = arith.constant 1 : index
    %c0_161 = arith.constant 0 : index
    %c0_162 = arith.constant 0 : index
    %594 = vector.load %arg8[%c1_160, %c0_161, %c0_162] : memref<2x2x128xf32, #tpu.memory_space<vmem>>, vector<1x2x128xf32>
    %595 = vector.shape_cast %594 : vector<1x2x128xf32> to vector<2x128xf32>
    %596 = vector.shape_cast %589 : vector<2x128xf32> to vector<1x2x128xf32>
    tpu.vector_store %arg8[%c1_160, %c0_161, %c0_162], %596 {strides = array<i32>} : memref<2x2x128xf32, #tpu.memory_space<vmem>>, vector<1x2x128xf32>,
    %c1_163 = arith.constant 1 : index
    %c0_164 = arith.constant 0 : index
    %c0_165 = arith.constant 0 : index
    %597 = vector.load %arg9[%c1_163, %c0_164, %c0_165] : memref<2x2x128xf32, #tpu.memory_space<vmem>>, vector<1x2x128xf32>
    %598 = vector.shape_cast %597 : vector<1x2x128xf32> to vector<2x128xf32>
    %599 = vector.shape_cast %587 : vector<2x128xf32> to vector<1x2x128xf32>
    tpu.vector_store %arg9[%c1_163, %c0_164, %c0_165], %599 {strides = array<i32>} : memref<2x2x128xf32, #tpu.memory_space<vmem>>, vector<1x2x128xf32>,
    return
  }
}

</mosaic_0001>

<bundles_post_ra>
// kernel: tpu_custom_call.1
= control target key start
LH: loop header
LB: loop body
LE: loop exit
PB: predicated region body
PF: predicated region fallthrough
CT: control target
= control target key end

     0   :  { %15 = vsyncpa [#allocation4], 0  ;;  %s6533_s0 = inlined_call_operand.hbm [shape: f32[8,2,16], index: 0, kind: input, shape index: {}]   ;;  %s6534_s1 = inlined_call_operand.hbm [shape: f32[144,512], index: 1, kind: input, shape index: {}]   ;;  %s6535_s2 = inlined_call_operand.hbm [shape: f32[256,512], index: 2, kind: input, shape index: {}]   ;;  %s6536_s3 = inlined_call_operand.vmem [shape: f32[1,512], index: 3, kind: input, shape index: {}]   ;;  %s6537_s4 = inlined_call_operand.vmem [shape: f32[1,512], index: 4, kind: input, shape index: {}]   ;;  %s6538_s5 = inlined_call_operand.vmem [shape: f32[2,2,128], index: 5, kind: input, shape index: {}]   ;;  %s6539_s6 = inlined_call_operand.vmem [shape: f32[2,2,128], index: 6, kind: input, shape index: {}]   ;;  %s6540_s7 = inlined_call_operand.hbm [shape: f32[8,2,128], index: 7, kind: output, shape index: {0}]   ;;  %s6541_s8 = inlined_call_operand.hbm [shape: f32[2,2,128], index: 8, kind: output, shape index: {1}]   ;;  %s6542_s9 = inlined_call_operand.hbm [shape: f32[2,2,128], index: 9, kind: output, shape index: {2}]  }
   0x1   :  { %16 = vsyncpa [#allocation7], 0 }
   0x2   :  { %17 = vsyncpa [#allocation5], 0 }
   0x3   :  { %18 = vsyncpa [#allocation11], 0  ;;  %s5182_s30 = smov [#allocation6]   ;;  %s5042_s13 = scalar_lea.hbm %s6534_s1, 9216 }
   0x4   :  { %s36_s10 = sshll.u32 %s5182_s30, 4  ;;  %p5043_p0 = scmp.ne.s32.totalorder %s6534_s1, %s5042_s13  ;;  %s37_s10 = int_to_ptr.vmem [resolvable:$true] %s36_s10 }
   0x5   :  { %p5046_p1 = scmp.lt.u32.totalorder %s5042_s13, %s6534_s1 }
   0x7   :  { %p5048_p2 = pnand %p5046_p1, %p5043_p0 }
   0x9   :  { %5051 = shalt.err (!%p5048_p2)
}
   0xa   :  { %s5052_s18 = scalar_lea.vmem %s37_s10, 9216  ;;  %p5057_p4 = scmp.lt.s32.totalorder %s37_s10, %s37_s10 }
   0xb   :  { %p5053_p3 = scmp.ne.s32.totalorder %s37_s10, %s5052_s18  ;;  %p5058_p5 = scmp.lt.s32.totalorder %s5052_s18, %s5052_s18 }
   0xd   :  { %p5059_p6 = por %p5058_p5, %p5057_p4 }
   0xf   :  { %p5060_p7 = pnand %p5059_p6, %p5053_p3 }
  0x11   :  { %5063 = shalt.err (!%p5060_p7)
}
  0x12   :  { %s5183_s19 = smov 512   ;;  %s5184_s20 = smov 32  }
  0x13   :  { %42 = dma.hbm_to_vmem [thread:$0]  %s6534_s1, 9216, %s37_s10, [#allocation7], %s5183_s19, %s5183_s19, %s5184_s20  }
  0x14   :  { %s5185_s23 = smov [#allocation3]   ;;  %s5064_s27 = scalar_lea.hbm %s6533_s0, 256 }
  0x15   :  { %s24_s24 = sshll.u32 %s5185_s23, 4  ;;  %p5065_p8 = scmp.ne.s32.totalorder %s6533_s0, %s5064_s27  ;;  %s25_s24 = int_to_ptr.vmem [resolvable:$true] %s24_s24 }
  0x16   :  { %p5068_p9 = scmp.lt.u32.totalorder %s5064_s27, %s6533_s0 }
  0x18   :  { %p5070_p10 = pnand %p5068_p9, %p5065_p8 }
  0x1a   :  { %5073 = shalt.err (!%p5070_p10)
}
  0x1b   :  { %s5074_s12 = scalar_lea.vmem %s25_s24, 256  ;;  %p5079_p12 = scmp.lt.s32.totalorder %s25_s24, %s25_s24 }
  0x1c   :  { %p5075_p11 = scmp.ne.s32.totalorder %s25_s24, %s5074_s12  ;;  %p5080_p13 = scmp.lt.s32.totalorder %s5074_s12, %s5074_s12 }
  0x1e   :  { %p5081_p0 = por %p5080_p13, %p5079_p12 }
  0x20   :  { %p5082_p1 = pnand %p5081_p0, %p5075_p11 }
  0x22   :  { %5085 = shalt.err (!%p5082_p1)
}
  0x23   :  { %s5186_s1 = smov 2   ;;  %s5187_s14 = smov [#allocation8]  }
  0x24   :  { %30 = dma.hbm_to_vmem [thread:$0]  %s6533_s0, 256, %s25_s24, [#allocation4], %s5184_s20, %s5184_s20, %s5186_s1  }
  0x25   :  { %s48_s15 = sshll.u32 %s5187_s14, 4  ;;  %s5086_s18 = scalar_lea.hbm %s6535_s2, 16384  ;;  %s49_s15 = int_to_ptr.vmem [resolvable:$true] %s48_s15 }
  0x26   :  { %p5087_p2 = scmp.ne.s32.totalorder %s6535_s2, %s5086_s18  ;;  %p5090_p3 = scmp.lt.u32.totalorder %s5086_s18, %s6535_s2 }
  0x28   :  { %p5092_p4 = pnand %p5090_p3, %p5087_p2 }
  0x2a   :  { %5095 = shalt.err (!%p5092_p4)
}
  0x2b   :  { %s5096_s26 = scalar_lea.vmem %s49_s15, 16384  ;;  %p5101_p6 = scmp.lt.s32.totalorder %s49_s15, %s49_s15 }
  0x2c   :  { %p5097_p5 = scmp.ne.s32.totalorder %s49_s15, %s5096_s26  ;;  %p5102_p7 = scmp.lt.s32.totalorder %s5096_s26, %s5096_s26 }
  0x2e   :  { %p5103_p8 = por %p5102_p7, %p5101_p6 }
  0x30   :  { %p5104_p9 = pnand %p5103_p8, %p5097_p5 }
  0x32   :  { %5107 = shalt.err (!%p5104_p9)
}
  0x33   :  { %54 = dma.hbm_to_vmem [thread:$0]  %s6535_s2, 16384, %s49_s15, [#allocation7], %s5183_s19, %s5183_s19, %s5184_s20  }
  0x34   :  { %5174 = dma.done.wait [#allocation4], 256  }
  0x35   :  { %5175 = vsyncadd [#allocation4], 4294967040 }
  0x36   :  { %5176 = dma.done.wait [#allocation7], 25600  }
  0x37   :  { %5177 = vsyncadd [#allocation7], 4294941696  ;;  %v73_v0 = vld [vmem:[#allocation6 + $0x8] sm:$0xff]  ;;  %v72_v2 = vld [vmem:[#allocation6] sm:$0xff]  ;;  %vm169_vm0 = vcmask 130048   ;;  %s5189_s14 = smov [#allocation9]  }
  0x38   :  { %v77_v1 = vld [vmem:[#allocation6 + $0x28] sm:$0xff]  ;;  %v76_v4 = vld [vmem:[#allocation6 + $0x20] sm:$0xff]  ;;  %v75_v18 = vld [vmem:[#allocation6 + $0x18] sm:$0xff]  ;;  %s3067_s15 = sshll.u32 %s5189_s14, 4  ;;  %s5190_s16 = smov [#allocation12]   ;;  %s6474_s15 = int_to_ptr.vmem [resolvable:$true] %s3067_s15 }
  0x39   :  { %v5286_v3 = vpack.c.bf16 %v77_v1, %v73_v0  ;;  %v81_v5 = vld [vmem:[#allocation6 + $0x48] sm:$0xff]  ;;  %v5288_v7 = vpack.c.bf16 %v76_v4, %v72_v2  ;;  %v80_v9 = vld [vmem:[#allocation6 + $0x40] sm:$0xff]  ;;  %v79_v19 = vld [vmem:[#allocation6 + $0x38] sm:$0xff]  ;;  %s3091_s17 = sshll.u32 %s5190_s16, 4  ;;  %s6476_s17 = int_to_ptr.vmem [resolvable:$true] %s3091_s17 }
  0x3a   :  { %v85_v6 = vld [vmem:[#allocation6 + $0x68] sm:$0xff]  ;;  %v84_v10 = vld [vmem:[#allocation6 + $0x60] sm:$0xff]  ;;  %v5299_v21 = vpack.c.bf16 %v79_v19, %v75_v18  ;;  %v74_v22 = vld [vmem:[#allocation6 + $0x10] sm:$0xff] }
  0x3b   :  { %v5290_v8 = vpack.c.bf16 %v85_v6, %v81_v5  ;;  %v89_v11 = vld [vmem:[#allocation6 + $0x88] sm:$0xff]  ;;  %3178 = vmatprep.subr.bf16.mxu0 %v5286_v3  ;;  %v5294_v13 = vpack.c.bf16 %v84_v10, %v80_v9  ;;  %v88_v14 = vld [vmem:[#allocation6 + $0x80] sm:$0xff]  ;;  %v78_v23 = vld [vmem:[#allocation6 + $0x30] sm:$0xff] }
  0x3c   :  { %v93_v12 = vld [vmem:[#allocation6 + $0xa8] sm:$0xff]  ;;  %3180 = vmatpush1.bf16.msra.mxu0 %v5288_v7  ;;  %v92_v15 = vld [vmem:[#allocation6 + $0xa0] sm:$0xff]  ;;  %v5301_v24 = vpack.c.bf16 %v78_v23, %v74_v22  ;;  %3214 = vmatprep.subr.bf16.mxu1 %v5299_v21  ;;  %v83_v26 = vld [vmem:[#allocation6 + $0x58] sm:$0xff] }
  0x3d   :  { %3182 = vmatprep.subr.bf16.mxu0 %v5290_v8  ;;  %v5297_v16 = vpack.c.bf16 %v93_v12, %v89_v11  ;;  %v97_v17 = vld [vmem:[#allocation6 + $0xc8] sm:$0xff]  ;;  %v5304_v25 = vpack.c.bf16 %v92_v15, %v88_v14  ;;  %v87_v27 = vld [vmem:[#allocation6 + $0x78] sm:$0xff]  ;;  %v82_v28 = vld [vmem:[#allocation6 + $0x50] sm:$0xff] }
  0x3e   :  { %v101_v20 = vld [vmem:[#allocation6 + $0xe8] sm:$0xff]  ;;  %v96_v30 = vld [vmem:[#allocation6 + $0xc0] sm:$0xff]  ;;  %3216 = vmatpush1.bf16.msra.mxu1 %v5301_v24  ;;  %v5311_v32 = vpack.c.bf16 %v87_v27, %v83_v26  ;;  %v86_v33 = vld [vmem:[#allocation6 + $0x70] sm:$0xff] }
  0x3f   :  { %v5308_v29 = vpack.c.bf16 %v101_v20, %v97_v17  ;;  %v100_v31 = vld [vmem:[#allocation6 + $0xe0] sm:$0xff]  ;;  %v105_v34 = vld [vmem:[#allocation6 + $0x108] sm:$0xff]  ;;  %v5313_v36 = vpack.c.bf16 %v86_v33, %v82_v28  ;;  %v91_v37 = vld [vmem:[#allocation6 + $0x98] sm:$0xff] }
  0x40   :  { %3184 = vmatpush1.bf16.msra.mxu0 %v5294_v13  ;;  %v109_v35 = vld [vmem:[#allocation6 + $0x128] sm:$0xff]  ;;  %3218 = vmatprep.subr.bf16.mxu1 %v5311_v32  ;;  %v95_v38 = vld [vmem:[#allocation6 + $0xb8] sm:$0xff]  ;;  %v90_v39 = vld [vmem:[#allocation6 + $0x90] sm:$0xff]  ;;  %v5317_v41 = vpack.c.bf16 %v100_v31, %v96_v30 }
  0x41   :  { %3186 = vmatprep.subr.bf16.mxu0 %v5297_v16  ;;  %v94_v40 = vld [vmem:[#allocation6 + $0xb0] sm:$0xff]  ;;  %v104_v42 = vld [vmem:[#allocation6 + $0x100] sm:$0xff]  ;;  %v5319_v44 = vpack.c.bf16 %v95_v38, %v91_v37  ;;  %v5322_v45 = vpack.c.bf16 %v109_v35, %v105_v34  ;;  %v113_v46 = vld [vmem:[#allocation6 + $0x148] sm:$0xff] }
  0x42   :  { %v108_v43 = vld [vmem:[#allocation6 + $0x120] sm:$0xff]  ;;  %3220 = vmatpush1.bf16.msra.mxu1 %v5313_v36  ;;  %v5325_v47 = vpack.c.bf16 %v94_v40, %v90_v39  ;;  %v99_v48 = vld [vmem:[#allocation6 + $0xd8] sm:$0xff]  ;;  %v117_v50 = vld [vmem:[#allocation6 + $0x168] sm:$0xff] }
  0x43   :  { %v103_v49 = vld [vmem:[#allocation6 + $0xf8] sm:$0xff]  ;;  %3222 = vmatprep.subr.bf16.mxu1 %v5319_v44  ;;  %v98_v52 = vld [vmem:[#allocation6 + $0xd0] sm:$0xff]  ;;  %v5331_v54 = vpack.c.bf16 %v108_v43, %v104_v42  ;;  %v5334_v57 = vpack.c.bf16 %v117_v50, %v113_v46  ;;  %v112_v58 = vld [vmem:[#allocation6 + $0x140] sm:$0xff] }
  0x44   :  { %3188 = vmatpush1.bf16.msra.mxu0 %v5304_v25  ;;  %v5328_v51 = vpack.c.bf16 %v103_v49, %v99_v48  ;;  %v102_v53 = vld [vmem:[#allocation6 + $0xf0] sm:$0xff]  ;;  %v107_v55 = vld [vmem:[#allocation6 + $0x118] sm:$0xff]  ;;  %v116_v59 = vld [vmem:[#allocation6 + $0x160] sm:$0xff] }
  0x45   :  { %3190 = vmatprep.subr.bf16.mxu0 %v5308_v29  ;;  %v111_v56 = vld [vmem:[#allocation6 + $0x138] sm:$0xff]  ;;  %v121_v60 = vld [vmem:[#allocation6 + $0x188] sm:$0xff]  ;;  %v5337_v61 = vpack.c.bf16 %v102_v53, %v98_v52  ;;  %v106_v0 = vld [vmem:[#allocation6 + $0x110] sm:$0xff]  ;;  %v5343_v6 = vpack.c.bf16 %v116_v59, %v112_v58 }
  0x46   :  { %3224 = vmatpush1.bf16.msra.mxu1 %v5325_v47  ;;  %v125_v62 = vld [vmem:[#allocation6 + $0x1a8] sm:$0xff]  ;;  %v5340_v63 = vpack.c.bf16 %v111_v56, %v107_v55  ;;  %v110_v1 = vld [vmem:[#allocation6 + $0x130] sm:$0xff]  ;;  %v115_v2 = vld [vmem:[#allocation6 + $0x158] sm:$0xff] }
  0x47   :  { %3226 = vmatprep.subr.bf16.mxu1 %v5328_v51  ;;  %v119_v4 = vld [vmem:[#allocation6 + $0x178] sm:$0xff]  ;;  %v147_v5 = vld [vmem:[#allocation3] sm:$0x3]  ;;  %v5347_v9 = vpack.c.bf16 %v125_v62, %v121_v60  ;;  %v120_v10 = vld [vmem:[#allocation6 + $0x180] sm:$0xff]  ;;  %v5350_v14 = vpack.c.bf16 %v110_v1, %v106_v0 }
  0x48   :  { %3192 = vmatpush1.bf16.msra.mxu0 %v5317_v41  ;;  %3111 = vmatprep.mubr.msk.f32.mxu0 %vm169_vm0, %v147_v5  ;;  %v124_v11 = vld [vmem:[#allocation6 + $0x1a0] sm:$0xff]  ;;  %v129_v12 = vld [vmem:[#allocation6 + $0x1c8] sm:$0xff]  ;;  %v5353_v17 = vpack.c.bf16 %v119_v4, %v115_v2  ;;  %v114_v18 = vld [vmem:[#allocation6 + $0x150] sm:$0xff]  ;;  %v149_v4 = vlaneseq }
  0x49   :  { %3194 = vmatprep.subr.bf16.mxu0 %v5322_v45  ;;  %v133_v15 = vld [vmem:[#allocation6 + $0x1e8] sm:$0xff]  ;;  %v118_v19 = vld [vmem:[#allocation6 + $0x170] sm:$0xff]  ;;  %3112 = vmatprep.mubr.msk.f32.mxu1 %vm169_vm0, %v147_v5  ;;  %v123_v20 = vld [vmem:[#allocation6 + $0x198] sm:$0xff]  ;;  %v5357_v23 = vpack.c.bf16 %v124_v11, %v120_v10 }
  0x4a   :  { %3228 = vmatpush1.bf16.msra.mxu1 %v5337_v61  ;;  %v127_v22 = vld [vmem:[#allocation6 + $0x1b8] sm:$0xff]  ;;  %v5360_v26 = vpack.c.bf16 %v133_v15, %v129_v12  ;;  %v128_v27 = vld [vmem:[#allocation6 + $0x1c0] sm:$0xff]  ;;  %v137_v30 = vld [vmem:[#allocation6 + $0x208] sm:$0xff]  ;;  %v5363_v31 = vpack.c.bf16 %v118_v19, %v114_v18  ;;  %v5439_v5 = vshrl.u32 %v149_v4, 7 }
  0x4b   :  { %3230 = vmatprep.subr.bf16.mxu1 %v5340_v63  ;;  %v132_v28 = vld [vmem:[#allocation6 + $0x1e0] sm:$0xff]  ;;  %v141_v33 = vld [vmem:[#allocation6 + $0x228] sm:$0xff]  ;;  %v5366_v34 = vpack.c.bf16 %v127_v22, %v123_v20  ;;  %v122_v35 = vld [vmem:[#allocation6 + $0x190] sm:$0xff] }
  0x4c   :  { %3196 = vmatpush1.bf16.msra.mxu0 %v5331_v54  ;;  %v126_v37 = vld [vmem:[#allocation6 + $0x1b0] sm:$0xff]  ;;  %v131_v38 = vld [vmem:[#allocation6 + $0x1d8] sm:$0xff]  ;;  %v5369_v40 = vpack.c.bf16 %v132_v28, %v128_v27  ;;  %v5372_v42 = vpack.c.bf16 %v141_v33, %v137_v30  ;;  %v136_v43 = vld [vmem:[#allocation6 + $0x200] sm:$0xff]  ;;  %6607 = vst [vmem:[#allocation17_spill] sm:$0xff] %v5439_v5  ;;  %v6546_v10 = vsub.s32 0, %v5439_v5  ;;  %v6545_v12 = vsub.s32 1, %v5439_v5 }
  0x4d   :  { %3198 = vmatprep.subr.bf16.mxu0 %v5334_v57  ;;  %v135_v39 = vld [vmem:[#allocation6 + $0x1f8] sm:$0xff]  ;;  %v140_v46 = vld [vmem:[#allocation6 + $0x220] sm:$0xff]  ;;  %v5375_v48 = vpack.c.bf16 %v126_v37, %v122_v35  ;;  %v130_v50 = vld [vmem:[#allocation6 + $0x1d0] sm:$0xff]  ;;  %v6544_v19 = vsub.s32 3, %v5439_v5  ;;  %v6543_v37 = vsub.s32 2, %v5439_v5 }
  0x4e   :  { %3232 = vmatpush1.bf16.msra.mxu1 %v5350_v14  ;;  %v5378_v49 = vpack.c.bf16 %v135_v39, %v131_v38  ;;  %v134_v52 = vld [vmem:[#allocation6 + $0x1f0] sm:$0xff]  ;;  %v139_v53 = vld [vmem:[#allocation6 + $0x218] sm:$0xff]  ;;  %v5381_v56 = vpack.c.bf16 %v140_v46, %v136_v43  ;;  %v145_v0 = vld [vmem:[%s6538_s5] sm:$0x3] }
  0x4f   :  { %3234 = vmatprep.subr.bf16.mxu1 %v5353_v17  ;;  %v143_v55 = vld [vmem:[#allocation6 + $0x238] sm:$0xff]  ;;  %v5385_v58 = vpack.c.bf16 %v134_v52, %v130_v50  ;;  %v138_v60 = vld [vmem:[#allocation6 + $0x210] sm:$0xff]  ;;  %v144_v11 = vld [vmem:[%s6536_s3] sm:$0xf] }
  0x50   :  { %3200 = vmatpush1.bf16.msra.mxu0 %v5343_v6  ;;  %v5388_v59 = vpack.c.bf16 %v143_v55, %v139_v53  ;;  %v142_v62 = vld [vmem:[#allocation6 + $0x230] sm:$0xff]  ;;  %v5448_v15 = vrot.slane %v144_v11, %v6546_v10  ;;  %v5452_v18 = vrot.slane %v144_v11, %v6545_v12  ;;  %v5459_v33 = vrot.slane %v144_v11, %v6544_v19  ;;  %v146_v4 = vld [vmem:[%s6539_s6] sm:$0x3]  ;;  %v1646_v19 = vld [vmem:[#allocation8 + $0x2e8] sm:$0xff] }
  0x51   :  { %3202 = vmatprep.subr.bf16.mxu0 %v5347_v9  ;;  %v5395_v1 = vpack.c.bf16 %v142_v62, %v138_v60  ;;  %v341_v2 = vld [vmem:[#allocation3 + $0x2] sm:$0x3]  ;;  %v5465_v46 = vrot.slane %v144_v11, %v6543_v37  ;;  %v1642_v37 = vld [vmem:[#allocation8 + $0x2c8] sm:$0xff]  ;;  %v1644_v12 = vld [vmem:[#allocation8 + $0x2d8] sm:$0xff] }
  0x52   :  { %3236 = vmatpush1.bf16.msra.mxu1 %v5363_v31  ;;  %6608 = vst [vmem:[#allocation18_spill] sm:$0xff] %v5448_v15  ;;  %6609 = vst [vmem:[#allocation19_spill] sm:$0xff] %v5452_v18  ;;  %v1648_v10 = vld [vmem:[#allocation8 + $0x2f8] sm:$0xff]  ;;  %v1650_v5 = vld [vmem:[#allocation8 + $0x308] sm:$0xff] }
  0x53   :  { %3238 = vmatprep.subr.bf16.mxu1 %v5366_v34  ;;  %6610 = vst [vmem:[#allocation20_spill] sm:$0xff] %v5459_v33  ;;  %6611 = vst [vmem:[#allocation21_spill] sm:$0xff] %v5465_v46 }
  0x54   :  { %3204 = vmatpush1.bf16.msra.mxu0 %v5357_v23 }
  0x55   :  { %3206 = vmatprep.subr.bf16.mxu0 %v5360_v26 }
  0x56   :  { %3240 = vmatpush1.bf16.msra.mxu1 %v5375_v48 }
  0x57   :  { %3242 = vmatprep.subr.bf16.mxu1 %v5378_v49 }
  0x58   :  { %3208 = vmatpush1.bf16.msra.mxu0 %v5369_v40 }
  0x59   :  { %3210 = vmatprep.subr.bf16.mxu0 %v5372_v42 }
  0x5a   :  { %3244 = vmatpush1.bf16.msra.mxu1 %v5385_v58 }
  0x5b   :  { %3246 = vmatprep.subr.bf16.mxu1 %v5388_v59 }
  0x5c   :  { %3212 = vmatpush1.bf16.msra.mxu0 %v5381_v56 }
  0x5d   :  { %3250 = vmatprep.subr.bf16.mxu0 %v5286_v3 }
  0x5e   :  { %3248 = vmatpush1.bf16.msra.mxu1 %v5395_v1 }
  0x5f   :  { %238 = vmatmul.mubr.f32.vlgmr.msra.gmra.mrb[0].mxu0 %v145_v0  ;;  %3286 = vmatprep.subr.bf16.mxu1 %v5299_v21 }
  0x60   :  { %3252 = vmatpush1.bf16.msra.mxu0 %v5288_v7  ;;  %3116 = vmatprep.mubr.msk.f32.mxu0 %vm169_vm0, %v341_v2 }
  0x61   :  { %3254 = vmatprep.subr.bf16.mxu0 %v5290_v8  ;;  %309 = vmatmul.mubr.f32.vlgmr.msra.gmra.mrb[0].mxu1 %v145_v0 }
  0x62   :  { %3288 = vmatpush1.bf16.msra.mxu1 %v5301_v24  ;;  %3117 = vmatprep.mubr.msk.f32.mxu1 %vm169_vm0, %v341_v2 }
  0x63   :  { %3290 = vmatprep.subr.bf16.mxu1 %v5311_v32 }
  0x64   :  { %3256 = vmatpush1.bf16.msra.mxu0 %v5294_v13 }
  0x65   :  { %3258 = vmatprep.subr.bf16.mxu0 %v5297_v16 }
  0x66   :  { %3292 = vmatpush1.bf16.msra.mxu1 %v5313_v36 }
  0x67   :  { %3294 = vmatprep.subr.bf16.mxu1 %v5319_v44 }
  0x68   :  { %3260 = vmatpush1.bf16.msra.mxu0 %v5304_v25 }
  0x69   :  { %3262 = vmatprep.subr.bf16.mxu0 %v5308_v29 }
  0x6a   :  { %3296 = vmatpush1.bf16.msra.mxu1 %v5325_v47 }
  0x6b   :  { %3298 = vmatprep.subr.bf16.mxu1 %v5328_v51 }
  0x6c   :  { %3264 = vmatpush1.bf16.msra.mxu0 %v5317_v41 }
  0x6d   :  { %3266 = vmatprep.subr.bf16.mxu0 %v5322_v45 }
  0x6e   :  { %3300 = vmatpush1.bf16.msra.mxu1 %v5337_v61 }
  0x6f   :  { %3302 = vmatprep.subr.bf16.mxu1 %v5340_v63 }
  0x70   :  { %3268 = vmatpush1.bf16.msra.mxu0 %v5331_v54 }
  0x71   :  { %3270 = vmatprep.subr.bf16.mxu0 %v5334_v57 }
  0x72   :  { %3304 = vmatpush1.bf16.msra.mxu1 %v5350_v14 }
  0x73   :  { %3306 = vmatprep.subr.bf16.mxu1 %v5353_v17 }
  0x74   :  { %3272 = vmatpush1.bf16.msra.mxu0 %v5343_v6 }
  0x75   :  { %3274 = vmatprep.subr.bf16.mxu0 %v5347_v9 }
  0x76   :  { %3308 = vmatpush1.bf16.msra.mxu1 %v5363_v31 }
  0x77   :  { %3310 = vmatprep.subr.bf16.mxu1 %v5366_v34 }
  0x78   :  { %3276 = vmatpush1.bf16.msra.mxu0 %v5357_v23 }
  0x79   :  { %3278 = vmatprep.subr.bf16.mxu0 %v5360_v26 }
  0x7a   :  { %3312 = vmatpush1.bf16.msra.mxu1 %v5375_v48 }
  0x7b   :  { %3314 = vmatprep.subr.bf16.mxu1 %v5378_v49 }
  0x7c   :  { %3280 = vmatpush1.bf16.msra.mxu0 %v5369_v40 }
  0x7d   :  { %3282 = vmatprep.subr.bf16.mxu0 %v5372_v42 }
  0x7e   :  { %3316 = vmatpush1.bf16.msra.mxu1 %v5385_v58 }
  0x7f   :  { %3318 = vmatprep.subr.bf16.mxu1 %v5388_v59 }
  0x80   :  { %3284 = vmatpush1.bf16.msra.mxu0 %v5381_v56 }
  0x81   :  { %3322 = vmatprep.subr.bf16.mxu0 %v5286_v3 }
  0x82   :  { %3320 = vmatpush1.bf16.msra.mxu1 %v5395_v1 }
  0x83   :  { %3358 = vmatprep.subr.bf16.mxu1 %v5299_v21 }
 0x132   :  { %v239_v20 = vpop.f32.mrb[0].mxu0 }
 0x133   :  { %v240_v22 = vadd.f32 %v239_v20, %v5448_v15  ;;  %v241_v27 = vpop.f32.mrb[1].mxu0 }
 0x134   :  { %v242_v28 = vadd.f32 %v241_v27, %v5452_v18  ;;  %v310_v38 = vpop.f32.mrb[0].mxu1 }
 0x135   :  { %v3113_v30 = vmul.f32 -1.442695, %v240_v22  ;;  %v312_v39 = vpop.f32.mrb[1].mxu1  ;;  %v311_v52 = vadd.f32 %v310_v38, %v5465_v46 }
 0x136   :  { %v3114_v35 = vmul.f32 -1.442695, %v242_v28  ;;  %v313_v43 = vadd.f32 %v312_v39, %v5459_v33 }
 0x137   :  { %4786 = vpow2.f32 %v3113_v30 }
 0x138   :  { %4788 = vpow2.f32 %v3114_v35  ;;  %v3115_v50 = vmul.f32 -1.442695, %v313_v43  ;;  %v514_v43 = vld [vmem:[#allocation3 + $0x4] sm:$0x3] }
 0x13a   :  { %4790 = vpow2.f32 %v3115_v50 }
 0x13b   :  { %4792 = vtanh.f32 %v311_v52 }
 0x141   :  { %v4787_v53 = vpop.eup %4786 }
 0x142   :  { %v4789_v55 = vpop.eup %4788  ;;  %v318_v60 = vadd.f32 1.0, %v4787_v53 }
 0x143   :  { %v324_v62 = vadd.f32 1.0, %v4789_v55 }
 0x144   :  { %4794 = vrcp.f32 %v318_v60  ;;  %v4791_v0 = vpop.eup %4790 }
 0x145   :  { %4796 = vrcp.f32 %v324_v62  ;;  %v4793_v2 = vpop.eup %4792  ;;  %v331_v11 = vadd.f32 1.0, %v4791_v0 }
 0x147   :  { %4798 = vrcp.f32 %v331_v11 }
 0x14e   :  { %v4795_v20 = vpop.eup %4794 }
 0x14f   :  { %v4797_v22 = vpop.eup %4796  ;;  %v335_v27 = vmul.f32 %v4795_v20, %v4793_v2 }
 0x150   :  { %v334_v28 = vmul.f32 %v4797_v22, %v146_v4 }
 0x151   :  { %v4799_v35 = vpop.eup %4798 }
 0x152   :  { %v5471_v30 = vadd.f32 %v335_v27, %v334_v28 }
 0x154   :  { %4800 = vtanh.f32 %v5471_v30 }
 0x15e   :  { %v4801_v38 = vpop.eup %4800 }
 0x15f   :  { %v338_v39 = vmul.f32 %v4801_v38, %v4799_v35 }
 0x161   :  { %339 = vst [vmem:[#allocation2] sm:$0x3] %v338_v39  ;;  %410 = vmatmul.mubr.f32.vlgmr.msra.gmra.mrb[2].mxu0 %v338_v39  ;;  %481 = vmatmul.mubr.f32.vlgmr.msra.gmra.mrb[2].mxu1 %v338_v39 }
 0x162   :  { %3324 = vmatpush1.bf16.msra.mxu0 %v5288_v7  ;;  %3360 = vmatpush1.bf16.msra.mxu1 %v5301_v24 }
 0x163   :  { %3326 = vmatprep.subr.bf16.mxu0 %v5290_v8  ;;  %3362 = vmatprep.subr.bf16.mxu1 %v5311_v32 }
 0x164   :  { %3121 = vmatprep.mubr.msk.f32.mxu0 %vm169_vm0, %v514_v43  ;;  %3122 = vmatprep.mubr.msk.f32.mxu1 %vm169_vm0, %v514_v43 }
 0x166   :  { %3328 = vmatpush1.bf16.msra.mxu0 %v5294_v13  ;;  %3364 = vmatpush1.bf16.msra.mxu1 %v5313_v36 }
 0x167   :  { %3330 = vmatprep.subr.bf16.mxu0 %v5297_v16  ;;  %3366 = vmatprep.subr.bf16.mxu1 %v5319_v44 }
 0x16a   :  { %3332 = vmatpush1.bf16.msra.mxu0 %v5304_v25  ;;  %3368 = vmatpush1.bf16.msra.mxu1 %v5325_v47 }
 0x16b   :  { %3334 = vmatprep.subr.bf16.mxu0 %v5308_v29  ;;  %3370 = vmatprep.subr.bf16.mxu1 %v5328_v51 }
 0x16e   :  { %3336 = vmatpush1.bf16.msra.mxu0 %v5317_v41  ;;  %3372 = vmatpush1.bf16.msra.mxu1 %v5337_v61 }
 0x16f   :  { %3338 = vmatprep.subr.bf16.mxu0 %v5322_v45  ;;  %3374 = vmatprep.subr.bf16.mxu1 %v5340_v63 }
 0x172   :  { %3340 = vmatpush1.bf16.msra.mxu0 %v5331_v54  ;;  %3376 = vmatpush1.bf16.msra.mxu1 %v5350_v14 }
 0x173   :  { %3342 = vmatprep.subr.bf16.mxu0 %v5334_v57  ;;  %3378 = vmatprep.subr.bf16.mxu1 %v5353_v17 }
 0x176   :  { %3344 = vmatpush1.bf16.msra.mxu0 %v5343_v6  ;;  %3380 = vmatpush1.bf16.msra.mxu1 %v5363_v31 }
 0x177   :  { %3346 = vmatprep.subr.bf16.mxu0 %v5347_v9  ;;  %3382 = vmatprep.subr.bf16.mxu1 %v5366_v34 }
 0x17a   :  { %3348 = vmatpush1.bf16.msra.mxu0 %v5357_v23  ;;  %3384 = vmatpush1.bf16.msra.mxu1 %v5375_v48 }
 0x17b   :  { %3350 = vmatprep.subr.bf16.mxu0 %v5360_v26  ;;  %3386 = vmatprep.subr.bf16.mxu1 %v5378_v49 }
 0x17e   :  { %3352 = vmatpush1.bf16.msra.mxu0 %v5369_v40  ;;  %3388 = vmatpush1.bf16.msra.mxu1 %v5385_v58 }
 0x17f   :  { %3354 = vmatprep.subr.bf16.mxu0 %v5372_v42  ;;  %3390 = vmatprep.subr.bf16.mxu1 %v5388_v59 }
 0x182   :  { %3356 = vmatpush1.bf16.msra.mxu0 %v5381_v56  ;;  %3392 = vmatpush1.bf16.msra.mxu1 %v5395_v1 }
 0x183   :  { %3394 = vmatprep.subr.bf16.mxu0 %v5286_v3  ;;  %3430 = vmatprep.subr.bf16.mxu1 %v5299_v21 }
 0x234   :  { %v411_v50 = vpop.f32.mrb[2].mxu0  ;;  %v482_v52 = vpop.f32.mrb[2].mxu1 }
 0x235   :  { %v412_v53 = vadd.f32 %v411_v50, %v5448_v15  ;;  %v413_v55 = vpop.f32.mrb[3].mxu0  ;;  %v484_v60 = vpop.f32.mrb[3].mxu1  ;;  %v483_v11 = vadd.f32 %v482_v52, %v5465_v46 }
 0x236   :  { %v414_v62 = vadd.f32 %v413_v55, %v5452_v18  ;;  %v485_v4 = vadd.f32 %v484_v60, %v5459_v33 }
 0x237   :  { %v3118_v0 = vmul.f32 -1.442695, %v412_v53 }
 0x238   :  { %v3119_v2 = vmul.f32 -1.442695, %v414_v62  ;;  %v3120_v20 = vmul.f32 -1.442695, %v485_v4 }
 0x239   :  { %4802 = vpow2.f32 %v3118_v0 }
 0x23a   :  { %4804 = vpow2.f32 %v3119_v2 }
 0x23b   :  { %4806 = vpow2.f32 %v3120_v20 }
 0x23c   :  { %4808 = vtanh.f32 %v483_v11 }
 0x243   :  { %v4803_v22 = vpop.eup %4802 }
 0x244   :  { %v4805_v27 = vpop.eup %4804  ;;  %v490_v28 = vadd.f32 1.0, %v4803_v22 }
 0x245   :  { %v496_v35 = vadd.f32 1.0, %v4805_v27  ;;  %v4807_v38 = vpop.eup %4806 }
 0x246   :  { %4810 = vrcp.f32 %v490_v28  ;;  %v4809_v39 = vpop.eup %4808  ;;  %v503_v55 = vadd.f32 1.0, %v4807_v38 }
 0x247   :  { %4812 = vrcp.f32 %v496_v35 }
 0x248   :  { %4814 = vrcp.f32 %v503_v55 }
 0x250   :  { %v4811_v43 = vpop.eup %4810 }
 0x251   :  { %v4813_v50 = vpop.eup %4812  ;;  %v507_v53 = vmul.f32 %v4811_v43, %v4809_v39 }
 0x252   :  { %v506_v62 = vmul.f32 %v4813_v50, %v5471_v30  ;;  %v4815_v52 = vpop.eup %4814  ;;  %v687_v30 = vld [vmem:[#allocation3 + $0x6] sm:$0x3] }
 0x254   :  { %v5517_v60 = vadd.f32 %v507_v53, %v506_v62 }
 0x256   :  { %4816 = vtanh.f32 %v5517_v60 }
 0x260   :  { %v4817_v0 = vpop.eup %4816 }
 0x261   :  { %v510_v2 = vmul.f32 %v4817_v0, %v4815_v52 }
 0x263   :  { %512 = vst [vmem:[#allocation2 + $0x2] sm:$0x3] %v510_v2  ;;  %583 = vmatmul.mubr.f32.vlgmr.msra.gmra.mrb[4].mxu0 %v510_v2  ;;  %654 = vmatmul.mubr.f32.vlgmr.msra.gmra.mrb[4].mxu1 %v510_v2 }
 0x264   :  { %3396 = vmatpush1.bf16.msra.mxu0 %v5288_v7  ;;  %3432 = vmatpush1.bf16.msra.mxu1 %v5301_v24 }
 0x265   :  { %3398 = vmatprep.subr.bf16.mxu0 %v5290_v8  ;;  %3434 = vmatprep.subr.bf16.mxu1 %v5311_v32 }
 0x266   :  { %3126 = vmatprep.mubr.msk.f32.mxu0 %vm169_vm0, %v687_v30  ;;  %3127 = vmatprep.mubr.msk.f32.mxu1 %vm169_vm0, %v687_v30 }
 0x268   :  { %3400 = vmatpush1.bf16.msra.mxu0 %v5294_v13  ;;  %3436 = vmatpush1.bf16.msra.mxu1 %v5313_v36 }
 0x269   :  { %3402 = vmatprep.subr.bf16.mxu0 %v5297_v16  ;;  %3438 = vmatprep.subr.bf16.mxu1 %v5319_v44 }
 0x26c   :  { %3404 = vmatpush1.bf16.msra.mxu0 %v5304_v25  ;;  %3440 = vmatpush1.bf16.msra.mxu1 %v5325_v47 }
 0x26d   :  { %3406 = vmatprep.subr.bf16.mxu0 %v5308_v29  ;;  %3442 = vmatprep.subr.bf16.mxu1 %v5328_v51 }
 0x270   :  { %3408 = vmatpush1.bf16.msra.mxu0 %v5317_v41  ;;  %3444 = vmatpush1.bf16.msra.mxu1 %v5337_v61 }
 0x271   :  { %3410 = vmatprep.subr.bf16.mxu0 %v5322_v45  ;;  %3446 = vmatprep.subr.bf16.mxu1 %v5340_v63 }
 0x274   :  { %3412 = vmatpush1.bf16.msra.mxu0 %v5331_v54  ;;  %3448 = vmatpush1.bf16.msra.mxu1 %v5350_v14 }
 0x275   :  { %3414 = vmatprep.subr.bf16.mxu0 %v5334_v57  ;;  %3450 = vmatprep.subr.bf16.mxu1 %v5353_v17 }
 0x278   :  { %3416 = vmatpush1.bf16.msra.mxu0 %v5343_v6  ;;  %3452 = vmatpush1.bf16.msra.mxu1 %v5363_v31 }
 0x279   :  { %3418 = vmatprep.subr.bf16.mxu0 %v5347_v9  ;;  %3454 = vmatprep.subr.bf16.mxu1 %v5366_v34 }
 0x27c   :  { %3420 = vmatpush1.bf16.msra.mxu0 %v5357_v23  ;;  %3456 = vmatpush1.bf16.msra.mxu1 %v5375_v48 }
 0x27d   :  { %3422 = vmatprep.subr.bf16.mxu0 %v5360_v26  ;;  %3458 = vmatprep.subr.bf16.mxu1 %v5378_v49 }
 0x280   :  { %3424 = vmatpush1.bf16.msra.mxu0 %v5369_v40  ;;  %3460 = vmatpush1.bf16.msra.mxu1 %v5385_v58 }
 0x281   :  { %3426 = vmatprep.subr.bf16.mxu0 %v5372_v42  ;;  %3462 = vmatprep.subr.bf16.mxu1 %v5388_v59 }
 0x284   :  { %3428 = vmatpush1.bf16.msra.mxu0 %v5381_v56  ;;  %3464 = vmatpush1.bf16.msra.mxu1 %v5395_v1 }
 0x285   :  { %3466 = vmatprep.subr.bf16.mxu0 %v5286_v3  ;;  %3502 = vmatprep.subr.bf16.mxu1 %v5299_v21 }
 0x336   :  { %v584_v4 = vpop.f32.mrb[4].mxu0  ;;  %v655_v20 = vpop.f32.mrb[4].mxu1 }
 0x337   :  { %v585_v11 = vadd.f32 %v584_v4, %v5448_v15  ;;  %v586_v22 = vpop.f32.mrb[5].mxu0  ;;  %v657_v27 = vpop.f32.mrb[5].mxu1  ;;  %v656_v50 = vadd.f32 %v655_v20, %v5465_v46 }
 0x338   :  { %v587_v28 = vadd.f32 %v586_v22, %v5452_v18  ;;  %v658_v39 = vadd.f32 %v657_v27, %v5459_v33 }
 0x339   :  { %v3123_v35 = vmul.f32 -1.442695, %v585_v11 }
 0x33a   :  { %v3124_v38 = vmul.f32 -1.442695, %v587_v28  ;;  %v3125_v43 = vmul.f32 -1.442695, %v658_v39 }
 0x33b   :  { %4818 = vpow2.f32 %v3123_v35 }
 0x33c   :  { %4820 = vpow2.f32 %v3124_v38 }
 0x33d   :  { %4822 = vpow2.f32 %v3125_v43 }
 0x33e   :  { %4824 = vtanh.f32 %v656_v50 }
 0x345   :  { %v4819_v53 = vpop.eup %4818 }
 0x346   :  { %v4821_v55 = vpop.eup %4820  ;;  %v663_v62 = vadd.f32 1.0, %v4819_v53 }
 0x347   :  { %v669_v52 = vadd.f32 1.0, %v4821_v55  ;;  %v4823_v0 = vpop.eup %4822 }
 0x348   :  { %4826 = vrcp.f32 %v663_v62  ;;  %v4825_v2 = vpop.eup %4824  ;;  %v676_v22 = vadd.f32 1.0, %v4823_v0 }
 0x349   :  { %4828 = vrcp.f32 %v669_v52 }
 0x34a   :  { %4830 = vrcp.f32 %v676_v22 }
 0x352   :  { %v4827_v30 = vpop.eup %4826 }
 0x353   :  { %v4829_v4 = vpop.eup %4828  ;;  %v680_v11 = vmul.f32 %v4827_v30, %v4825_v2 }
 0x354   :  { %v679_v28 = vmul.f32 %v4829_v4, %v5517_v60  ;;  %v4831_v20 = vpop.eup %4830  ;;  %v860_v60 = vld [vmem:[#allocation3 + $0x8] sm:$0x3] }
 0x356   :  { %v5563_v27 = vadd.f32 %v680_v11, %v679_v28 }
 0x358   :  { %4832 = vtanh.f32 %v5563_v27 }
 0x362   :  { %v4833_v35 = vpop.eup %4832 }
 0x363   :  { %v683_v38 = vmul.f32 %v4833_v35, %v4831_v20 }
 0x365   :  { %685 = vst [vmem:[#allocation2 + $0x4] sm:$0x3] %v683_v38  ;;  %756 = vmatmul.mubr.f32.vlgmr.msra.gmra.mrb[6].mxu0 %v683_v38  ;;  %827 = vmatmul.mubr.f32.vlgmr.msra.gmra.mrb[6].mxu1 %v683_v38 }
 0x366   :  { %3468 = vmatpush1.bf16.msra.mxu0 %v5288_v7  ;;  %3504 = vmatpush1.bf16.msra.mxu1 %v5301_v24 }
 0x367   :  { %3470 = vmatprep.subr.bf16.mxu0 %v5290_v8  ;;  %3506 = vmatprep.subr.bf16.mxu1 %v5311_v32 }
 0x368   :  { %3131 = vmatprep.mubr.msk.f32.mxu0 %vm169_vm0, %v860_v60  ;;  %3132 = vmatprep.mubr.msk.f32.mxu1 %vm169_vm0, %v860_v60 }
 0x36a   :  { %3472 = vmatpush1.bf16.msra.mxu0 %v5294_v13  ;;  %3508 = vmatpush1.bf16.msra.mxu1 %v5313_v36 }
 0x36b   :  { %3474 = vmatprep.subr.bf16.mxu0 %v5297_v16  ;;  %3510 = vmatprep.subr.bf16.mxu1 %v5319_v44 }
 0x36e   :  { %3476 = vmatpush1.bf16.msra.mxu0 %v5304_v25  ;;  %3512 = vmatpush1.bf16.msra.mxu1 %v5325_v47 }
 0x36f   :  { %3478 = vmatprep.subr.bf16.mxu0 %v5308_v29  ;;  %3514 = vmatprep.subr.bf16.mxu1 %v5328_v51 }
 0x372   :  { %3480 = vmatpush1.bf16.msra.mxu0 %v5317_v41  ;;  %3516 = vmatpush1.bf16.msra.mxu1 %v5337_v61 }
 0x373   :  { %3482 = vmatprep.subr.bf16.mxu0 %v5322_v45  ;;  %3518 = vmatprep.subr.bf16.mxu1 %v5340_v63 }
 0x376   :  { %3484 = vmatpush1.bf16.msra.mxu0 %v5331_v54  ;;  %3520 = vmatpush1.bf16.msra.mxu1 %v5350_v14 }
 0x377   :  { %3486 = vmatprep.subr.bf16.mxu0 %v5334_v57  ;;  %3522 = vmatprep.subr.bf16.mxu1 %v5353_v17 }
 0x37a   :  { %3488 = vmatpush1.bf16.msra.mxu0 %v5343_v6  ;;  %3524 = vmatpush1.bf16.msra.mxu1 %v5363_v31 }
 0x37b   :  { %3490 = vmatprep.subr.bf16.mxu0 %v5347_v9  ;;  %3526 = vmatprep.subr.bf16.mxu1 %v5366_v34 }
 0x37e   :  { %3492 = vmatpush1.bf16.msra.mxu0 %v5357_v23  ;;  %3528 = vmatpush1.bf16.msra.mxu1 %v5375_v48 }
 0x37f   :  { %3494 = vmatprep.subr.bf16.mxu0 %v5360_v26  ;;  %3530 = vmatprep.subr.bf16.mxu1 %v5378_v49 }
 0x382   :  { %3496 = vmatpush1.bf16.msra.mxu0 %v5369_v40  ;;  %3532 = vmatpush1.bf16.msra.mxu1 %v5385_v58 }
 0x383   :  { %3498 = vmatprep.subr.bf16.mxu0 %v5372_v42  ;;  %3534 = vmatprep.subr.bf16.mxu1 %v5388_v59 }
 0x386   :  { %3500 = vmatpush1.bf16.msra.mxu0 %v5381_v56  ;;  %3536 = vmatpush1.bf16.msra.mxu1 %v5395_v1 }
 0x387   :  { %3538 = vmatprep.subr.bf16.mxu0 %v5286_v3  ;;  %3574 = vmatprep.subr.bf16.mxu1 %v5299_v21 }
 0x438   :  { %v757_v39 = vpop.f32.mrb[6].mxu0  ;;  %v828_v43 = vpop.f32.mrb[6].mxu1 }
 0x439   :  { %v758_v50 = vadd.f32 %v757_v39, %v5448_v15  ;;  %v759_v53 = vpop.f32.mrb[7].mxu0  ;;  %v830_v55 = vpop.f32.mrb[7].mxu1  ;;  %v829_v4 = vadd.f32 %v828_v43, %v5465_v46 }
 0x43a   :  { %v760_v62 = vadd.f32 %v759_v53, %v5452_v18  ;;  %v831_v2 = vadd.f32 %v830_v55, %v5459_v33 }
 0x43b   :  { %v3128_v52 = vmul.f32 -1.442695, %v758_v50 }
 0x43c   :  { %v3129_v0 = vmul.f32 -1.442695, %v760_v62  ;;  %v3130_v30 = vmul.f32 -1.442695, %v831_v2 }
 0x43d   :  { %4834 = vpow2.f32 %v3128_v52 }
 0x43e   :  { %4836 = vpow2.f32 %v3129_v0 }
 0x43f   :  { %4838 = vpow2.f32 %v3130_v30 }
 0x440   :  { %4840 = vtanh.f32 %v829_v4 }
 0x447   :  { %v4835_v11 = vpop.eup %4834 }
 0x448   :  { %v4837_v22 = vpop.eup %4836  ;;  %v836_v28 = vadd.f32 1.0, %v4835_v11 }
 0x449   :  { %v842_v20 = vadd.f32 1.0, %v4837_v22  ;;  %v4839_v35 = vpop.eup %4838 }
 0x44a   :  { %4842 = vrcp.f32 %v836_v28  ;;  %v4841_v38 = vpop.eup %4840  ;;  %v849_v53 = vadd.f32 1.0, %v4839_v35 }
 0x44b   :  { %4844 = vrcp.f32 %v842_v20 }
 0x44c   :  { %4846 = vrcp.f32 %v849_v53 }
 0x454   :  { %v4843_v60 = vpop.eup %4842 }
 0x455   :  { %v4845_v39 = vpop.eup %4844  ;;  %v853_v50 = vmul.f32 %v4843_v60, %v4841_v38 }
 0x456   :  { %v852_v62 = vmul.f32 %v4845_v39, %v5563_v27  ;;  %v4847_v43 = vpop.eup %4846  ;;  %v1033_v27 = vld [vmem:[#allocation3 + $0xa] sm:$0x3] }
 0x458   :  { %v5609_v55 = vadd.f32 %v853_v50, %v852_v62 }
 0x45a   :  { %4848 = vtanh.f32 %v5609_v55 }
 0x464   :  { %v4849_v52 = vpop.eup %4848 }
 0x465   :  { %v856_v0 = vmul.f32 %v4849_v52, %v4847_v43 }
 0x467   :  { %858 = vst [vmem:[#allocation2 + $0x6] sm:$0x3] %v856_v0  ;;  %929 = vmatmul.mubr.f32.vlgmr.msra.gmra.mrb[8].mxu0 %v856_v0  ;;  %1000 = vmatmul.mubr.f32.vlgmr.msra.gmra.mrb[8].mxu1 %v856_v0 }
 0x468   :  { %3540 = vmatpush1.bf16.msra.mxu0 %v5288_v7  ;;  %3576 = vmatpush1.bf16.msra.mxu1 %v5301_v24 }
 0x469   :  { %3542 = vmatprep.subr.bf16.mxu0 %v5290_v8  ;;  %3578 = vmatprep.subr.bf16.mxu1 %v5311_v32 }
 0x46a   :  { %3136 = vmatprep.mubr.msk.f32.mxu0 %vm169_vm0, %v1033_v27  ;;  %3137 = vmatprep.mubr.msk.f32.mxu1 %vm169_vm0, %v1033_v27 }
 0x46c   :  { %3544 = vmatpush1.bf16.msra.mxu0 %v5294_v13  ;;  %3580 = vmatpush1.bf16.msra.mxu1 %v5313_v36 }
 0x46d   :  { %3546 = vmatprep.subr.bf16.mxu0 %v5297_v16  ;;  %3582 = vmatprep.subr.bf16.mxu1 %v5319_v44 }
 0x470   :  { %3548 = vmatpush1.bf16.msra.mxu0 %v5304_v25  ;;  %3584 = vmatpush1.bf16.msra.mxu1 %v5325_v47 }
 0x471   :  { %3550 = vmatprep.subr.bf16.mxu0 %v5308_v29  ;;  %3586 = vmatprep.subr.bf16.mxu1 %v5328_v51 }
 0x474   :  { %3552 = vmatpush1.bf16.msra.mxu0 %v5317_v41  ;;  %3588 = vmatpush1.bf16.msra.mxu1 %v5337_v61 }
 0x475   :  { %3554 = vmatprep.subr.bf16.mxu0 %v5322_v45  ;;  %3590 = vmatprep.subr.bf16.mxu1 %v5340_v63 }
 0x478   :  { %3556 = vmatpush1.bf16.msra.mxu0 %v5331_v54  ;;  %3592 = vmatpush1.bf16.msra.mxu1 %v5350_v14 }
 0x479   :  { %3558 = vmatprep.subr.bf16.mxu0 %v5334_v57  ;;  %3594 = vmatprep.subr.bf16.mxu1 %v5353_v17 }
 0x47c   :  { %3560 = vmatpush1.bf16.msra.mxu0 %v5343_v6  ;;  %3596 = vmatpush1.bf16.msra.mxu1 %v5363_v31 }
 0x47d   :  { %3562 = vmatprep.subr.bf16.mxu0 %v5347_v9  ;;  %3598 = vmatprep.subr.bf16.mxu1 %v5366_v34 }
 0x480   :  { %3564 = vmatpush1.bf16.msra.mxu0 %v5357_v23  ;;  %3600 = vmatpush1.bf16.msra.mxu1 %v5375_v48 }
 0x481   :  { %3566 = vmatprep.subr.bf16.mxu0 %v5360_v26  ;;  %3602 = vmatprep.subr.bf16.mxu1 %v5378_v49 }
 0x484   :  { %3568 = vmatpush1.bf16.msra.mxu0 %v5369_v40  ;;  %3604 = vmatpush1.bf16.msra.mxu1 %v5385_v58 }
 0x485   :  { %3570 = vmatprep.subr.bf16.mxu0 %v5372_v42  ;;  %3606 = vmatprep.subr.bf16.mxu1 %v5388_v59 }
 0x488   :  { %3572 = vmatpush1.bf16.msra.mxu0 %v5381_v56  ;;  %3608 = vmatpush1.bf16.msra.mxu1 %v5395_v1 }
 0x489   :  { %3610 = vmatprep.subr.bf16.mxu0 %v5286_v3  ;;  %3646 = vmatprep.subr.bf16.mxu1 %v5299_v21 }
 0x53a   :  { %v930_v2 = vpop.f32.mrb[8].mxu0  ;;  %v1001_v30 = vpop.f32.mrb[8].mxu1 }
 0x53b   :  { %v931_v4 = vadd.f32 %v930_v2, %v5448_v15  ;;  %v932_v11 = vpop.f32.mrb[9].mxu0  ;;  %v1003_v22 = vpop.f32.mrb[9].mxu1  ;;  %v1002_v39 = vadd.f32 %v1001_v30, %v5465_v46 }
 0x53c   :  { %v933_v28 = vadd.f32 %v932_v11, %v5452_v18  ;;  %v1004_v38 = vadd.f32 %v1003_v22, %v5459_v33 }
 0x53d   :  { %v3133_v20 = vmul.f32 -1.442695, %v931_v4 }
 0x53e   :  { %v3134_v35 = vmul.f32 -1.442695, %v933_v28  ;;  %v3135_v60 = vmul.f32 -1.442695, %v1004_v38 }
 0x53f   :  { %4850 = vpow2.f32 %v3133_v20 }
 0x540   :  { %4852 = vpow2.f32 %v3134_v35 }
 0x541   :  { %4854 = vpow2.f32 %v3135_v60 }
 0x542   :  { %4856 = vtanh.f32 %v1002_v39 }
 0x549   :  { %v4851_v50 = vpop.eup %4850 }
 0x54a   :  { %v4853_v53 = vpop.eup %4852  ;;  %v1009_v62 = vadd.f32 1.0, %v4851_v50 }
 0x54b   :  { %v1015_v43 = vadd.f32 1.0, %v4853_v53  ;;  %v4855_v52 = vpop.eup %4854 }
 0x54c   :  { %4858 = vrcp.f32 %v1009_v62  ;;  %v4857_v0 = vpop.eup %4856  ;;  %v1022_v11 = vadd.f32 1.0, %v4855_v52 }
 0x54d   :  { %4860 = vrcp.f32 %v1015_v43 }
 0x54e   :  { %4862 = vrcp.f32 %v1022_v11 }
 0x556   :  { %v4859_v27 = vpop.eup %4858 }
 0x557   :  { %v4861_v2 = vpop.eup %4860  ;;  %v1026_v4 = vmul.f32 %v4859_v27, %v4857_v0 }
 0x558   :  { %v1025_v28 = vmul.f32 %v4861_v2, %v5609_v55  ;;  %v4863_v30 = vpop.eup %4862  ;;  %v1206_v55 = vld [vmem:[#allocation3 + $0xc] sm:$0x3] }
 0x55a   :  { %v5655_v22 = vadd.f32 %v1026_v4, %v1025_v28 }
 0x55c   :  { %4864 = vtanh.f32 %v5655_v22 }
 0x566   :  { %v4865_v20 = vpop.eup %4864 }
 0x567   :  { %v1029_v35 = vmul.f32 %v4865_v20, %v4863_v30 }
 0x569   :  { %1031 = vst [vmem:[#allocation2 + $0x8] sm:$0x3] %v1029_v35  ;;  %1102 = vmatmul.mubr.f32.vlgmr.msra.gmra.mrb[10].mxu0 %v1029_v35  ;;  %1173 = vmatmul.mubr.f32.vlgmr.msra.gmra.mrb[10].mxu1 %v1029_v35 }
 0x56a   :  { %3612 = vmatpush1.bf16.msra.mxu0 %v5288_v7  ;;  %3648 = vmatpush1.bf16.msra.mxu1 %v5301_v24 }
 0x56b   :  { %3614 = vmatprep.subr.bf16.mxu0 %v5290_v8  ;;  %3650 = vmatprep.subr.bf16.mxu1 %v5311_v32 }
 0x56c   :  { %3141 = vmatprep.mubr.msk.f32.mxu0 %vm169_vm0, %v1206_v55  ;;  %3142 = vmatprep.mubr.msk.f32.mxu1 %vm169_vm0, %v1206_v55 }
 0x56e   :  { %3616 = vmatpush1.bf16.msra.mxu0 %v5294_v13  ;;  %3652 = vmatpush1.bf16.msra.mxu1 %v5313_v36 }
 0x56f   :  { %3618 = vmatprep.subr.bf16.mxu0 %v5297_v16  ;;  %3654 = vmatprep.subr.bf16.mxu1 %v5319_v44 }
 0x572   :  { %3620 = vmatpush1.bf16.msra.mxu0 %v5304_v25  ;;  %3656 = vmatpush1.bf16.msra.mxu1 %v5325_v47 }
 0x573   :  { %3622 = vmatprep.subr.bf16.mxu0 %v5308_v29  ;;  %3658 = vmatprep.subr.bf16.mxu1 %v5328_v51 }
 0x576   :  { %3624 = vmatpush1.bf16.msra.mxu0 %v5317_v41  ;;  %3660 = vmatpush1.bf16.msra.mxu1 %v5337_v61 }
 0x577   :  { %3626 = vmatprep.subr.bf16.mxu0 %v5322_v45  ;;  %3662 = vmatprep.subr.bf16.mxu1 %v5340_v63 }
 0x57a   :  { %3628 = vmatpush1.bf16.msra.mxu0 %v5331_v54  ;;  %3664 = vmatpush1.bf16.msra.mxu1 %v5350_v14 }
 0x57b   :  { %3630 = vmatprep.subr.bf16.mxu0 %v5334_v57  ;;  %3666 = vmatprep.subr.bf16.mxu1 %v5353_v17 }
 0x57e   :  { %3632 = vmatpush1.bf16.msra.mxu0 %v5343_v6  ;;  %3668 = vmatpush1.bf16.msra.mxu1 %v5363_v31 }
 0x57f   :  { %3634 = vmatprep.subr.bf16.mxu0 %v5347_v9  ;;  %3670 = vmatprep.subr.bf16.mxu1 %v5366_v34 }
 0x582   :  { %3636 = vmatpush1.bf16.msra.mxu0 %v5357_v23  ;;  %3672 = vmatpush1.bf16.msra.mxu1 %v5375_v48 }
 0x583   :  { %3638 = vmatprep.subr.bf16.mxu0 %v5360_v26  ;;  %3674 = vmatprep.subr.bf16.mxu1 %v5378_v49 }
 0x586   :  { %3640 = vmatpush1.bf16.msra.mxu0 %v5369_v40  ;;  %3676 = vmatpush1.bf16.msra.mxu1 %v5385_v58 }
 0x587   :  { %3642 = vmatprep.subr.bf16.mxu0 %v5372_v42  ;;  %3678 = vmatprep.subr.bf16.mxu1 %v5388_v59 }
 0x58a   :  { %3644 = vmatpush1.bf16.msra.mxu0 %v5381_v56  ;;  %3680 = vmatpush1.bf16.msra.mxu1 %v5395_v1 }
 0x58b   :  { %3682 = vmatprep.subr.bf16.mxu0 %v5286_v3  ;;  %3718 = vmatprep.subr.bf16.mxu1 %v5299_v21 }
 0x63c   :  { %v1103_v38 = vpop.f32.mrb[10].mxu0  ;;  %v1174_v60 = vpop.f32.mrb[10].mxu1 }
 0x63d   :  { %v1104_v39 = vadd.f32 %v1103_v38, %v5448_v15  ;;  %v1105_v50 = vpop.f32.mrb[11].mxu0  ;;  %v1176_v53 = vpop.f32.mrb[11].mxu1  ;;  %v1175_v0 = vadd.f32 %v1174_v60, %v5465_v46 }
 0x63e   :  { %v1106_v62 = vadd.f32 %v1105_v50, %v5452_v18  ;;  %v1177_v3 = vadd.f32 %v1176_v53, %v5459_v33 }
 0x63f   :  { %v3138_v43 = vmul.f32 -1.442695, %v1104_v39 }
 0x640   :  { %v3139_v52 = vmul.f32 -1.442695, %v1106_v62  ;;  %v3140_v21 = vmul.f32 -1.442695, %v1177_v3  ;;  %v1564_v3 = vld [vmem:[#allocation8 + $0x58] sm:$0xff] }
 0x641   :  { %4866 = vpow2.f32 %v3138_v43 }
 0x642   :  { %4868 = vpow2.f32 %v3139_v52  ;;  %v1566_v52 = vld [vmem:[#allocation8 + $0x68] sm:$0xff] }
 0x643   :  { %4870 = vpow2.f32 %v3140_v21  ;;  %v1568_v21 = vld [vmem:[#allocation8 + $0x78] sm:$0xff] }
 0x644   :  { %4872 = vtanh.f32 %v1175_v0 }
 0x64b   :  { %v4867_v27 = vpop.eup %4866 }
 0x64c   :  { %v4869_v2 = vpop.eup %4868  ;;  %v1182_v4 = vadd.f32 1.0, %v4867_v27 }
 0x64d   :  { %v1188_v11 = vadd.f32 1.0, %v4869_v2  ;;  %v4871_v28 = vpop.eup %4870 }
 0x64e   :  { %4874 = vrcp.f32 %v1182_v4  ;;  %v4873_v30 = vpop.eup %4872  ;;  %v1195_v38 = vadd.f32 1.0, %v4871_v28  ;;  %v1561_v4 = vld [vmem:[#allocation8 + $0x40] sm:$0xff] }
 0x64f   :  { %4876 = vrcp.f32 %v1188_v11  ;;  %v1565_v11 = vld [vmem:[#allocation8 + $0x60] sm:$0xff] }
 0x650   :  { %4878 = vrcp.f32 %v1195_v38  ;;  %v5760_v38 = vpack.c.bf16 %v1568_v21, %v1564_v3  ;;  %v1600_v3 = vld [vmem:[#allocation8 + $0x178] sm:$0xff] }
 0x658   :  { %v4875_v20 = vpop.eup %4874 }
 0x659   :  { %v4877_v35 = vpop.eup %4876  ;;  %v1199_v55 = vmul.f32 %v4875_v20, %v4873_v30  ;;  %v1563_v30 = vld [vmem:[#allocation8 + $0x50] sm:$0xff] }
 0x65a   :  { %v1198_v39 = vmul.f32 %v4877_v35, %v5655_v22  ;;  %v4879_v60 = vpop.eup %4878  ;;  %v1562_v22 = vld [vmem:[#allocation8 + $0x48] sm:$0xff]  ;;  %v1567_v20 = vld [vmem:[#allocation8 + $0x70] sm:$0xff] }
 0x65b   :  { %v1570_v35 = vld [vmem:[#allocation8 + $0x88] sm:$0xff] }
 0x65c   :  { %v5701_v50 = vadd.f32 %v1199_v55, %v1198_v39  ;;  %v5758_v55 = vpack.c.bf16 %v1566_v52, %v1562_v22  ;;  %v1574_v39 = vld [vmem:[#allocation8 + $0xa8] sm:$0xff]  ;;  %v1596_v52 = vld [vmem:[#allocation8 + $0x158] sm:$0xff] }
 0x65d   :  { %v1594_v22 = vld [vmem:[#allocation8 + $0x148] sm:$0xff] }
 0x65e   :  { %4880 = vtanh.f32 %v5701_v50 }
 0x668   :  { %v4881_v53 = vpop.eup %4880 }
 0x669   :  { %v1202_v62 = vmul.f32 %v4881_v53, %v4879_v60  ;;  %v1576_v60 = vld [vmem:[#allocation8 + $0xb8] sm:$0xff]  ;;  %v1686_v53 = vld [vmem:[#allocation2] sm:$0x3] }
 0x66b   :  { %1204 = vst [vmem:[#allocation2 + $0xa] sm:$0x3] %v1202_v62  ;;  %1275 = vmatmul.mubr.f32.vlgmr.msra.gmra.mrb[12].mxu0 %v1202_v62  ;;  %1346 = vmatmul.mubr.f32.vlgmr.msra.gmra.mrb[12].mxu1 %v1202_v62  ;;  %v5764_v62 = vpack.c.bf16 %v1565_v11, %v1561_v4  ;;  %v1593_v4 = vld [vmem:[#allocation8 + $0x140] sm:$0xff] }
 0x66c   :  { %3684 = vmatpush1.bf16.msra.mxu0 %v5288_v7  ;;  %3720 = vmatpush1.bf16.msra.mxu1 %v5301_v24  ;;  %v1379_v7 = vld [vmem:[#allocation3 + $0xe] sm:$0x3]  ;;  %v1597_v11 = vld [vmem:[#allocation8 + $0x160] sm:$0xff] }
 0x66d   :  { %3686 = vmatprep.subr.bf16.mxu0 %v5290_v8  ;;  %3722 = vmatprep.subr.bf16.mxu1 %v5311_v32  ;;  %v1554_v8 = vld [vmem:[#allocation8 + $0x8] sm:$0xff]  ;;  %v1556_v24 = vld [vmem:[#allocation8 + $0x18] sm:$0xff] }
 0x66e   :  { %3146 = vmatprep.mubr.msk.f32.mxu0 %vm169_vm0, %v1379_v7  ;;  %3147 = vmatprep.mubr.msk.f32.mxu1 %vm169_vm0, %v1379_v7  ;;  %v5766_v7 = vpack.c.bf16 %v1567_v20, %v1563_v30  ;;  %v5808_v30 = vpack.c.bf16 %v1600_v3, %v1596_v52  ;;  %v1595_v20 = vld [vmem:[#allocation8 + $0x150] sm:$0xff]  ;;  %v1620_v52 = vld [vmem:[#allocation8 + $0x218] sm:$0xff] }
 0x66f   :  { %v1624_v3 = vld [vmem:[#allocation8 + $0x238] sm:$0xff] }
 0x670   :  { %3688 = vmatpush1.bf16.msra.mxu0 %v5294_v13  ;;  %3724 = vmatpush1.bf16.msra.mxu1 %v5313_v36  ;;  %v1558_v13 = vld [vmem:[#allocation8 + $0x28] sm:$0xff] }
 0x671   :  { %3690 = vmatprep.subr.bf16.mxu0 %v5297_v16  ;;  %3726 = vmatprep.subr.bf16.mxu1 %v5319_v44  ;;  %v5740_v16 = vpack.c.bf16 %v1558_v13, %v1554_v8  ;;  %v1569_v8 = vld [vmem:[#allocation8 + $0x80] sm:$0xff] }
 0x672   :  { %v1573_v13 = vld [vmem:[#allocation8 + $0xa0] sm:$0xff] }
 0x673   :  { %6612 = vst [vmem:[#allocation22_spill] sm:$0xff] %v5740_v16 }
 0x674   :  { %3692 = vmatpush1.bf16.msra.mxu0 %v5304_v25  ;;  %3728 = vmatpush1.bf16.msra.mxu1 %v5325_v47  ;;  %v1560_v25 = vld [vmem:[#allocation8 + $0x38] sm:$0xff] }
 0x675   :  { %3694 = vmatprep.subr.bf16.mxu0 %v5308_v29  ;;  %3730 = vmatprep.subr.bf16.mxu1 %v5328_v51  ;;  %v5742_v29 = vpack.c.bf16 %v1560_v25, %v1556_v24  ;;  %v5768_v24 = vpack.c.bf16 %v1574_v39, %v1570_v35  ;;  %v1599_v35 = vld [vmem:[#allocation8 + $0x170] sm:$0xff]  ;;  %v1602_v39 = vld [vmem:[#allocation8 + $0x188] sm:$0xff] }
 0x677   :  { %6613 = vst [vmem:[#allocation23_spill] sm:$0xff] %v5742_v29 }
 0x678   :  { %3696 = vmatpush1.bf16.msra.mxu0 %v5317_v41  ;;  %3732 = vmatpush1.bf16.msra.mxu1 %v5337_v61 }
 0x679   :  { %3698 = vmatprep.subr.bf16.mxu0 %v5322_v45  ;;  %3734 = vmatprep.subr.bf16.mxu1 %v5340_v63 }
 0x67c   :  { %3700 = vmatpush1.bf16.msra.mxu0 %v5331_v54  ;;  %3736 = vmatpush1.bf16.msra.mxu1 %v5350_v14 }
 0x67d   :  { %3702 = vmatprep.subr.bf16.mxu0 %v5334_v57  ;;  %3738 = vmatprep.subr.bf16.mxu1 %v5353_v17 }
 0x680   :  { %3704 = vmatpush1.bf16.msra.mxu0 %v5343_v6  ;;  %3740 = vmatpush1.bf16.msra.mxu1 %v5363_v31 }
 0x681   :  { %3706 = vmatprep.subr.bf16.mxu0 %v5347_v9  ;;  %3742 = vmatprep.subr.bf16.mxu1 %v5366_v34 }
 0x684   :  { %3708 = vmatpush1.bf16.msra.mxu0 %v5357_v23  ;;  %3744 = vmatpush1.bf16.msra.mxu1 %v5375_v48 }
 0x685   :  { %3710 = vmatprep.subr.bf16.mxu0 %v5360_v26  ;;  %3746 = vmatprep.subr.bf16.mxu1 %v5378_v49 }
 0x688   :  { %3712 = vmatpush1.bf16.msra.mxu0 %v5369_v40  ;;  %3748 = vmatpush1.bf16.msra.mxu1 %v5385_v58  ;;  %v1557_v58 = vld [vmem:[#allocation8 + $0x20] sm:$0xff] }
 0x689   :  { %3714 = vmatprep.subr.bf16.mxu0 %v5372_v42  ;;  %3750 = vmatprep.subr.bf16.mxu1 %v5388_v59  ;;  %v1555_v59 = vld [vmem:[#allocation8 + $0x10] sm:$0xff] }
 0x68c   :  { %3716 = vmatpush1.bf16.msra.mxu0 %v5381_v56  ;;  %3752 = vmatpush1.bf16.msra.mxu1 %v5395_v1  ;;  %v1553_v56 = vld [vmem:[#allocation8] sm:$0xff]  ;;  %v1559_v1 = vld [vmem:[#allocation8 + $0x30] sm:$0xff] }
 0x68d   :  { %3754 = vmatprep.subr.bf16.mxu0 %v5740_v16  ;;  %3818 = vmatprep.subr.bf16.mxu1 %v5742_v29  ;;  %v5754_v27 = vpack.c.bf16 %v1557_v58, %v1553_v56  ;;  %v5756_v2 = vpack.c.bf16 %v1559_v1, %v1555_v59  ;;  %v1587_v59 = vld [vmem:[#allocation8 + $0x110] sm:$0xff] }
 0x68e   :  { %v1591_v1 = vld [vmem:[#allocation8 + $0x130] sm:$0xff] }
 0x73e   :  { %v1276_v32 = vpop.f32.mrb[12].mxu0  ;;  %v1347_v36 = vpop.f32.mrb[12].mxu1 }
 0x73f   :  { %v1277_v41 = vadd.f32 %v1276_v32, %v5448_v15  ;;  %v1278_v44 = vpop.f32.mrb[13].mxu0  ;;  %v1349_v45 = vpop.f32.mrb[13].mxu1  ;;  %v1348_v63 = vadd.f32 %v1347_v36, %v5465_v46  ;;  %v1571_v32 = vld [vmem:[#allocation8 + $0x90] sm:$0xff]  ;;  %v1652_v46 = vld [vmem:[#allocation8 + $0x318] sm:$0xff]  ;;  %v1662_v15 = vld [vmem:[#allocation8 + $0x368] sm:$0xff] }
 0x740   :  { %v1279_v47 = vadd.f32 %v1278_v44, %v5452_v18  ;;  %v1350_v57 = vadd.f32 %v1349_v45, %v5459_v33  ;;  %v1575_v36 = vld [vmem:[#allocation8 + $0xb0] sm:$0xff]  ;;  %v1582_v44 = vld [vmem:[#allocation8 + $0xe8] sm:$0xff]  ;;  %v1580_v45 = vld [vmem:[#allocation8 + $0xd8] sm:$0xff] }
 0x741   :  { %v3143_v51 = vmul.f32 -1.442695, %v1277_v41  ;;  %v1578_v41 = vld [vmem:[#allocation8 + $0xc8] sm:$0xff]  ;;  %v1656_v33 = vld [vmem:[#allocation8 + $0x338] sm:$0xff] }
 0x742   :  { %v3144_v54 = vmul.f32 -1.442695, %v1279_v47  ;;  %v3145_v61 = vmul.f32 -1.442695, %v1350_v57  ;;  %v1584_v47 = vld [vmem:[#allocation8 + $0xf8] sm:$0xff]  ;;  %v1577_v57 = vld [vmem:[#allocation8 + $0xc0] sm:$0xff] }
 0x743   :  { %4882 = vpow2.f32 %v3143_v51  ;;  %v5776_v51 = vpack.c.bf16 %v1573_v13, %v1569_v8  ;;  %v5812_v8 = vpack.c.bf16 %v1597_v11, %v1593_v4  ;;  %v5814_v13 = vpack.c.bf16 %v1599_v35, %v1595_v20  ;;  %v1617_v20 = vld [vmem:[#allocation8 + $0x200] sm:$0xff]  ;;  %v1658_v18 = vld [vmem:[#allocation8 + $0x348] sm:$0xff] }
 0x744   :  { %4884 = vpow2.f32 %v3144_v54  ;;  %v5778_v54 = vpack.c.bf16 %v1575_v36, %v1571_v32  ;;  %v1601_v32 = vld [vmem:[#allocation8 + $0x180] sm:$0xff] }
 0x745   :  { %4886 = vpow2.f32 %v3145_v61  ;;  %v1581_v61 = vld [vmem:[#allocation8 + $0xe0] sm:$0xff] }
 0x746   :  { %4888 = vtanh.f32 %v1348_v63  ;;  %v5782_v63 = vpack.c.bf16 %v1582_v44, %v1578_v41  ;;  %v1605_v36 = vld [vmem:[#allocation8 + $0x1a0] sm:$0xff] }
 0x747   :  { %v1621_v35 = vld [vmem:[#allocation8 + $0x220] sm:$0xff] }
 0x74d   :  { %v4883_v6 = vpop.eup %4882 }
 0x74e   :  { %v4885_v9 = vpop.eup %4884  ;;  %v1355_v14 = vadd.f32 1.0, %v4883_v6  ;;  %v5784_v6 = vpack.c.bf16 %v1584_v47, %v1580_v45  ;;  %v1603_v45 = vld [vmem:[#allocation8 + $0x190] sm:$0xff] }
 0x74f   :  { %v1361_v17 = vadd.f32 1.0, %v4885_v9  ;;  %v4887_v23 = vpop.eup %4886  ;;  %v1579_v9 = vld [vmem:[#allocation8 + $0xd0] sm:$0xff] }
 0x750   :  { %4890 = vrcp.f32 %v1355_v14  ;;  %v4889_v26 = vpop.eup %4888  ;;  %v1368_v42 = vadd.f32 1.0, %v4887_v23  ;;  %v1583_v14 = vld [vmem:[#allocation8 + $0xf0] sm:$0xff]  ;;  %v1590_v23 = vld [vmem:[#allocation8 + $0x128] sm:$0xff] }
 0x751   :  { %4892 = vrcp.f32 %v1361_v17  ;;  %v1586_v17 = vld [vmem:[#allocation8 + $0x108] sm:$0xff]  ;;  %v1607_v47 = vld [vmem:[#allocation8 + $0x1b0] sm:$0xff] }
 0x752   :  { %4894 = vrcp.f32 %v1368_v42  ;;  %v1585_v42 = vld [vmem:[#allocation8 + $0x100] sm:$0xff]  ;;  %v5794_v56 = vpack.c.bf16 %v1590_v23, %v1586_v17  ;;  %v5824_v17 = vpack.c.bf16 %v1605_v36, %v1601_v32  ;;  %v5826_v23 = vpack.c.bf16 %v1607_v47, %v1603_v45  ;;  %v1626_v32 = vld [vmem:[#allocation8 + $0x248] sm:$0xff]  ;;  %v1628_v45 = vld [vmem:[#allocation8 + $0x258] sm:$0xff] }
 0x753   :  { %v1630_v36 = vld [vmem:[#allocation8 + $0x268] sm:$0xff]  ;;  %v1632_v47 = vld [vmem:[#allocation8 + $0x278] sm:$0xff] }
 0x75a   :  { %v4891_v31 = vpop.eup %4890 }
 0x75b   :  { %v4893_v34 = vpop.eup %4892  ;;  %v1372_v40 = vmul.f32 %v4891_v31, %v4889_v26  ;;  %v1588_v26 = vld [vmem:[#allocation8 + $0x118] sm:$0xff] }
 0x75c   :  { %v1371_v48 = vmul.f32 %v4893_v34, %v5701_v50  ;;  %v4895_v43 = vpop.eup %4894  ;;  %v1572_v50 = vld [vmem:[#allocation8 + $0x98] sm:$0xff]  ;;  %v5788_v34 = vpack.c.bf16 %v1581_v61, %v1577_v57  ;;  %v1610_v57 = vld [vmem:[#allocation8 + $0x1c8] sm:$0xff] }
 0x75d   :  { %v5770_v25 = vpack.c.bf16 %v1576_v60, %v1572_v50  ;;  %v1592_v31 = vld [vmem:[#allocation8 + $0x138] sm:$0xff]  ;;  %v1606_v50 = vld [vmem:[#allocation8 + $0x1a8] sm:$0xff] }
 0x75e   :  { %v5751_v49 = vadd.f32 %v1372_v40, %v1371_v48  ;;  %v5790_v40 = vpack.c.bf16 %v1583_v14, %v1579_v9  ;;  %v1589_v48 = vld [vmem:[#allocation8 + $0x120] sm:$0xff]  ;;  %v5796_v58 = vpack.c.bf16 %v1592_v31, %v1588_v26  ;;  %v1604_v60 = vld [vmem:[#allocation8 + $0x198] sm:$0xff]  ;;  %v5818_v41 = vpack.c.bf16 %v1606_v50, %v1602_v39  ;;  %v1614_v61 = vld [vmem:[#allocation8 + $0x1e8] sm:$0xff] }
 0x75f   :  { %v5800_v21 = vpack.c.bf16 %v1589_v48, %v1585_v42  ;;  %v1612_v9 = vld [vmem:[#allocation8 + $0x1d8] sm:$0xff]  ;;  %v1609_v26 = vld [vmem:[#allocation8 + $0x1c0] sm:$0xff]  ;;  %v5830_v42 = vpack.c.bf16 %v1614_v61, %v1610_v57  ;;  %v5844_v50 = vpack.c.bf16 %v1624_v3, %v1620_v52  ;;  %v5848_v57 = vpack.c.bf16 %v1621_v35, %v1617_v20 }
 0x760   :  { %6614 = vst [vmem:[#allocation24_spill] sm:$0xff] %v5751_v49  ;;  %4896 = vtanh.f32 %v5751_v49  ;;  %v1616_v14 = vld [vmem:[#allocation8 + $0x1f8] sm:$0xff]  ;;  %v1613_v31 = vld [vmem:[#allocation8 + $0x1e0] sm:$0xff]  ;;  %v1654_v49 = vld [vmem:[#allocation8 + $0x328] sm:$0xff] }
 0x761   :  { %v5832_v48 = vpack.c.bf16 %v1616_v14, %v1612_v9  ;;  %v5836_v4 = vpack.c.bf16 %v1613_v31, %v1609_v26  ;;  %v1625_v9 = vld [vmem:[#allocation8 + $0x240] sm:$0xff]  ;;  %v5854_v26 = vpack.c.bf16 %v1630_v36, %v1626_v32  ;;  %v5856_v31 = vpack.c.bf16 %v1632_v47, %v1628_v45  ;;  %v1636_v52 = vld [vmem:[#allocation8 + $0x298] sm:$0xff]  ;;  %v1635_v45 = vld [vmem:[#allocation8 + $0x290] sm:$0xff] }
 0x762   :  { %v1629_v14 = vld [vmem:[#allocation8 + $0x260] sm:$0xff]  ;;  %v1640_v3 = vld [vmem:[#allocation8 + $0x2b8] sm:$0xff]  ;;  %v1639_v47 = vld [vmem:[#allocation8 + $0x2b0] sm:$0xff] }
 0x763   :  { %v5860_v20 = vpack.c.bf16 %v1629_v14, %v1625_v9  ;;  %v5868_v36 = vpack.c.bf16 %v1640_v3, %v1636_v52  ;;  %v5874_v14 = vpack.c.bf16 %v1639_v47, %v1635_v45  ;;  %v1643_v52 = vld [vmem:[#allocation8 + $0x2d0] sm:$0xff]  ;;  %v1649_v45 = vld [vmem:[#allocation8 + $0x300] sm:$0xff] }
 0x764   :  { %v1647_v3 = vld [vmem:[#allocation8 + $0x2f0] sm:$0xff]  ;;  %v1653_v47 = vld [vmem:[#allocation8 + $0x320] sm:$0xff] }
 0x765   :  { %6616 = vst [vmem:[#allocation26_spill] sm:$0xff] %v5874_v14 }
 0x76a   :  { %v4897_v0 = vpop.eup %4896 }
 0x76b   :  { %v1375_v28 = vmul.f32 %v4897_v0, %v4895_v43  ;;  %v1598_v43 = vld [vmem:[#allocation8 + $0x168] sm:$0xff]  ;;  %v5802_v0 = vpack.c.bf16 %v1591_v1, %v1587_v59  ;;  %v1611_v59 = vld [vmem:[#allocation8 + $0x1d0] sm:$0xff] }
 0x76c   :  { %v1615_v1 = vld [vmem:[#allocation8 + $0x1f0] sm:$0xff] }
 0x76d   :  { %1377 = vst [vmem:[#allocation2 + $0xc] sm:$0x3] %v1375_v28  ;;  %1448 = vmatmul.mubr.f32.vlgmr.msra.gmra.mrb[14].mxu0 %v1375_v28  ;;  %1519 = vmatmul.mubr.f32.vlgmr.msra.gmra.mrb[14].mxu1 %v1375_v28  ;;  %v5806_v28 = vpack.c.bf16 %v1598_v43, %v1594_v22  ;;  %v1618_v22 = vld [vmem:[#allocation8 + $0x208] sm:$0xff]  ;;  %v5838_v11 = vpack.c.bf16 %v1615_v1, %v1611_v59  ;;  %v1627_v59 = vld [vmem:[#allocation8 + $0x250] sm:$0xff] }
 0x76e   :  { %3756 = vmatpush1.bf16.msra.mxu0 %v5754_v27  ;;  %3820 = vmatpush1.bf16.msra.mxu1 %v5756_v2  ;;  %v1622_v43 = vld [vmem:[#allocation8 + $0x228] sm:$0xff]  ;;  %v1631_v1 = vld [vmem:[#allocation8 + $0x270] sm:$0xff] }
 0x76f   :  { %1772 = vmatprep.mubr.f32.mxu0 %v1686_v53  ;;  %1843 = vmatprep.mubr.f32.mxu1 %v1686_v53  ;;  %v1608_v53 = vld [vmem:[#allocation8 + $0x1b8] sm:$0xff]  ;;  %v5842_v39 = vpack.c.bf16 %v1622_v43, %v1618_v22  ;;  %v1634_v22 = vld [vmem:[#allocation8 + $0x288] sm:$0xff]  ;;  %v5862_v35 = vpack.c.bf16 %v1631_v1, %v1627_v59  ;;  %v1641_v59 = vld [vmem:[#allocation8 + $0x2c0] sm:$0xff] }
 0x770   :  { %3758 = vmatprep.subr.bf16.mxu0 %v5758_v55  ;;  %3822 = vmatprep.subr.bf16.mxu1 %v5760_v38  ;;  %v5820_v44 = vpack.c.bf16 %v1608_v53, %v1604_v60  ;;  %v1619_v60 = vld [vmem:[#allocation8 + $0x210] sm:$0xff]  ;;  %v1638_v43 = vld [vmem:[#allocation8 + $0x2a8] sm:$0xff]  ;;  %v1645_v1 = vld [vmem:[#allocation8 + $0x2e0] sm:$0xff] }
 0x771   :  { %v1623_v53 = vld [vmem:[#allocation8 + $0x230] sm:$0xff]  ;;  %v5866_v32 = vpack.c.bf16 %v1638_v43, %v1634_v22  ;;  %v5878_v22 = vpack.c.bf16 %v1646_v19, %v1642_v37  ;;  %v5880_v43 = vpack.c.bf16 %v1648_v10, %v1644_v12  ;;  %v5890_v10 = vpack.c.bf16 %v1654_v49, %v1650_v5 }
 0x772   :  { %3760 = vmatpush1.bf16.msra.mxu0 %v5764_v62  ;;  %3824 = vmatpush1.bf16.msra.mxu1 %v5766_v7  ;;  %v5850_v61 = vpack.c.bf16 %v1623_v53, %v1619_v60  ;;  %v1633_v60 = vld [vmem:[#allocation8 + $0x280] sm:$0xff]  ;;  %v5892_v12 = vpack.c.bf16 %v1656_v33, %v1652_v46  ;;  %v1651_v19 = vld [vmem:[#allocation8 + $0x310] sm:$0xff]  ;;  %v5902_v5 = vpack.c.bf16 %v1662_v15, %v1658_v18 }
 0x773   :  { %3762 = vmatprep.subr.bf16.mxu0 %v5768_v24  ;;  %3826 = vmatprep.subr.bf16.mxu1 %v5770_v25  ;;  %v1637_v53 = vld [vmem:[#allocation8 + $0x2a0] sm:$0xff]  ;;  %6617 = vst [vmem:[#allocation27_spill] sm:$0xff] %v5878_v22  ;;  %6618 = vst [vmem:[#allocation28_spill] sm:$0xff] %v5880_v43  ;;  %v1655_v37 = vld [vmem:[#allocation8 + $0x330] sm:$0xff] }
 0x774   :  { %v5872_v9 = vpack.c.bf16 %v1637_v53, %v1633_v60  ;;  %v5884_v60 = vpack.c.bf16 %v1645_v1, %v1641_v59  ;;  %v5886_v53 = vpack.c.bf16 %v1647_v3, %v1643_v52  ;;  %6621 = vst [vmem:[#allocation31_spill] sm:$0xff] %v5890_v10  ;;  %6622 = vst [vmem:[#allocation32_spill] sm:$0xff] %v5892_v12  ;;  %v1657_v52 = vld [vmem:[#allocation8 + $0x340] sm:$0xff]  ;;  %v1659_v46 = vld [vmem:[#allocation8 + $0x350] sm:$0xff] }
 0x775   :  { %v5896_v59 = vpack.c.bf16 %v1653_v47, %v1649_v45  ;;  %v5898_v1 = vpack.c.bf16 %v1655_v37, %v1651_v19  ;;  %v1661_v3 = vld [vmem:[#allocation8 + $0x360] sm:$0xff]  ;;  %6625 = vst [vmem:[#allocation35_spill] sm:$0xff] %v5902_v5  ;;  %v1663_v49 = vld [vmem:[#allocation8 + $0x370] sm:$0xff] }
 0x776   :  { %3764 = vmatpush1.bf16.msra.mxu0 %v5776_v51  ;;  %3828 = vmatpush1.bf16.msra.mxu1 %v5778_v54  ;;  %6615 = vst [vmem:[#allocation25_spill] sm:$0xff] %v5872_v9  ;;  %6619 = vst [vmem:[#allocation29_spill] sm:$0xff] %v5884_v60  ;;  %v5908_v45 = vpack.c.bf16 %v1661_v3, %v1657_v52  ;;  %v5910_v47 = vpack.c.bf16 %v1663_v49, %v1659_v46  ;;  %v1665_v19 = vld [vmem:[#allocation8 + $0x380] sm:$0xff]  ;;  %v1679_v49 = vld [vmem:[#allocation8 + $0x3f0] sm:$0xff] }
 0x777   :  { %3766 = vmatprep.subr.bf16.mxu0 %v5782_v63  ;;  %3830 = vmatprep.subr.bf16.mxu1 %v5784_v6  ;;  %6620 = vst [vmem:[#allocation30_spill] sm:$0xff] %v5886_v53  ;;  %6623 = vst [vmem:[#allocation33_spill] sm:$0xff] %v5896_v59  ;;  %v1669_v37 = vld [vmem:[#allocation8 + $0x3a0] sm:$0xff] }
 0x778   :  { %6624 = vst [vmem:[#allocation34_spill] sm:$0xff] %v5898_v1  ;;  %6627 = vst [vmem:[#allocation37_spill] sm:$0xff] %v5908_v45  ;;  %v5920_v52 = vpack.c.bf16 %v1669_v37, %v1665_v19  ;;  %v1673_v46 = vld [vmem:[#allocation8 + $0x3c0] sm:$0xff] }
 0x779   :  { %6628 = vst [vmem:[#allocation38_spill] sm:$0xff] %v5910_v47 }
 0x77a   :  { %3768 = vmatpush1.bf16.msra.mxu0 %v5788_v34  ;;  %3832 = vmatpush1.bf16.msra.mxu1 %v5790_v40  ;;  %6631 = vst [vmem:[#allocation41_spill] sm:$0xff] %v5920_v52 }
 0x77b   :  { %3770 = vmatprep.subr.bf16.mxu0 %v5794_v56  ;;  %3834 = vmatprep.subr.bf16.mxu1 %v5796_v58 }
 0x77e   :  { %3772 = vmatpush1.bf16.msra.mxu0 %v5800_v21  ;;  %3836 = vmatpush1.bf16.msra.mxu1 %v5802_v0 }
 0x77f   :  { %3774 = vmatprep.subr.bf16.mxu0 %v5806_v28  ;;  %3838 = vmatprep.subr.bf16.mxu1 %v5808_v30 }
 0x782   :  { %3776 = vmatpush1.bf16.msra.mxu0 %v5812_v8  ;;  %3840 = vmatpush1.bf16.msra.mxu1 %v5814_v13 }
 0x783   :  { %3778 = vmatprep.subr.bf16.mxu0 %v5818_v41  ;;  %3842 = vmatprep.subr.bf16.mxu1 %v5820_v44 }
 0x786   :  { %3780 = vmatpush1.bf16.msra.mxu0 %v5824_v17  ;;  %3844 = vmatpush1.bf16.msra.mxu1 %v5826_v23 }
 0x787   :  { %3782 = vmatprep.subr.bf16.mxu0 %v5830_v42  ;;  %3846 = vmatprep.subr.bf16.mxu1 %v5832_v48 }
 0x78a   :  { %3784 = vmatpush1.bf16.msra.mxu0 %v5836_v4  ;;  %3848 = vmatpush1.bf16.msra.mxu1 %v5838_v11 }
 0x78b   :  { %3786 = vmatprep.subr.bf16.mxu0 %v5842_v39  ;;  %3850 = vmatprep.subr.bf16.mxu1 %v5844_v50 }
 0x78e   :  { %3788 = vmatpush1.bf16.msra.mxu0 %v5848_v57  ;;  %3852 = vmatpush1.bf16.msra.mxu1 %v5850_v61 }
 0x78f   :  { %3790 = vmatprep.subr.bf16.mxu0 %v5854_v26  ;;  %3854 = vmatprep.subr.bf16.mxu1 %v5856_v31 }
 0x792   :  { %3792 = vmatpush1.bf16.msra.mxu0 %v5860_v20  ;;  %3856 = vmatpush1.bf16.msra.mxu1 %v5862_v35 }
 0x793   :  { %3794 = vmatprep.subr.bf16.mxu0 %v5866_v32  ;;  %3858 = vmatprep.subr.bf16.mxu1 %v5868_v36 }
 0x796   :  { %3796 = vmatpush1.bf16.msra.mxu0 %v5872_v9  ;;  %3860 = vmatpush1.bf16.msra.mxu1 %v5874_v14  ;;  %v1660_v9 = vld [vmem:[#allocation8 + $0x358] sm:$0xff] }
 0x797   :  { %3798 = vmatprep.subr.bf16.mxu0 %v5878_v22  ;;  %3862 = vmatprep.subr.bf16.mxu1 %v5880_v43  ;;  %v1664_v14 = vld [vmem:[#allocation8 + $0x378] sm:$0xff]  ;;  %v1666_v43 = vld [vmem:[#allocation8 + $0x388] sm:$0xff] }
 0x798   :  { %v5904_v33 = vpack.c.bf16 %v1664_v14, %v1660_v9  ;;  %v1668_v22 = vld [vmem:[#allocation8 + $0x398] sm:$0xff]  ;;  %v1667_v9 = vld [vmem:[#allocation8 + $0x390] sm:$0xff] }
 0x799   :  { %v1671_v14 = vld [vmem:[#allocation8 + $0x3b0] sm:$0xff] }
 0x79a   :  { %3800 = vmatpush1.bf16.msra.mxu0 %v5884_v60  ;;  %3864 = vmatpush1.bf16.msra.mxu1 %v5886_v53  ;;  %6626 = vst [vmem:[#allocation36_spill] sm:$0xff] %v5904_v33  ;;  %v1670_v60 = vld [vmem:[#allocation8 + $0x3a8] sm:$0xff]  ;;  %v1672_v53 = vld [vmem:[#allocation8 + $0x3b8] sm:$0xff]  ;;  %v5922_v3 = vpack.c.bf16 %v1671_v14, %v1667_v9  ;;  %v6640_v14 = vld [vmem:[#allocation28_spill] sm:$0xff] }
 0x79b   :  { %3802 = vmatprep.subr.bf16.mxu0 %v5890_v10  ;;  %3866 = vmatprep.subr.bf16.mxu1 %v5892_v12  ;;  %v5914_v15 = vpack.c.bf16 %v1670_v60, %v1666_v43  ;;  %v5916_v18 = vpack.c.bf16 %v1672_v53, %v1668_v22  ;;  %v1674_v12 = vld [vmem:[#allocation8 + $0x3c8] sm:$0xff]  ;;  %v1676_v10 = vld [vmem:[#allocation8 + $0x3d8] sm:$0xff]  ;;  %v1677_v60 = vld [vmem:[#allocation8 + $0x3e0] sm:$0xff] }
 0x79c   :  { %6632 = vst [vmem:[#allocation42_spill] sm:$0xff] %v5922_v3  ;;  %v1675_v53 = vld [vmem:[#allocation8 + $0x3d0] sm:$0xff]  ;;  %v5932_v19 = vpack.c.bf16 %v1677_v60, %v1673_v46  ;;  %v6639_v9 = vld [vmem:[#allocation27_spill] sm:$0xff]  ;;  %v6641_v46 = vld [vmem:[#allocation29_spill] sm:$0xff] }
 0x79d   :  { %6629 = vst [vmem:[#allocation39_spill] sm:$0xff] %v5914_v15  ;;  %6630 = vst [vmem:[#allocation40_spill] sm:$0xff] %v5916_v18  ;;  %v5934_v37 = vpack.c.bf16 %v1679_v49, %v1675_v53  ;;  %v6642_v60 = vld [vmem:[#allocation30_spill] sm:$0xff]  ;;  %v6643_v53 = vld [vmem:[#allocation31_spill] sm:$0xff] }
 0x79e   :  { %3804 = vmatpush1.bf16.msra.mxu0 %v5896_v59  ;;  %3868 = vmatpush1.bf16.msra.mxu1 %v5898_v1  ;;  %v1678_v59 = vld [vmem:[#allocation8 + $0x3e8] sm:$0xff]  ;;  %v1680_v1 = vld [vmem:[#allocation8 + $0x3f8] sm:$0xff]  ;;  %6635 = vst [vmem:[#allocation45_spill] sm:$0xff] %v5932_v19  ;;  %v6644_v49 = vld [vmem:[#allocation32_spill] sm:$0xff] }
 0x79f   :  { %3806 = vmatprep.subr.bf16.mxu0 %v5902_v5  ;;  %3870 = vmatprep.subr.bf16.mxu1 %v5904_v33  ;;  %v5926_v22 = vpack.c.bf16 %v1678_v59, %v1674_v12  ;;  %v5928_v43 = vpack.c.bf16 %v1680_v1, %v1676_v10  ;;  %6636 = vst [vmem:[#allocation46_spill] sm:$0xff] %v5934_v37  ;;  %v3151_v10 = vld [vmem:[%s6538_s5 + $0x2] sm:$0x3]  ;;  %v6637_v59 = vld [vmem:[#allocation25_spill] sm:$0xff] }
 0x7a0   :  { %v1875_v12 = vld [vmem:[#allocation2 + $0x2] sm:$0x3] }
 0x7a1   :  { %6633 = vst [vmem:[#allocation43_spill] sm:$0xff] %v5926_v22  ;;  %6634 = vst [vmem:[#allocation44_spill] sm:$0xff] %v5928_v43  ;;  %v6638_v1 = vld [vmem:[#allocation26_spill] sm:$0xff] }
 0x7a2   :  { %3808 = vmatpush1.bf16.msra.mxu0 %v5908_v45  ;;  %3872 = vmatpush1.bf16.msra.mxu1 %v5910_v47 }
 0x7a3   :  { %3810 = vmatprep.subr.bf16.mxu0 %v5914_v15  ;;  %3874 = vmatprep.subr.bf16.mxu1 %v5916_v18 }
 0x7a6   :  { %3812 = vmatpush1.bf16.msra.mxu0 %v5920_v52  ;;  %3876 = vmatpush1.bf16.msra.mxu1 %v5922_v3 }
 0x7a7   :  { %3814 = vmatprep.subr.bf16.mxu0 %v5926_v22  ;;  %3878 = vmatprep.subr.bf16.mxu1 %v5928_v43 }
 0x7aa   :  { %3816 = vmatpush1.bf16.msra.mxu0 %v5932_v19  ;;  %3880 = vmatpush1.bf16.msra.mxu1 %v5934_v37 }
 0x7ab   :  { %3882 = vmatprep.subr.bf16.mxu0 %v5740_v16  ;;  %3946 = vmatprep.subr.bf16.mxu1 %v5742_v29 }
 0x7ad   :  { %1773 = vmatmul.mubr.f32.vlgmr.msra.gmra.mrb[16].mxu0 %v3151_v10  ;;  %1844 = vmatmul.mubr.f32.vlgmr.msra.gmra.mrb[16].mxu1 %v3151_v10  ;;  %v6645_v10 = vld [vmem:[#allocation33_spill] sm:$0xff] }
 0x7ae   :  { %1940 = vmatprep.mubr.f32.mxu0 %v1875_v12  ;;  %2011 = vmatprep.mubr.f32.mxu1 %v1875_v12  ;;  %v6646_v12 = vld [vmem:[#allocation34_spill] sm:$0xff] }
 0x7af   :  { %3884 = vmatpush1.bf16.msra.mxu0 %v5754_v27  ;;  %3948 = vmatpush1.bf16.msra.mxu1 %v5756_v2 }
 0x7b0   :  { %3886 = vmatprep.subr.bf16.mxu0 %v5758_v55  ;;  %3950 = vmatprep.subr.bf16.mxu1 %v5760_v38 }
 0x7b3   :  { %3888 = vmatpush1.bf16.msra.mxu0 %v5764_v62  ;;  %3952 = vmatpush1.bf16.msra.mxu1 %v5766_v7 }
 0x7b4   :  { %3890 = vmatprep.subr.bf16.mxu0 %v5768_v24  ;;  %3954 = vmatprep.subr.bf16.mxu1 %v5770_v25 }
 0x7b7   :  { %3892 = vmatpush1.bf16.msra.mxu0 %v5776_v51  ;;  %3956 = vmatpush1.bf16.msra.mxu1 %v5778_v54 }
 0x7b8   :  { %3894 = vmatprep.subr.bf16.mxu0 %v5782_v63  ;;  %3958 = vmatprep.subr.bf16.mxu1 %v5784_v6 }
 0x7bb   :  { %3896 = vmatpush1.bf16.msra.mxu0 %v5788_v34  ;;  %3960 = vmatpush1.bf16.msra.mxu1 %v5790_v40 }
 0x7bc   :  { %3898 = vmatprep.subr.bf16.mxu0 %v5794_v56  ;;  %3962 = vmatprep.subr.bf16.mxu1 %v5796_v58 }
 0x7bf   :  { %3900 = vmatpush1.bf16.msra.mxu0 %v5800_v21  ;;  %3964 = vmatpush1.bf16.msra.mxu1 %v5802_v0 }
 0x7c0   :  { %3902 = vmatprep.subr.bf16.mxu0 %v5806_v28  ;;  %3966 = vmatprep.subr.bf16.mxu1 %v5808_v30 }
 0x7c3   :  { %3904 = vmatpush1.bf16.msra.mxu0 %v5812_v8  ;;  %3968 = vmatpush1.bf16.msra.mxu1 %v5814_v13 }
 0x7c4   :  { %3906 = vmatprep.subr.bf16.mxu0 %v5818_v41  ;;  %3970 = vmatprep.subr.bf16.mxu1 %v5820_v44 }
 0x7c7   :  { %3908 = vmatpush1.bf16.msra.mxu0 %v5824_v17  ;;  %3972 = vmatpush1.bf16.msra.mxu1 %v5826_v23 }
 0x7c8   :  { %3910 = vmatprep.subr.bf16.mxu0 %v5830_v42  ;;  %3974 = vmatprep.subr.bf16.mxu1 %v5832_v48 }
 0x7cb   :  { %3912 = vmatpush1.bf16.msra.mxu0 %v5836_v4  ;;  %3976 = vmatpush1.bf16.msra.mxu1 %v5838_v11 }
 0x7cc   :  { %3914 = vmatprep.subr.bf16.mxu0 %v5842_v39  ;;  %3978 = vmatprep.subr.bf16.mxu1 %v5844_v50 }
 0x7cf   :  { %3916 = vmatpush1.bf16.msra.mxu0 %v5848_v57  ;;  %3980 = vmatpush1.bf16.msra.mxu1 %v5850_v61 }
 0x7d0   :  { %3918 = vmatprep.subr.bf16.mxu0 %v5854_v26  ;;  %3982 = vmatprep.subr.bf16.mxu1 %v5856_v31 }
 0x7d3   :  { %3920 = vmatpush1.bf16.msra.mxu0 %v5860_v20  ;;  %3984 = vmatpush1.bf16.msra.mxu1 %v5862_v35 }
 0x7d4   :  { %3922 = vmatprep.subr.bf16.mxu0 %v5866_v32  ;;  %3986 = vmatprep.subr.bf16.mxu1 %v5868_v36 }
 0x7d7   :  { %3924 = vmatpush1.bf16.msra.mxu0 %v6637_v59  ;;  %3988 = vmatpush1.bf16.msra.mxu1 %v6638_v1 }
 0x7d8   :  { %3926 = vmatprep.subr.bf16.mxu0 %v6639_v9  ;;  %3990 = vmatprep.subr.bf16.mxu1 %v6640_v14 }
 0x7db   :  { %3928 = vmatpush1.bf16.msra.mxu0 %v6641_v46  ;;  %3992 = vmatpush1.bf16.msra.mxu1 %v6642_v60 }
 0x7dc   :  { %3930 = vmatprep.subr.bf16.mxu0 %v6643_v53  ;;  %3994 = vmatprep.subr.bf16.mxu1 %v6644_v49 }
 0x7df   :  { %3932 = vmatpush1.bf16.msra.mxu0 %v6645_v10  ;;  %3996 = vmatpush1.bf16.msra.mxu1 %v6646_v12 }
 0x7e0   :  { %3934 = vmatprep.subr.bf16.mxu0 %v5902_v5  ;;  %3998 = vmatprep.subr.bf16.mxu1 %v5904_v33  ;;  %v6648_v5 = vld [vmem:[#allocation19_spill] sm:$0xff] }
 0x7e3   :  { %3936 = vmatpush1.bf16.msra.mxu0 %v5908_v45  ;;  %4000 = vmatpush1.bf16.msra.mxu1 %v5910_v47  ;;  %v6647_v45 = vld [vmem:[#allocation18_spill] sm:$0xff] }
 0x7e4   :  { %3938 = vmatprep.subr.bf16.mxu0 %v5914_v15  ;;  %4002 = vmatprep.subr.bf16.mxu1 %v5916_v18 }
 0x7e7   :  { %3940 = vmatpush1.bf16.msra.mxu0 %v5920_v52  ;;  %4004 = vmatpush1.bf16.msra.mxu1 %v5922_v3 }
 0x7e8   :  { %3942 = vmatprep.subr.bf16.mxu0 %v5926_v22  ;;  %4006 = vmatprep.subr.bf16.mxu1 %v5928_v43  ;;  %v6649_v43 = vld [vmem:[#allocation20_spill] sm:$0xff] }
 0x7eb   :  { %3944 = vmatpush1.bf16.msra.mxu0 %v5932_v19  ;;  %4008 = vmatpush1.bf16.msra.mxu1 %v5934_v37  ;;  %v6650_v37 = vld [vmem:[#allocation21_spill] sm:$0xff] }
 0x7ec   :  { %4010 = vmatprep.subr.bf16.mxu0 %v5740_v16  ;;  %4074 = vmatprep.subr.bf16.mxu1 %v5742_v29 }
 0x840   :  { %v1449_v47 = vpop.f32.mrb[14].mxu0  ;;  %v1520_v15 = vpop.f32.mrb[14].mxu1 }
 0x841   :  { %v1450_v18 = vadd.f32 %v1449_v47, %v6647_v45  ;;  %v1451_v33 = vpop.f32.mrb[15].mxu0  ;;  %v1522_v52 = vpop.f32.mrb[15].mxu1  ;;  %v1521_v49 = vadd.f32 %v1520_v15, %v6650_v37 }
 0x842   :  { %v1452_v3 = vadd.f32 %v1451_v33, %v6648_v5  ;;  %v1523_v19 = vadd.f32 %v1522_v52, %v6649_v43 }
 0x843   :  { %v3148_v12 = vmul.f32 -1.442695, %v1450_v18 }
 0x844   :  { %v3149_v22 = vmul.f32 -1.442695, %v1452_v3  ;;  %v3150_v10 = vmul.f32 -1.442695, %v1523_v19  ;;  %v6652_v19 = vld [vmem:[#allocation17_spill] sm:$0xff] }
 0x845   :  { %4898 = vpow2.f32 %v3148_v12  ;;  %v6653_v37 = vsub.s32 0, %v6652_v19 }
 0x846   :  { %4900 = vpow2.f32 %v3149_v22  ;;  %v6651_v22 = vld [vmem:[#allocation24_spill] sm:$0xff] }
 0x847   :  { %4902 = vpow2.f32 %v3150_v10 }
 0x848   :  { %4904 = vtanh.f32 %v1521_v49 }
 0x84f   :  { %v4899_v16 = vpop.eup %4898 }
 0x850   :  { %v4901_v53 = vpop.eup %4900  ;;  %v1528_v29 = vadd.f32 1.0, %v4899_v16 }
 0x851   :  { %v1534_v60 = vadd.f32 1.0, %v4901_v53  ;;  %v4903_v45 = vpop.eup %4902  ;;  %v6655_v53 = vsub.s32 1, %v6652_v19 }
 0x852   :  { %4906 = vrcp.f32 %v1528_v29  ;;  %v4905_v47 = vpop.eup %4904  ;;  %v1541_v3 = vadd.f32 1.0, %v4903_v45  ;;  %v1681_v29 = vld [vmem:[%s6537_s4] sm:$0xf] }
 0x853   :  { %4908 = vrcp.f32 %v1534_v60  ;;  %v6019_v60 = vrot.slane %v1681_v29, %v6653_v37  ;;  %v6023_v49 = vrot.slane %v1681_v29, %v6655_v53 }
 0x854   :  { %4910 = vrcp.f32 %v1541_v3 }
 0x855   :  { %6654 = vst [vmem:[#allocation25_spill] sm:$0xff] %v6019_v60  ;;  %6656 = vst [vmem:[#allocation26_spill] sm:$0xff] %v6023_v49 }
 0x85c   :  { %v4907_v5 = vpop.eup %4906 }
 0x85d   :  { %v4909_v33 = vpop.eup %4908  ;;  %v1545_v18 = vmul.f32 %v4907_v5, %v4905_v47 }
 0x85e   :  { %v1544_v12 = vmul.f32 %v4909_v33, %v6651_v22  ;;  %v4911_v15 = vpop.eup %4910  ;;  %v6657_v22 = vsub.s32 3, %v6652_v19 }
 0x860   :  { %v1546_v52 = vadd.f32 %v1545_v18, %v1544_v12  ;;  %v6029_v12 = vrot.slane %v1681_v29, %v6657_v22 }
 0x862   :  { %4912 = vtanh.f32 %v1546_v52  ;;  %1552 = vst [vmem:[#allocation12] sm:$0x3] %v1546_v52 }
 0x86c   :  { %v4913_v43 = vpop.eup %4912 }
 0x86d   :  { %v1548_v16 = vmul.f32 %v4913_v43, %v4911_v15  ;;  %v6658_v43 = vsub.s32 2, %v6652_v19 }
 0x86f   :  { %1550 = vst [vmem:[#allocation2 + $0xe] sm:$0x3] %v1548_v16  ;;  %1551 = vst [vmem:[#allocation10] sm:$0x3] %v1548_v16  ;;  %v6034_v16 = vrot.slane %v1681_v29, %v6658_v43 }
 0x880   :  { %v1774_v10 = vpop.f32.mrb[16].mxu0  ;;  %v1845_v45 = vpop.f32.mrb[16].mxu1 }
 0x881   :  { %v1775_v47 = vadd.f32 %v1774_v10, %v6019_v60  ;;  %v1776_v5 = vpop.f32.mrb[17].mxu0  ;;  %v1847_v33 = vpop.f32.mrb[17].mxu1  ;;  %v1846_v53 = vadd.f32 %v1845_v45, %v6034_v16 }
 0x882   :  { %v1777_v18 = vadd.f32 %v1776_v5, %v6023_v49  ;;  %v1848_v15 = vadd.f32 %v1847_v33, %v6029_v12  ;;  %v3152_v33 = vld [vmem:[%s6539_s6 + $0x2] sm:$0x3]  ;;  %s5188_s6 = smov [#allocation10]  }
 0x883   :  { %v3153_v3 = vmul.f32 -1.442695, %v1775_v47  ;;  %s3079_s13 = sshll.u32 %s5188_s6, 4  ;;  %s3080_s13 = int_to_ptr.vmem [resolvable:$true] %s3079_s13 }
 0x884   :  { %v3154_v52 = vmul.f32 -1.442695, %v1777_v18  ;;  %v3155_v37 = vmul.f32 -1.442695, %v1848_v15  ;;  %s5108_s18 = scalar_lea.vmem %s3080_s13, 64  ;;  %p5113_p11 = scmp.lt.s32.totalorder %s3080_s13, %s3080_s13 }
 0x885   :  { %4914 = vpow2.f32 %v3153_v3  ;;  %p5109_p10 = scmp.ne.s32.totalorder %s3080_s13, %s5108_s18  ;;  %p5114_p12 = scmp.lt.s32.totalorder %s5108_s18, %s5108_s18 }
 0x886   :  { %4916 = vpow2.f32 %v3154_v52 }
 0x887   :  { %4918 = vpow2.f32 %v3155_v37  ;;  %p5115_p13 = por %p5114_p12, %p5113_p11 }
 0x888   :  { %4920 = vtanh.f32 %v1846_v53 }
 0x889   :  { %p5116_p0 = pnand %p5115_p13, %p5109_p10 }
 0x88f   :  { %v4915_v10 = vpop.eup %4914 }
 0x890   :  { %v4917_v5 = vpop.eup %4916  ;;  %v1853_v47 = vadd.f32 1.0, %v4915_v10  ;;  %v6659_v10 = vld [vmem:[#allocation30_spill] sm:$0xff] }
 0x891   :  { %v1859_v49 = vadd.f32 1.0, %v4917_v5  ;;  %v4919_v18 = vpop.eup %4918  ;;  %v6660_v5 = vld [vmem:[#allocation31_spill] sm:$0xff] }
 0x892   :  { %4922 = vrcp.f32 %v1853_v47  ;;  %v4921_v3 = vpop.eup %4920  ;;  %v1866_v29 = vadd.f32 1.0, %v4919_v18  ;;  %v6661_v47 = vld [vmem:[#allocation32_spill] sm:$0xff]  ;;  %v6662_v18 = vld [vmem:[#allocation33_spill] sm:$0xff] }
 0x893   :  { %4924 = vrcp.f32 %v1859_v49  ;;  %v2044_v49 = vld [vmem:[#allocation2 + $0x4] sm:$0x3] }
 0x894   :  { %4926 = vrcp.f32 %v1866_v29  ;;  %v6666_v29 = vld [vmem:[#allocation37_spill] sm:$0xff] }
 0x89c   :  { %v4923_v19 = vpop.eup %4922 }
 0x89d   :  { %v4925_v22 = vpop.eup %4924  ;;  %v1870_v52 = vmul.f32 %v4923_v19, %v4921_v3  ;;  %v6663_v3 = vld [vmem:[#allocation34_spill] sm:$0xff]  ;;  %v6665_v19 = vld [vmem:[#allocation36_spill] sm:$0xff] }
 0x89e   :  { %v1869_v15 = vmul.f32 %v4925_v22, %v3152_v33  ;;  %v4927_v43 = vpop.eup %4926  ;;  %v6664_v33 = vld [vmem:[#allocation35_spill] sm:$0xff]  ;;  %v6667_v22 = vld [vmem:[#allocation38_spill] sm:$0xff] }
 0x8a0   :  { %v6040_v45 = vadd.f32 %v1870_v52, %v1869_v15  ;;  %v6668_v52 = vld [vmem:[#allocation39_spill] sm:$0xff]  ;;  %v6669_v15 = vld [vmem:[#allocation40_spill] sm:$0xff] }
 0x8a2   :  { %4928 = vtanh.f32 %v6040_v45 }
 0x8ac   :  { %v4929_v37 = vpop.eup %4928 }
 0x8ad   :  { %v1873_v53 = vmul.f32 %v4929_v37, %v4927_v43  ;;  %v6670_v43 = vld [vmem:[#allocation41_spill] sm:$0xff]  ;;  %v6671_v37 = vld [vmem:[#allocation42_spill] sm:$0xff] }
 0x8af   :  { %1874 = vst [vmem:[#allocation9] sm:$0x3] %v1873_v53  ;;  %1941 = vmatmul.mubr.f32.vlgmr.msra.gmra.mrb[18].mxu0 %v1873_v53  ;;  %2012 = vmatmul.mubr.f32.vlgmr.msra.gmra.mrb[18].mxu1 %v1873_v53  ;;  %v6672_v53 = vld [vmem:[#allocation43_spill] sm:$0xff] }
 0x8b0   :  { %2109 = vmatprep.mubr.f32.mxu0 %v2044_v49  ;;  %2180 = vmatprep.mubr.f32.mxu1 %v2044_v49  ;;  %v6673_v49 = vld [vmem:[#allocation44_spill] sm:$0xff] }
 0x8b1   :  { %4012 = vmatpush1.bf16.msra.mxu0 %v5754_v27  ;;  %4076 = vmatpush1.bf16.msra.mxu1 %v5756_v2 }
 0x8b2   :  { %4014 = vmatprep.subr.bf16.mxu0 %v5758_v55  ;;  %4078 = vmatprep.subr.bf16.mxu1 %v5760_v38 }
 0x8b5   :  { %4016 = vmatpush1.bf16.msra.mxu0 %v5764_v62  ;;  %4080 = vmatpush1.bf16.msra.mxu1 %v5766_v7 }
 0x8b6   :  { %4018 = vmatprep.subr.bf16.mxu0 %v5768_v24  ;;  %4082 = vmatprep.subr.bf16.mxu1 %v5770_v25 }
 0x8b9   :  { %4020 = vmatpush1.bf16.msra.mxu0 %v5776_v51  ;;  %4084 = vmatpush1.bf16.msra.mxu1 %v5778_v54 }
 0x8ba   :  { %4022 = vmatprep.subr.bf16.mxu0 %v5782_v63  ;;  %4086 = vmatprep.subr.bf16.mxu1 %v5784_v6 }
 0x8bd   :  { %4024 = vmatpush1.bf16.msra.mxu0 %v5788_v34  ;;  %4088 = vmatpush1.bf16.msra.mxu1 %v5790_v40 }
 0x8be   :  { %4026 = vmatprep.subr.bf16.mxu0 %v5794_v56  ;;  %4090 = vmatprep.subr.bf16.mxu1 %v5796_v58 }
 0x8c1   :  { %4028 = vmatpush1.bf16.msra.mxu0 %v5800_v21  ;;  %4092 = vmatpush1.bf16.msra.mxu1 %v5802_v0 }
 0x8c2   :  { %4030 = vmatprep.subr.bf16.mxu0 %v5806_v28  ;;  %4094 = vmatprep.subr.bf16.mxu1 %v5808_v30 }
 0x8c5   :  { %4032 = vmatpush1.bf16.msra.mxu0 %v5812_v8  ;;  %4096 = vmatpush1.bf16.msra.mxu1 %v5814_v13 }
 0x8c6   :  { %4034 = vmatprep.subr.bf16.mxu0 %v5818_v41  ;;  %4098 = vmatprep.subr.bf16.mxu1 %v5820_v44 }
 0x8c9   :  { %4036 = vmatpush1.bf16.msra.mxu0 %v5824_v17  ;;  %4100 = vmatpush1.bf16.msra.mxu1 %v5826_v23 }
 0x8ca   :  { %4038 = vmatprep.subr.bf16.mxu0 %v5830_v42  ;;  %4102 = vmatprep.subr.bf16.mxu1 %v5832_v48 }
 0x8cd   :  { %4040 = vmatpush1.bf16.msra.mxu0 %v5836_v4  ;;  %4104 = vmatpush1.bf16.msra.mxu1 %v5838_v11 }
 0x8ce   :  { %4042 = vmatprep.subr.bf16.mxu0 %v5842_v39  ;;  %4106 = vmatprep.subr.bf16.mxu1 %v5844_v50 }
 0x8d1   :  { %4044 = vmatpush1.bf16.msra.mxu0 %v5848_v57  ;;  %4108 = vmatpush1.bf16.msra.mxu1 %v5850_v61 }
 0x8d2   :  { %4046 = vmatprep.subr.bf16.mxu0 %v5854_v26  ;;  %4110 = vmatprep.subr.bf16.mxu1 %v5856_v31 }
 0x8d5   :  { %4048 = vmatpush1.bf16.msra.mxu0 %v5860_v20  ;;  %4112 = vmatpush1.bf16.msra.mxu1 %v5862_v35 }
 0x8d6   :  { %4050 = vmatprep.subr.bf16.mxu0 %v5866_v32  ;;  %4114 = vmatprep.subr.bf16.mxu1 %v5868_v36 }
 0x8d9   :  { %4052 = vmatpush1.bf16.msra.mxu0 %v6637_v59  ;;  %4116 = vmatpush1.bf16.msra.mxu1 %v6638_v1 }
 0x8da   :  { %4054 = vmatprep.subr.bf16.mxu0 %v6639_v9  ;;  %4118 = vmatprep.subr.bf16.mxu1 %v6640_v14 }
 0x8dd   :  { %4056 = vmatpush1.bf16.msra.mxu0 %v6641_v46  ;;  %4120 = vmatpush1.bf16.msra.mxu1 %v6659_v10 }
 0x8de   :  { %4058 = vmatprep.subr.bf16.mxu0 %v6660_v5  ;;  %4122 = vmatprep.subr.bf16.mxu1 %v6661_v47  ;;  %v6678_v47 = vld [vmem:[#allocation26_spill] sm:$0xff] }
 0x8e1   :  { %4060 = vmatpush1.bf16.msra.mxu0 %v6662_v18  ;;  %4124 = vmatpush1.bf16.msra.mxu1 %v6663_v3  ;;  %v6674_v3 = vld [vmem:[#allocation45_spill] sm:$0xff] }
 0x8e2   :  { %4062 = vmatprep.subr.bf16.mxu0 %v6664_v33  ;;  %4126 = vmatprep.subr.bf16.mxu1 %v6665_v19  ;;  %v6675_v33 = vld [vmem:[#allocation46_spill] sm:$0xff] }
 0x8e3   :  { %v6676_v19 = vld [vmem:[#allocation22_spill] sm:$0xff] }
 0x8e5   :  { %4064 = vmatpush1.bf16.msra.mxu0 %v6666_v29  ;;  %4128 = vmatpush1.bf16.msra.mxu1 %v6667_v22  ;;  %v6677_v29 = vld [vmem:[#allocation23_spill] sm:$0xff] }
 0x8e6   :  { %4066 = vmatprep.subr.bf16.mxu0 %v6668_v52  ;;  %4130 = vmatprep.subr.bf16.mxu1 %v6669_v15 }
 0x8e9   :  { %4068 = vmatpush1.bf16.msra.mxu0 %v6670_v43  ;;  %4132 = vmatpush1.bf16.msra.mxu1 %v6671_v37 }
 0x8ea   :  { %4070 = vmatprep.subr.bf16.mxu0 %v6672_v53  ;;  %4134 = vmatprep.subr.bf16.mxu1 %v6673_v49 }
 0x8ed   :  { %4072 = vmatpush1.bf16.msra.mxu0 %v6674_v3  ;;  %4136 = vmatpush1.bf16.msra.mxu1 %v6675_v33 }
 0x8ee   :  { %4138 = vmatprep.subr.bf16.mxu0 %v6676_v19  ;;  %4202 = vmatprep.subr.bf16.mxu1 %v6677_v29 }
 0x982   :  { %v1942_v22 = vpop.f32.mrb[18].mxu0  ;;  %v2013_v52 = vpop.f32.mrb[18].mxu1 }
 0x983   :  { %v1943_v15 = vadd.f32 %v1942_v22, %v6019_v60  ;;  %v1944_v18 = vpop.f32.mrb[19].mxu0  ;;  %v2015_v43 = vpop.f32.mrb[19].mxu1  ;;  %v2014_v33 = vadd.f32 %v2013_v52, %v6034_v16 }
 0x984   :  { %v1945_v37 = vadd.f32 %v1944_v18, %v6678_v47  ;;  %v2016_v3 = vadd.f32 %v2015_v43, %v6029_v12 }
 0x985   :  { %v3156_v5 = vmul.f32 -1.442695, %v1943_v15 }
 0x986   :  { %v3157_v53 = vmul.f32 -1.442695, %v1945_v37  ;;  %v3158_v49 = vmul.f32 -1.442695, %v2016_v3 }
 0x987   :  { %4930 = vpow2.f32 %v3156_v5 }
 0x988   :  { %4932 = vpow2.f32 %v3157_v53 }
 0x989   :  { %4934 = vpow2.f32 %v3158_v49  ;;  %v6684_v49 = vld [vmem:[#allocation34_spill] sm:$0xff] }
 0x98a   :  { %4936 = vtanh.f32 %v2014_v33  ;;  %v6682_v33 = vld [vmem:[#allocation32_spill] sm:$0xff] }
 0x991   :  { %v4931_v19 = vpop.eup %4930 }
 0x992   :  { %v4933_v10 = vpop.eup %4932  ;;  %v2021_v29 = vadd.f32 1.0, %v4931_v19 }
 0x993   :  { %v2027_v46 = vadd.f32 1.0, %v4933_v10  ;;  %v4935_v22 = vpop.eup %4934  ;;  %v6681_v10 = vld [vmem:[#allocation31_spill] sm:$0xff] }
 0x994   :  { %4938 = vrcp.f32 %v2021_v29  ;;  %v4937_v60 = vpop.eup %4936  ;;  %v2034_v5 = vadd.f32 1.0, %v4935_v22  ;;  %v6683_v29 = vld [vmem:[#allocation33_spill] sm:$0xff]  ;;  %v6685_v22 = vld [vmem:[#allocation35_spill] sm:$0xff] }
 0x995   :  { %4940 = vrcp.f32 %v2027_v46  ;;  %v2213_v46 = vld [vmem:[#allocation2 + $0x6] sm:$0x3] }
 0x996   :  { %4942 = vrcp.f32 %v2034_v5  ;;  %v6689_v5 = vld [vmem:[#allocation39_spill] sm:$0xff] }
 0x99e   :  { %v4939_v18 = vpop.eup %4938 }
 0x99f   :  { %v4941_v15 = vpop.eup %4940  ;;  %v2038_v37 = vmul.f32 %v4939_v18, %v4937_v60  ;;  %v6679_v60 = vld [vmem:[#allocation29_spill] sm:$0xff]  ;;  %v6686_v18 = vld [vmem:[#allocation36_spill] sm:$0xff] }
 0x9a0   :  { %v2037_v53 = vmul.f32 %v4941_v15, %v6040_v45  ;;  %v4943_v3 = vpop.eup %4942  ;;  %v6680_v45 = vld [vmem:[#allocation30_spill] sm:$0xff]  ;;  %v6687_v15 = vld [vmem:[#allocation37_spill] sm:$0xff] }
 0x9a2   :  { %v6112_v43 = vadd.f32 %v2038_v37, %v2037_v53  ;;  %v6688_v37 = vld [vmem:[#allocation38_spill] sm:$0xff]  ;;  %v6690_v53 = vld [vmem:[#allocation40_spill] sm:$0xff] }
 0x9a4   :  { %4944 = vtanh.f32 %v6112_v43 }
 0x9ae   :  { %v4945_v19 = vpop.eup %4944 }
 0x9af   :  { %v2041_v52 = vmul.f32 %v4945_v19, %v4943_v3  ;;  %v6691_v3 = vld [vmem:[#allocation41_spill] sm:$0xff]  ;;  %v6692_v19 = vld [vmem:[#allocation42_spill] sm:$0xff] }
 0x9b1   :  { %2043 = vst [vmem:[#allocation9 + $0x2] sm:$0x3] %v2041_v52  ;;  %2110 = vmatmul.mubr.f32.vlgmr.msra.gmra.mrb[20].mxu0 %v2041_v52  ;;  %2181 = vmatmul.mubr.f32.vlgmr.msra.gmra.mrb[20].mxu1 %v2041_v52  ;;  %v6693_v52 = vld [vmem:[#allocation43_spill] sm:$0xff] }
 0x9b2   :  { %2278 = vmatprep.mubr.f32.mxu0 %v2213_v46  ;;  %2349 = vmatprep.mubr.f32.mxu1 %v2213_v46  ;;  %v6694_v46 = vld [vmem:[#allocation44_spill] sm:$0xff] }
 0x9b3   :  { %4140 = vmatpush1.bf16.msra.mxu0 %v5754_v27  ;;  %4204 = vmatpush1.bf16.msra.mxu1 %v5756_v2 }
 0x9b4   :  { %4142 = vmatprep.subr.bf16.mxu0 %v5758_v55  ;;  %4206 = vmatprep.subr.bf16.mxu1 %v5760_v38 }
 0x9b7   :  { %4144 = vmatpush1.bf16.msra.mxu0 %v5764_v62  ;;  %4208 = vmatpush1.bf16.msra.mxu1 %v5766_v7 }
 0x9b8   :  { %4146 = vmatprep.subr.bf16.mxu0 %v5768_v24  ;;  %4210 = vmatprep.subr.bf16.mxu1 %v5770_v25 }
 0x9bb   :  { %4148 = vmatpush1.bf16.msra.mxu0 %v5776_v51  ;;  %4212 = vmatpush1.bf16.msra.mxu1 %v5778_v54 }
 0x9bc   :  { %4150 = vmatprep.subr.bf16.mxu0 %v5782_v63  ;;  %4214 = vmatprep.subr.bf16.mxu1 %v5784_v6 }
 0x9bf   :  { %4152 = vmatpush1.bf16.msra.mxu0 %v5788_v34  ;;  %4216 = vmatpush1.bf16.msra.mxu1 %v5790_v40 }
 0x9c0   :  { %4154 = vmatprep.subr.bf16.mxu0 %v5794_v56  ;;  %4218 = vmatprep.subr.bf16.mxu1 %v5796_v58 }
 0x9c3   :  { %4156 = vmatpush1.bf16.msra.mxu0 %v5800_v21  ;;  %4220 = vmatpush1.bf16.msra.mxu1 %v5802_v0 }
 0x9c4   :  { %4158 = vmatprep.subr.bf16.mxu0 %v5806_v28  ;;  %4222 = vmatprep.subr.bf16.mxu1 %v5808_v30 }
 0x9c7   :  { %4160 = vmatpush1.bf16.msra.mxu0 %v5812_v8  ;;  %4224 = vmatpush1.bf16.msra.mxu1 %v5814_v13 }
 0x9c8   :  { %4162 = vmatprep.subr.bf16.mxu0 %v5818_v41  ;;  %4226 = vmatprep.subr.bf16.mxu1 %v5820_v44 }
 0x9cb   :  { %4164 = vmatpush1.bf16.msra.mxu0 %v5824_v17  ;;  %4228 = vmatpush1.bf16.msra.mxu1 %v5826_v23 }
 0x9cc   :  { %4166 = vmatprep.subr.bf16.mxu0 %v5830_v42  ;;  %4230 = vmatprep.subr.bf16.mxu1 %v5832_v48 }
 0x9cf   :  { %4168 = vmatpush1.bf16.msra.mxu0 %v5836_v4  ;;  %4232 = vmatpush1.bf16.msra.mxu1 %v5838_v11 }
 0x9d0   :  { %4170 = vmatprep.subr.bf16.mxu0 %v5842_v39  ;;  %4234 = vmatprep.subr.bf16.mxu1 %v5844_v50 }
 0x9d3   :  { %4172 = vmatpush1.bf16.msra.mxu0 %v5848_v57  ;;  %4236 = vmatpush1.bf16.msra.mxu1 %v5850_v61 }
 0x9d4   :  { %4174 = vmatprep.subr.bf16.mxu0 %v5854_v26  ;;  %4238 = vmatprep.subr.bf16.mxu1 %v5856_v31 }
 0x9d7   :  { %4176 = vmatpush1.bf16.msra.mxu0 %v5860_v20  ;;  %4240 = vmatpush1.bf16.msra.mxu1 %v5862_v35 }
 0x9d8   :  { %4178 = vmatprep.subr.bf16.mxu0 %v5866_v32  ;;  %4242 = vmatprep.subr.bf16.mxu1 %v5868_v36 }
 0x9db   :  { %4180 = vmatpush1.bf16.msra.mxu0 %v6637_v59  ;;  %4244 = vmatpush1.bf16.msra.mxu1 %v6638_v1 }
 0x9dc   :  { %4182 = vmatprep.subr.bf16.mxu0 %v6639_v9  ;;  %4246 = vmatprep.subr.bf16.mxu1 %v6640_v14 }
 0x9df   :  { %4184 = vmatpush1.bf16.msra.mxu0 %v6679_v60  ;;  %4248 = vmatpush1.bf16.msra.mxu1 %v6680_v45 }
 0x9e0   :  { %4186 = vmatprep.subr.bf16.mxu0 %v6681_v10  ;;  %4250 = vmatprep.subr.bf16.mxu1 %v6682_v33 }
 0x9e3   :  { %4188 = vmatpush1.bf16.msra.mxu0 %v6683_v29  ;;  %4252 = vmatpush1.bf16.msra.mxu1 %v6684_v49  ;;  %v6695_v49 = vld [vmem:[#allocation45_spill] sm:$0xff] }
 0x9e4   :  { %4190 = vmatprep.subr.bf16.mxu0 %v6685_v22  ;;  %4254 = vmatprep.subr.bf16.mxu1 %v6686_v18  ;;  %v6696_v22 = vld [vmem:[#allocation46_spill] sm:$0xff]  ;;  %v6699_v29 = vld [vmem:[#allocation25_spill] sm:$0xff] }
 0x9e5   :  { %v6697_v18 = vld [vmem:[#allocation22_spill] sm:$0xff] }
 0x9e7   :  { %4192 = vmatpush1.bf16.msra.mxu0 %v6687_v15  ;;  %4256 = vmatpush1.bf16.msra.mxu1 %v6688_v37  ;;  %v6698_v15 = vld [vmem:[#allocation23_spill] sm:$0xff] }
 0x9e8   :  { %4194 = vmatprep.subr.bf16.mxu0 %v6689_v5  ;;  %4258 = vmatprep.subr.bf16.mxu1 %v6690_v53 }
 0x9eb   :  { %4196 = vmatpush1.bf16.msra.mxu0 %v6691_v3  ;;  %4260 = vmatpush1.bf16.msra.mxu1 %v6692_v19 }
 0x9ec   :  { %4198 = vmatprep.subr.bf16.mxu0 %v6693_v52  ;;  %4262 = vmatprep.subr.bf16.mxu1 %v6694_v46 }
 0x9ef   :  { %4200 = vmatpush1.bf16.msra.mxu0 %v6695_v49  ;;  %4264 = vmatpush1.bf16.msra.mxu1 %v6696_v22 }
 0x9f0   :  { %4266 = vmatprep.subr.bf16.mxu0 %v6697_v18  ;;  %4330 = vmatprep.subr.bf16.mxu1 %v6698_v15 }
 0xa84   :  { %v2111_v37 = vpop.f32.mrb[20].mxu0  ;;  %v2182_v5 = vpop.f32.mrb[20].mxu1 }
 0xa85   :  { %v2112_v53 = vadd.f32 %v2111_v37, %v6699_v29  ;;  %v2113_v33 = vpop.f32.mrb[21].mxu0  ;;  %v2184_v3 = vpop.f32.mrb[21].mxu1  ;;  %v2183_v22 = vadd.f32 %v2182_v5, %v6034_v16 }
 0xa86   :  { %v2114_v19 = vadd.f32 %v2113_v33, %v6678_v47  ;;  %v2185_v49 = vadd.f32 %v2184_v3, %v6029_v12 }
 0xa87   :  { %v3159_v10 = vmul.f32 -1.442695, %v2112_v53 }
 0xa88   :  { %v3160_v52 = vmul.f32 -1.442695, %v2114_v19  ;;  %v3161_v46 = vmul.f32 -1.442695, %v2185_v49 }
 0xa89   :  { %4946 = vpow2.f32 %v3159_v10 }
 0xa8a   :  { %4948 = vpow2.f32 %v3160_v52 }
 0xa8b   :  { %4950 = vpow2.f32 %v3161_v46  ;;  %v6705_v46 = vld [vmem:[#allocation34_spill] sm:$0xff] }
 0xa8c   :  { %4952 = vtanh.f32 %v2183_v22  ;;  %v6703_v22 = vld [vmem:[#allocation32_spill] sm:$0xff] }
 0xa93   :  { %v4947_v18 = vpop.eup %4946 }
 0xa94   :  { %v4949_v45 = vpop.eup %4948  ;;  %v2190_v15 = vadd.f32 1.0, %v4947_v18 }
 0xa95   :  { %v2196_v60 = vadd.f32 1.0, %v4949_v45  ;;  %v4951_v37 = vpop.eup %4950  ;;  %v6701_v45 = vld [vmem:[#allocation30_spill] sm:$0xff] }
 0xa96   :  { %4954 = vrcp.f32 %v2190_v15  ;;  %v4953_v29 = vpop.eup %4952  ;;  %v2203_v10 = vadd.f32 1.0, %v4951_v37  ;;  %v6704_v15 = vld [vmem:[#allocation33_spill] sm:$0xff]  ;;  %v6706_v37 = vld [vmem:[#allocation35_spill] sm:$0xff] }
 0xa97   :  { %4956 = vrcp.f32 %v2196_v60  ;;  %v2382_v60 = vld [vmem:[#allocation2 + $0x8] sm:$0x3] }
 0xa98   :  { %4958 = vrcp.f32 %v2203_v10  ;;  %v6710_v10 = vld [vmem:[#allocation39_spill] sm:$0xff] }
 0xaa0   :  { %v4955_v33 = vpop.eup %4954 }
 0xaa1   :  { %v4957_v53 = vpop.eup %4956  ;;  %v2207_v19 = vmul.f32 %v4955_v33, %v4953_v29  ;;  %v6702_v29 = vld [vmem:[#allocation31_spill] sm:$0xff]  ;;  %v6707_v33 = vld [vmem:[#allocation36_spill] sm:$0xff] }
 0xaa2   :  { %v2206_v52 = vmul.f32 %v4957_v53, %v6112_v43  ;;  %v4959_v49 = vpop.eup %4958  ;;  %v6700_v43 = vld [vmem:[#allocation29_spill] sm:$0xff] }
 0xaa3   :  { %v6708_v53 = vld [vmem:[#allocation37_spill] sm:$0xff] }
 0xaa4   :  { %v6184_v3 = vadd.f32 %v2207_v19, %v2206_v52  ;;  %v6709_v19 = vld [vmem:[#allocation38_spill] sm:$0xff]  ;;  %v6711_v52 = vld [vmem:[#allocation40_spill] sm:$0xff] }
 0xaa6   :  { %4960 = vtanh.f32 %v6184_v3 }
 0xab0   :  { %v4961_v18 = vpop.eup %4960 }
 0xab1   :  { %v2210_v5 = vmul.f32 %v4961_v18, %v4959_v49  ;;  %v6712_v49 = vld [vmem:[#allocation41_spill] sm:$0xff]  ;;  %v6713_v18 = vld [vmem:[#allocation42_spill] sm:$0xff] }
 0xab3   :  { %2212 = vst [vmem:[#allocation9 + $0x4] sm:$0x3] %v2210_v5  ;;  %2279 = vmatmul.mubr.f32.vlgmr.msra.gmra.mrb[22].mxu0 %v2210_v5  ;;  %2350 = vmatmul.mubr.f32.vlgmr.msra.gmra.mrb[22].mxu1 %v2210_v5  ;;  %v6714_v5 = vld [vmem:[#allocation43_spill] sm:$0xff] }
 0xab4   :  { %2447 = vmatprep.mubr.f32.mxu0 %v2382_v60  ;;  %2518 = vmatprep.mubr.f32.mxu1 %v2382_v60  ;;  %v6715_v60 = vld [vmem:[#allocation44_spill] sm:$0xff] }
 0xab5   :  { %4268 = vmatpush1.bf16.msra.mxu0 %v5754_v27  ;;  %4332 = vmatpush1.bf16.msra.mxu1 %v5756_v2 }
 0xab6   :  { %4270 = vmatprep.subr.bf16.mxu0 %v5758_v55  ;;  %4334 = vmatprep.subr.bf16.mxu1 %v5760_v38 }
 0xab9   :  { %4272 = vmatpush1.bf16.msra.mxu0 %v5764_v62  ;;  %4336 = vmatpush1.bf16.msra.mxu1 %v5766_v7 }
 0xaba   :  { %4274 = vmatprep.subr.bf16.mxu0 %v5768_v24  ;;  %4338 = vmatprep.subr.bf16.mxu1 %v5770_v25 }
 0xabd   :  { %4276 = vmatpush1.bf16.msra.mxu0 %v5776_v51  ;;  %4340 = vmatpush1.bf16.msra.mxu1 %v5778_v54 }
 0xabe   :  { %4278 = vmatprep.subr.bf16.mxu0 %v5782_v63  ;;  %4342 = vmatprep.subr.bf16.mxu1 %v5784_v6 }
 0xac1   :  { %4280 = vmatpush1.bf16.msra.mxu0 %v5788_v34  ;;  %4344 = vmatpush1.bf16.msra.mxu1 %v5790_v40 }
 0xac2   :  { %4282 = vmatprep.subr.bf16.mxu0 %v5794_v56  ;;  %4346 = vmatprep.subr.bf16.mxu1 %v5796_v58 }
 0xac5   :  { %4284 = vmatpush1.bf16.msra.mxu0 %v5800_v21  ;;  %4348 = vmatpush1.bf16.msra.mxu1 %v5802_v0 }
 0xac6   :  { %4286 = vmatprep.subr.bf16.mxu0 %v5806_v28  ;;  %4350 = vmatprep.subr.bf16.mxu1 %v5808_v30 }
 0xac9   :  { %4288 = vmatpush1.bf16.msra.mxu0 %v5812_v8  ;;  %4352 = vmatpush1.bf16.msra.mxu1 %v5814_v13 }
 0xaca   :  { %4290 = vmatprep.subr.bf16.mxu0 %v5818_v41  ;;  %4354 = vmatprep.subr.bf16.mxu1 %v5820_v44 }
 0xacd   :  { %4292 = vmatpush1.bf16.msra.mxu0 %v5824_v17  ;;  %4356 = vmatpush1.bf16.msra.mxu1 %v5826_v23 }
 0xace   :  { %4294 = vmatprep.subr.bf16.mxu0 %v5830_v42  ;;  %4358 = vmatprep.subr.bf16.mxu1 %v5832_v48 }
 0xad1   :  { %4296 = vmatpush1.bf16.msra.mxu0 %v5836_v4  ;;  %4360 = vmatpush1.bf16.msra.mxu1 %v5838_v11 }
 0xad2   :  { %4298 = vmatprep.subr.bf16.mxu0 %v5842_v39  ;;  %4362 = vmatprep.subr.bf16.mxu1 %v5844_v50 }
 0xad5   :  { %4300 = vmatpush1.bf16.msra.mxu0 %v5848_v57  ;;  %4364 = vmatpush1.bf16.msra.mxu1 %v5850_v61 }
 0xad6   :  { %4302 = vmatprep.subr.bf16.mxu0 %v5854_v26  ;;  %4366 = vmatprep.subr.bf16.mxu1 %v5856_v31 }
 0xad9   :  { %4304 = vmatpush1.bf16.msra.mxu0 %v5860_v20  ;;  %4368 = vmatpush1.bf16.msra.mxu1 %v5862_v35 }
 0xada   :  { %4306 = vmatprep.subr.bf16.mxu0 %v5866_v32  ;;  %4370 = vmatprep.subr.bf16.mxu1 %v5868_v36 }
 0xadd   :  { %4308 = vmatpush1.bf16.msra.mxu0 %v6637_v59  ;;  %4372 = vmatpush1.bf16.msra.mxu1 %v6638_v1 }
 0xade   :  { %4310 = vmatprep.subr.bf16.mxu0 %v6639_v9  ;;  %4374 = vmatprep.subr.bf16.mxu1 %v6640_v14 }
 0xae1   :  { %4312 = vmatpush1.bf16.msra.mxu0 %v6700_v43  ;;  %4376 = vmatpush1.bf16.msra.mxu1 %v6701_v45 }
 0xae2   :  { %4314 = vmatprep.subr.bf16.mxu0 %v6702_v29  ;;  %4378 = vmatprep.subr.bf16.mxu1 %v6703_v22 }
 0xae5   :  { %4316 = vmatpush1.bf16.msra.mxu0 %v6704_v15  ;;  %4380 = vmatpush1.bf16.msra.mxu1 %v6705_v46  ;;  %v6716_v46 = vld [vmem:[#allocation45_spill] sm:$0xff] }
 0xae6   :  { %4318 = vmatprep.subr.bf16.mxu0 %v6706_v37  ;;  %4382 = vmatprep.subr.bf16.mxu1 %v6707_v33  ;;  %v6717_v37 = vld [vmem:[#allocation46_spill] sm:$0xff]  ;;  %v6720_v15 = vld [vmem:[#allocation25_spill] sm:$0xff] }
 0xae7   :  { %v6718_v33 = vld [vmem:[#allocation22_spill] sm:$0xff] }
 0xae9   :  { %4320 = vmatpush1.bf16.msra.mxu0 %v6708_v53  ;;  %4384 = vmatpush1.bf16.msra.mxu1 %v6709_v19  ;;  %v6719_v53 = vld [vmem:[#allocation23_spill] sm:$0xff] }
 0xaea   :  { %4322 = vmatprep.subr.bf16.mxu0 %v6710_v10  ;;  %4386 = vmatprep.subr.bf16.mxu1 %v6711_v52 }
 0xaed   :  { %4324 = vmatpush1.bf16.msra.mxu0 %v6712_v49  ;;  %4388 = vmatpush1.bf16.msra.mxu1 %v6713_v18 }
 0xaee   :  { %4326 = vmatprep.subr.bf16.mxu0 %v6714_v5  ;;  %4390 = vmatprep.subr.bf16.mxu1 %v6715_v60 }
 0xaf1   :  { %4328 = vmatpush1.bf16.msra.mxu0 %v6716_v46  ;;  %4392 = vmatpush1.bf16.msra.mxu1 %v6717_v37 }
 0xaf2   :  { %4394 = vmatprep.subr.bf16.mxu0 %v6718_v33  ;;  %4458 = vmatprep.subr.bf16.mxu1 %v6719_v53 }
 0xb86   :  { %v2280_v19 = vpop.f32.mrb[22].mxu0  ;;  %v2351_v10 = vpop.f32.mrb[22].mxu1 }
 0xb87   :  { %v2281_v52 = vadd.f32 %v2280_v19, %v6720_v15  ;;  %v2282_v22 = vpop.f32.mrb[23].mxu0  ;;  %v2353_v49 = vpop.f32.mrb[23].mxu1  ;;  %v2352_v37 = vadd.f32 %v2351_v10, %v6034_v16 }
 0xb88   :  { %v2283_v18 = vadd.f32 %v2282_v22, %v6678_v47  ;;  %v2354_v46 = vadd.f32 %v2353_v49, %v6029_v12 }
 0xb89   :  { %v3162_v29 = vmul.f32 -1.442695, %v2281_v52 }
 0xb8a   :  { %v3163_v5 = vmul.f32 -1.442695, %v2283_v18  ;;  %v3164_v60 = vmul.f32 -1.442695, %v2354_v46 }
 0xb8b   :  { %4962 = vpow2.f32 %v3162_v29 }
 0xb8c   :  { %4964 = vpow2.f32 %v3163_v5 }
 0xb8d   :  { %4966 = vpow2.f32 %v3164_v60  ;;  %v6726_v60 = vld [vmem:[#allocation34_spill] sm:$0xff] }
 0xb8e   :  { %4968 = vtanh.f32 %v2352_v37  ;;  %v6724_v37 = vld [vmem:[#allocation32_spill] sm:$0xff] }
 0xb95   :  { %v4963_v33 = vpop.eup %4962 }
 0xb96   :  { %v4965_v45 = vpop.eup %4964  ;;  %v2359_v53 = vadd.f32 1.0, %v4963_v33 }
 0xb97   :  { %v2365_v43 = vadd.f32 1.0, %v4965_v45  ;;  %v4967_v19 = vpop.eup %4966  ;;  %v6722_v45 = vld [vmem:[#allocation30_spill] sm:$0xff] }
 0xb98   :  { %4970 = vrcp.f32 %v2359_v53  ;;  %v4969_v15 = vpop.eup %4968  ;;  %v2372_v29 = vadd.f32 1.0, %v4967_v19  ;;  %v6725_v53 = vld [vmem:[#allocation33_spill] sm:$0xff]  ;;  %v6727_v19 = vld [vmem:[#allocation35_spill] sm:$0xff] }
 0xb99   :  { %4972 = vrcp.f32 %v2365_v43  ;;  %v2551_v43 = vld [vmem:[#allocation2 + $0xa] sm:$0x3] }
 0xb9a   :  { %4974 = vrcp.f32 %v2372_v29  ;;  %v6731_v29 = vld [vmem:[#allocation39_spill] sm:$0xff] }
 0xba2   :  { %v4971_v22 = vpop.eup %4970 }
 0xba3   :  { %v4973_v52 = vpop.eup %4972  ;;  %v2376_v18 = vmul.f32 %v4971_v22, %v4969_v15  ;;  %v6723_v15 = vld [vmem:[#allocation31_spill] sm:$0xff]  ;;  %v6728_v22 = vld [vmem:[#allocation36_spill] sm:$0xff] }
 0xba4   :  { %v2375_v5 = vmul.f32 %v4973_v52, %v6184_v3  ;;  %v4975_v46 = vpop.eup %4974  ;;  %v6721_v3 = vld [vmem:[#allocation29_spill] sm:$0xff] }
 0xba5   :  { %v6729_v52 = vld [vmem:[#allocation37_spill] sm:$0xff] }
 0xba6   :  { %v6256_v49 = vadd.f32 %v2376_v18, %v2375_v5  ;;  %v6730_v18 = vld [vmem:[#allocation38_spill] sm:$0xff]  ;;  %v6732_v5 = vld [vmem:[#allocation40_spill] sm:$0xff] }
 0xba8   :  { %4976 = vtanh.f32 %v6256_v49 }
 0xbb2   :  { %v4977_v33 = vpop.eup %4976 }
 0xbb3   :  { %v2379_v10 = vmul.f32 %v4977_v33, %v4975_v46  ;;  %v6733_v46 = vld [vmem:[#allocation41_spill] sm:$0xff]  ;;  %v6734_v33 = vld [vmem:[#allocation42_spill] sm:$0xff] }
 0xbb5   :  { %2381 = vst [vmem:[#allocation9 + $0x6] sm:$0x3] %v2379_v10  ;;  %2448 = vmatmul.mubr.f32.vlgmr.msra.gmra.mrb[24].mxu0 %v2379_v10  ;;  %2519 = vmatmul.mubr.f32.vlgmr.msra.gmra.mrb[24].mxu1 %v2379_v10  ;;  %v6735_v10 = vld [vmem:[#allocation43_spill] sm:$0xff] }
 0xbb6   :  { %2616 = vmatprep.mubr.f32.mxu0 %v2551_v43  ;;  %2687 = vmatprep.mubr.f32.mxu1 %v2551_v43  ;;  %v6736_v43 = vld [vmem:[#allocation44_spill] sm:$0xff] }
 0xbb7   :  { %4396 = vmatpush1.bf16.msra.mxu0 %v5754_v27  ;;  %4460 = vmatpush1.bf16.msra.mxu1 %v5756_v2 }
 0xbb8   :  { %4398 = vmatprep.subr.bf16.mxu0 %v5758_v55  ;;  %4462 = vmatprep.subr.bf16.mxu1 %v5760_v38 }
 0xbbb   :  { %4400 = vmatpush1.bf16.msra.mxu0 %v5764_v62  ;;  %4464 = vmatpush1.bf16.msra.mxu1 %v5766_v7 }
 0xbbc   :  { %4402 = vmatprep.subr.bf16.mxu0 %v5768_v24  ;;  %4466 = vmatprep.subr.bf16.mxu1 %v5770_v25 }
 0xbbf   :  { %4404 = vmatpush1.bf16.msra.mxu0 %v5776_v51  ;;  %4468 = vmatpush1.bf16.msra.mxu1 %v5778_v54 }
 0xbc0   :  { %4406 = vmatprep.subr.bf16.mxu0 %v5782_v63  ;;  %4470 = vmatprep.subr.bf16.mxu1 %v5784_v6 }
 0xbc3   :  { %4408 = vmatpush1.bf16.msra.mxu0 %v5788_v34  ;;  %4472 = vmatpush1.bf16.msra.mxu1 %v5790_v40 }
 0xbc4   :  { %4410 = vmatprep.subr.bf16.mxu0 %v5794_v56  ;;  %4474 = vmatprep.subr.bf16.mxu1 %v5796_v58 }
 0xbc7   :  { %4412 = vmatpush1.bf16.msra.mxu0 %v5800_v21  ;;  %4476 = vmatpush1.bf16.msra.mxu1 %v5802_v0 }
 0xbc8   :  { %4414 = vmatprep.subr.bf16.mxu0 %v5806_v28  ;;  %4478 = vmatprep.subr.bf16.mxu1 %v5808_v30 }
 0xbcb   :  { %4416 = vmatpush1.bf16.msra.mxu0 %v5812_v8  ;;  %4480 = vmatpush1.bf16.msra.mxu1 %v5814_v13 }
 0xbcc   :  { %4418 = vmatprep.subr.bf16.mxu0 %v5818_v41  ;;  %4482 = vmatprep.subr.bf16.mxu1 %v5820_v44 }
 0xbcf   :  { %4420 = vmatpush1.bf16.msra.mxu0 %v5824_v17  ;;  %4484 = vmatpush1.bf16.msra.mxu1 %v5826_v23 }
 0xbd0   :  { %4422 = vmatprep.subr.bf16.mxu0 %v5830_v42  ;;  %4486 = vmatprep.subr.bf16.mxu1 %v5832_v48 }
 0xbd3   :  { %4424 = vmatpush1.bf16.msra.mxu0 %v5836_v4  ;;  %4488 = vmatpush1.bf16.msra.mxu1 %v5838_v11 }
 0xbd4   :  { %4426 = vmatprep.subr.bf16.mxu0 %v5842_v39  ;;  %4490 = vmatprep.subr.bf16.mxu1 %v5844_v50 }
 0xbd7   :  { %4428 = vmatpush1.bf16.msra.mxu0 %v5848_v57  ;;  %4492 = vmatpush1.bf16.msra.mxu1 %v5850_v61 }
 0xbd8   :  { %4430 = vmatprep.subr.bf16.mxu0 %v5854_v26  ;;  %4494 = vmatprep.subr.bf16.mxu1 %v5856_v31 }
 0xbdb   :  { %4432 = vmatpush1.bf16.msra.mxu0 %v5860_v20  ;;  %4496 = vmatpush1.bf16.msra.mxu1 %v5862_v35 }
 0xbdc   :  { %4434 = vmatprep.subr.bf16.mxu0 %v5866_v32  ;;  %4498 = vmatprep.subr.bf16.mxu1 %v5868_v36 }
 0xbdf   :  { %4436 = vmatpush1.bf16.msra.mxu0 %v6637_v59  ;;  %4500 = vmatpush1.bf16.msra.mxu1 %v6638_v1 }
 0xbe0   :  { %4438 = vmatprep.subr.bf16.mxu0 %v6639_v9  ;;  %4502 = vmatprep.subr.bf16.mxu1 %v6640_v14 }
 0xbe3   :  { %4440 = vmatpush1.bf16.msra.mxu0 %v6721_v3  ;;  %4504 = vmatpush1.bf16.msra.mxu1 %v6722_v45 }
 0xbe4   :  { %4442 = vmatprep.subr.bf16.mxu0 %v6723_v15  ;;  %4506 = vmatprep.subr.bf16.mxu1 %v6724_v37 }
 0xbe7   :  { %4444 = vmatpush1.bf16.msra.mxu0 %v6725_v53  ;;  %4508 = vmatpush1.bf16.msra.mxu1 %v6726_v60  ;;  %v6737_v60 = vld [vmem:[#allocation45_spill] sm:$0xff] }
 0xbe8   :  { %4446 = vmatprep.subr.bf16.mxu0 %v6727_v19  ;;  %4510 = vmatprep.subr.bf16.mxu1 %v6728_v22  ;;  %v6738_v19 = vld [vmem:[#allocation46_spill] sm:$0xff]  ;;  %v6741_v53 = vld [vmem:[#allocation25_spill] sm:$0xff] }
 0xbe9   :  { %v6739_v22 = vld [vmem:[#allocation22_spill] sm:$0xff] }
 0xbeb   :  { %4448 = vmatpush1.bf16.msra.mxu0 %v6729_v52  ;;  %4512 = vmatpush1.bf16.msra.mxu1 %v6730_v18  ;;  %v6740_v52 = vld [vmem:[#allocation23_spill] sm:$0xff] }
 0xbec   :  { %4450 = vmatprep.subr.bf16.mxu0 %v6731_v29  ;;  %4514 = vmatprep.subr.bf16.mxu1 %v6732_v5 }
 0xbef   :  { %4452 = vmatpush1.bf16.msra.mxu0 %v6733_v46  ;;  %4516 = vmatpush1.bf16.msra.mxu1 %v6734_v33 }
 0xbf0   :  { %4454 = vmatprep.subr.bf16.mxu0 %v6735_v10  ;;  %4518 = vmatprep.subr.bf16.mxu1 %v6736_v43 }
 0xbf3   :  { %4456 = vmatpush1.bf16.msra.mxu0 %v6737_v60  ;;  %4520 = vmatpush1.bf16.msra.mxu1 %v6738_v19 }
 0xbf4   :  { %4522 = vmatprep.subr.bf16.mxu0 %v6739_v22  ;;  %4586 = vmatprep.subr.bf16.mxu1 %v6740_v52 }
 0xc88   :  { %v2449_v18 = vpop.f32.mrb[24].mxu0  ;;  %v2520_v29 = vpop.f32.mrb[24].mxu1 }
 0xc89   :  { %v2450_v5 = vadd.f32 %v2449_v18, %v6741_v53  ;;  %v2451_v37 = vpop.f32.mrb[25].mxu0  ;;  %v2522_v46 = vpop.f32.mrb[25].mxu1  ;;  %v2521_v19 = vadd.f32 %v2520_v29, %v6034_v16 }
 0xc8a   :  { %v2452_v33 = vadd.f32 %v2451_v37, %v6678_v47  ;;  %v2523_v60 = vadd.f32 %v2522_v46, %v6029_v12 }
 0xc8b   :  { %v3165_v15 = vmul.f32 -1.442695, %v2450_v5 }
 0xc8c   :  { %v3166_v10 = vmul.f32 -1.442695, %v2452_v33  ;;  %v3167_v43 = vmul.f32 -1.442695, %v2523_v60 }
 0xc8d   :  { %4978 = vpow2.f32 %v3165_v15 }
 0xc8e   :  { %4980 = vpow2.f32 %v3166_v10 }
 0xc8f   :  { %4982 = vpow2.f32 %v3167_v43  ;;  %v6747_v43 = vld [vmem:[#allocation34_spill] sm:$0xff] }
 0xc90   :  { %4984 = vtanh.f32 %v2521_v19  ;;  %v6745_v19 = vld [vmem:[#allocation32_spill] sm:$0xff] }
 0xc97   :  { %v4979_v22 = vpop.eup %4978 }
 0xc98   :  { %v4981_v45 = vpop.eup %4980  ;;  %v2528_v52 = vadd.f32 1.0, %v4979_v22 }
 0xc99   :  { %v2534_v3 = vadd.f32 1.0, %v4981_v45  ;;  %v4983_v18 = vpop.eup %4982  ;;  %v6743_v45 = vld [vmem:[#allocation30_spill] sm:$0xff] }
 0xc9a   :  { %4986 = vrcp.f32 %v2528_v52  ;;  %v4985_v53 = vpop.eup %4984  ;;  %v2541_v15 = vadd.f32 1.0, %v4983_v18  ;;  %v6746_v52 = vld [vmem:[#allocation33_spill] sm:$0xff]  ;;  %v6748_v18 = vld [vmem:[#allocation35_spill] sm:$0xff] }
 0xc9b   :  { %4988 = vrcp.f32 %v2534_v3  ;;  %v2720_v3 = vld [vmem:[#allocation2 + $0xc] sm:$0x3] }
 0xc9c   :  { %4990 = vrcp.f32 %v2541_v15  ;;  %v6752_v15 = vld [vmem:[#allocation39_spill] sm:$0xff] }
 0xca4   :  { %v4987_v37 = vpop.eup %4986 }
 0xca5   :  { %v4989_v5 = vpop.eup %4988  ;;  %v2545_v33 = vmul.f32 %v4987_v37, %v4985_v53  ;;  %v6744_v53 = vld [vmem:[#allocation31_spill] sm:$0xff]  ;;  %v6749_v37 = vld [vmem:[#allocation36_spill] sm:$0xff] }
 0xca6   :  { %v2544_v10 = vmul.f32 %v4989_v5, %v6256_v49  ;;  %v4991_v60 = vpop.eup %4990  ;;  %v6742_v49 = vld [vmem:[#allocation29_spill] sm:$0xff] }
 0xca7   :  { %v6750_v5 = vld [vmem:[#allocation37_spill] sm:$0xff] }
 0xca8   :  { %v6328_v46 = vadd.f32 %v2545_v33, %v2544_v10  ;;  %v6751_v33 = vld [vmem:[#allocation38_spill] sm:$0xff]  ;;  %v6753_v10 = vld [vmem:[#allocation40_spill] sm:$0xff] }
 0xcaa   :  { %4992 = vtanh.f32 %v6328_v46 }
 0xcb4   :  { %v4993_v22 = vpop.eup %4992 }
 0xcb5   :  { %v2548_v29 = vmul.f32 %v4993_v22, %v4991_v60  ;;  %v6754_v60 = vld [vmem:[#allocation41_spill] sm:$0xff]  ;;  %v6755_v22 = vld [vmem:[#allocation42_spill] sm:$0xff] }
 0xcb7   :  { %2550 = vst [vmem:[#allocation9 + $0x8] sm:$0x3] %v2548_v29  ;;  %2617 = vmatmul.mubr.f32.vlgmr.msra.gmra.mrb[26].mxu0 %v2548_v29  ;;  %2688 = vmatmul.mubr.f32.vlgmr.msra.gmra.mrb[26].mxu1 %v2548_v29  ;;  %v6756_v29 = vld [vmem:[#allocation43_spill] sm:$0xff] }
 0xcb8   :  { %2785 = vmatprep.mubr.f32.mxu0 %v2720_v3  ;;  %2856 = vmatprep.mubr.f32.mxu1 %v2720_v3  ;;  %v6757_v3 = vld [vmem:[#allocation44_spill] sm:$0xff] }
 0xcb9   :  { %4524 = vmatpush1.bf16.msra.mxu0 %v5754_v27  ;;  %4588 = vmatpush1.bf16.msra.mxu1 %v5756_v2 }
 0xcba   :  { %4526 = vmatprep.subr.bf16.mxu0 %v5758_v55  ;;  %4590 = vmatprep.subr.bf16.mxu1 %v5760_v38 }
 0xcbd   :  { %4528 = vmatpush1.bf16.msra.mxu0 %v5764_v62  ;;  %4592 = vmatpush1.bf16.msra.mxu1 %v5766_v7 }
 0xcbe   :  { %4530 = vmatprep.subr.bf16.mxu0 %v5768_v24  ;;  %4594 = vmatprep.subr.bf16.mxu1 %v5770_v25 }
 0xcc1   :  { %4532 = vmatpush1.bf16.msra.mxu0 %v5776_v51  ;;  %4596 = vmatpush1.bf16.msra.mxu1 %v5778_v54 }
 0xcc2   :  { %4534 = vmatprep.subr.bf16.mxu0 %v5782_v63  ;;  %4598 = vmatprep.subr.bf16.mxu1 %v5784_v6 }
 0xcc5   :  { %4536 = vmatpush1.bf16.msra.mxu0 %v5788_v34  ;;  %4600 = vmatpush1.bf16.msra.mxu1 %v5790_v40 }
 0xcc6   :  { %4538 = vmatprep.subr.bf16.mxu0 %v5794_v56  ;;  %4602 = vmatprep.subr.bf16.mxu1 %v5796_v58 }
 0xcc9   :  { %4540 = vmatpush1.bf16.msra.mxu0 %v5800_v21  ;;  %4604 = vmatpush1.bf16.msra.mxu1 %v5802_v0 }
 0xcca   :  { %4542 = vmatprep.subr.bf16.mxu0 %v5806_v28  ;;  %4606 = vmatprep.subr.bf16.mxu1 %v5808_v30 }
 0xccd   :  { %4544 = vmatpush1.bf16.msra.mxu0 %v5812_v8  ;;  %4608 = vmatpush1.bf16.msra.mxu1 %v5814_v13 }
 0xcce   :  { %4546 = vmatprep.subr.bf16.mxu0 %v5818_v41  ;;  %4610 = vmatprep.subr.bf16.mxu1 %v5820_v44 }
 0xcd1   :  { %4548 = vmatpush1.bf16.msra.mxu0 %v5824_v17  ;;  %4612 = vmatpush1.bf16.msra.mxu1 %v5826_v23 }
 0xcd2   :  { %4550 = vmatprep.subr.bf16.mxu0 %v5830_v42  ;;  %4614 = vmatprep.subr.bf16.mxu1 %v5832_v48 }
 0xcd5   :  { %4552 = vmatpush1.bf16.msra.mxu0 %v5836_v4  ;;  %4616 = vmatpush1.bf16.msra.mxu1 %v5838_v11 }
 0xcd6   :  { %4554 = vmatprep.subr.bf16.mxu0 %v5842_v39  ;;  %4618 = vmatprep.subr.bf16.mxu1 %v5844_v50 }
 0xcd9   :  { %4556 = vmatpush1.bf16.msra.mxu0 %v5848_v57  ;;  %4620 = vmatpush1.bf16.msra.mxu1 %v5850_v61 }
 0xcda   :  { %4558 = vmatprep.subr.bf16.mxu0 %v5854_v26  ;;  %4622 = vmatprep.subr.bf16.mxu1 %v5856_v31 }
 0xcdd   :  { %4560 = vmatpush1.bf16.msra.mxu0 %v5860_v20  ;;  %4624 = vmatpush1.bf16.msra.mxu1 %v5862_v35 }
 0xcde   :  { %4562 = vmatprep.subr.bf16.mxu0 %v5866_v32  ;;  %4626 = vmatprep.subr.bf16.mxu1 %v5868_v36 }
 0xce1   :  { %4564 = vmatpush1.bf16.msra.mxu0 %v6637_v59  ;;  %4628 = vmatpush1.bf16.msra.mxu1 %v6638_v1 }
 0xce2   :  { %4566 = vmatprep.subr.bf16.mxu0 %v6639_v9  ;;  %4630 = vmatprep.subr.bf16.mxu1 %v6640_v14 }
 0xce5   :  { %4568 = vmatpush1.bf16.msra.mxu0 %v6742_v49  ;;  %4632 = vmatpush1.bf16.msra.mxu1 %v6743_v45 }
 0xce6   :  { %4570 = vmatprep.subr.bf16.mxu0 %v6744_v53  ;;  %4634 = vmatprep.subr.bf16.mxu1 %v6745_v19 }
 0xce9   :  { %4572 = vmatpush1.bf16.msra.mxu0 %v6746_v52  ;;  %4636 = vmatpush1.bf16.msra.mxu1 %v6747_v43  ;;  %v6758_v43 = vld [vmem:[#allocation45_spill] sm:$0xff] }
 0xcea   :  { %4574 = vmatprep.subr.bf16.mxu0 %v6748_v18  ;;  %4638 = vmatprep.subr.bf16.mxu1 %v6749_v37  ;;  %v6759_v18 = vld [vmem:[#allocation46_spill] sm:$0xff]  ;;  %v6762_v52 = vld [vmem:[#allocation25_spill] sm:$0xff] }
 0xceb   :  { %v6760_v37 = vld [vmem:[#allocation22_spill] sm:$0xff] }
 0xced   :  { %4576 = vmatpush1.bf16.msra.mxu0 %v6750_v5  ;;  %4640 = vmatpush1.bf16.msra.mxu1 %v6751_v33  ;;  %v6761_v5 = vld [vmem:[#allocation23_spill] sm:$0xff] }
 0xcee   :  { %4578 = vmatprep.subr.bf16.mxu0 %v6752_v15  ;;  %4642 = vmatprep.subr.bf16.mxu1 %v6753_v10 }
 0xcf1   :  { %4580 = vmatpush1.bf16.msra.mxu0 %v6754_v60  ;;  %4644 = vmatpush1.bf16.msra.mxu1 %v6755_v22 }
 0xcf2   :  { %4582 = vmatprep.subr.bf16.mxu0 %v6756_v29  ;;  %4646 = vmatprep.subr.bf16.mxu1 %v6757_v3 }
 0xcf5   :  { %4584 = vmatpush1.bf16.msra.mxu0 %v6758_v43  ;;  %4648 = vmatpush1.bf16.msra.mxu1 %v6759_v18 }
 0xcf6   :  { %4650 = vmatprep.subr.bf16.mxu0 %v6760_v37  ;;  %4714 = vmatprep.subr.bf16.mxu1 %v6761_v5 }
 0xd8a   :  { %v2618_v33 = vpop.f32.mrb[26].mxu0  ;;  %v2689_v15 = vpop.f32.mrb[26].mxu1 }
 0xd8b   :  { %v2619_v10 = vadd.f32 %v2618_v33, %v6762_v52  ;;  %v2620_v19 = vpop.f32.mrb[27].mxu0  ;;  %v2691_v60 = vpop.f32.mrb[27].mxu1  ;;  %v2690_v18 = vadd.f32 %v2689_v15, %v6034_v16 }
 0xd8c   :  { %v2621_v22 = vadd.f32 %v2620_v19, %v6678_v47  ;;  %v2692_v43 = vadd.f32 %v2691_v60, %v6029_v12 }
 0xd8d   :  { %v3168_v53 = vmul.f32 -1.442695, %v2619_v10 }
 0xd8e   :  { %v3169_v29 = vmul.f32 -1.442695, %v2621_v22  ;;  %v3170_v3 = vmul.f32 -1.442695, %v2692_v43 }
 0xd8f   :  { %4994 = vpow2.f32 %v3168_v53 }
 0xd90   :  { %4996 = vpow2.f32 %v3169_v29 }
 0xd91   :  { %4998 = vpow2.f32 %v3170_v3 }
 0xd92   :  { %5000 = vtanh.f32 %v2690_v18 }
 0xd99   :  { %v4995_v37 = vpop.eup %4994 }
 0xd9a   :  { %v4997_v45 = vpop.eup %4996  ;;  %v2697_v5 = vadd.f32 1.0, %v4995_v37 }
 0xd9b   :  { %v2703_v49 = vadd.f32 1.0, %v4997_v45  ;;  %v4999_v33 = vpop.eup %4998 }
 0xd9c   :  { %5002 = vrcp.f32 %v2697_v5  ;;  %v5001_v52 = vpop.eup %5000  ;;  %v2710_v53 = vadd.f32 1.0, %v4999_v33 }
 0xd9d   :  { %5004 = vrcp.f32 %v2703_v49  ;;  %v2889_v49 = vld [vmem:[#allocation2 + $0xe] sm:$0x3] }
 0xd9e   :  { %5006 = vrcp.f32 %v2710_v53 }
 0xda6   :  { %v5003_v19 = vpop.eup %5002 }
 0xda7   :  { %v5005_v10 = vpop.eup %5004  ;;  %v2714_v22 = vmul.f32 %v5003_v19, %v5001_v52 }
 0xda8   :  { %v2713_v29 = vmul.f32 %v5005_v10, %v6328_v46  ;;  %v5007_v43 = vpop.eup %5006 }
 0xdaa   :  { %v6400_v60 = vadd.f32 %v2714_v22, %v2713_v29 }
 0xdac   :  { %5008 = vtanh.f32 %v6400_v60 }
 0xdb6   :  { %v5009_v15 = vpop.eup %5008 }
 0xdb7   :  { %v2717_v3 = vmul.f32 %v5009_v15, %v5007_v43 }
 0xdb9   :  { %2719 = vst [vmem:[#allocation9 + $0xa] sm:$0x3] %v2717_v3  ;;  %2786 = vmatmul.mubr.f32.vlgmr.msra.gmra.mrb[28].mxu0 %v2717_v3  ;;  %2857 = vmatmul.mubr.f32.vlgmr.msra.gmra.mrb[28].mxu1 %v2717_v3 }
 0xdba   :  { %2954 = vmatprep.mubr.f32.mxu0 %v2889_v49  ;;  %3025 = vmatprep.mubr.f32.mxu1 %v2889_v49 }
 0xdbb   :  { %4652 = vmatpush1.bf16.msra.mxu0 %v5754_v27  ;;  %4716 = vmatpush1.bf16.msra.mxu1 %v5756_v2  ;;  %v6763_v27 = vld [vmem:[#allocation29_spill] sm:$0xff]  ;;  %v6764_v2 = vld [vmem:[#allocation30_spill] sm:$0xff] }
 0xdbc   :  { %4654 = vmatprep.subr.bf16.mxu0 %v5758_v55  ;;  %4718 = vmatprep.subr.bf16.mxu1 %v5760_v38  ;;  %v6765_v55 = vld [vmem:[#allocation31_spill] sm:$0xff]  ;;  %v6766_v38 = vld [vmem:[#allocation32_spill] sm:$0xff] }
 0xdbf   :  { %4656 = vmatpush1.bf16.msra.mxu0 %v5764_v62  ;;  %4720 = vmatpush1.bf16.msra.mxu1 %v5766_v7  ;;  %v6767_v62 = vld [vmem:[#allocation33_spill] sm:$0xff]  ;;  %v6768_v7 = vld [vmem:[#allocation34_spill] sm:$0xff] }
 0xdc0   :  { %4658 = vmatprep.subr.bf16.mxu0 %v5768_v24  ;;  %4722 = vmatprep.subr.bf16.mxu1 %v5770_v25  ;;  %v6769_v24 = vld [vmem:[#allocation35_spill] sm:$0xff]  ;;  %v6770_v25 = vld [vmem:[#allocation36_spill] sm:$0xff] }
 0xdc3   :  { %4660 = vmatpush1.bf16.msra.mxu0 %v5776_v51  ;;  %4724 = vmatpush1.bf16.msra.mxu1 %v5778_v54  ;;  %v6771_v51 = vld [vmem:[#allocation37_spill] sm:$0xff]  ;;  %v6772_v54 = vld [vmem:[#allocation38_spill] sm:$0xff] }
 0xdc4   :  { %4662 = vmatprep.subr.bf16.mxu0 %v5782_v63  ;;  %4726 = vmatprep.subr.bf16.mxu1 %v5784_v6  ;;  %v6773_v63 = vld [vmem:[#allocation39_spill] sm:$0xff]  ;;  %v6774_v6 = vld [vmem:[#allocation40_spill] sm:$0xff] }
 0xdc7   :  { %4664 = vmatpush1.bf16.msra.mxu0 %v5788_v34  ;;  %4728 = vmatpush1.bf16.msra.mxu1 %v5790_v40  ;;  %v6775_v34 = vld [vmem:[#allocation41_spill] sm:$0xff]  ;;  %v6776_v40 = vld [vmem:[#allocation42_spill] sm:$0xff] }
 0xdc8   :  { %4666 = vmatprep.subr.bf16.mxu0 %v5794_v56  ;;  %4730 = vmatprep.subr.bf16.mxu1 %v5796_v58  ;;  %v6777_v56 = vld [vmem:[#allocation43_spill] sm:$0xff]  ;;  %v6778_v58 = vld [vmem:[#allocation44_spill] sm:$0xff] }
 0xdcb   :  { %4668 = vmatpush1.bf16.msra.mxu0 %v5800_v21  ;;  %4732 = vmatpush1.bf16.msra.mxu1 %v5802_v0  ;;  %v6779_v21 = vld [vmem:[#allocation45_spill] sm:$0xff]  ;;  %v6780_v0 = vld [vmem:[#allocation46_spill] sm:$0xff] }
 0xdcc   :  { %4670 = vmatprep.subr.bf16.mxu0 %v5806_v28  ;;  %4734 = vmatprep.subr.bf16.mxu1 %v5808_v30 }
 0xdcf   :  { %4672 = vmatpush1.bf16.msra.mxu0 %v5812_v8  ;;  %4736 = vmatpush1.bf16.msra.mxu1 %v5814_v13  ;;  %v6781_v8 = vld [vmem:[#allocation25_spill] sm:$0xff] }
 0xdd0   :  { %4674 = vmatprep.subr.bf16.mxu0 %v5818_v41  ;;  %4738 = vmatprep.subr.bf16.mxu1 %v5820_v44 }
 0xdd3   :  { %4676 = vmatpush1.bf16.msra.mxu0 %v5824_v17  ;;  %4740 = vmatpush1.bf16.msra.mxu1 %v5826_v23 }
 0xdd4   :  { %4678 = vmatprep.subr.bf16.mxu0 %v5830_v42  ;;  %4742 = vmatprep.subr.bf16.mxu1 %v5832_v48 }
 0xdd7   :  { %4680 = vmatpush1.bf16.msra.mxu0 %v5836_v4  ;;  %4744 = vmatpush1.bf16.msra.mxu1 %v5838_v11 }
 0xdd8   :  { %4682 = vmatprep.subr.bf16.mxu0 %v5842_v39  ;;  %4746 = vmatprep.subr.bf16.mxu1 %v5844_v50 }
 0xddb   :  { %4684 = vmatpush1.bf16.msra.mxu0 %v5848_v57  ;;  %4748 = vmatpush1.bf16.msra.mxu1 %v5850_v61 }
 0xddc   :  { %4686 = vmatprep.subr.bf16.mxu0 %v5854_v26  ;;  %4750 = vmatprep.subr.bf16.mxu1 %v5856_v31 }
 0xddf   :  { %4688 = vmatpush1.bf16.msra.mxu0 %v5860_v20  ;;  %4752 = vmatpush1.bf16.msra.mxu1 %v5862_v35 }
 0xde0   :  { %4690 = vmatprep.subr.bf16.mxu0 %v5866_v32  ;;  %4754 = vmatprep.subr.bf16.mxu1 %v5868_v36 }
 0xde3   :  { %4692 = vmatpush1.bf16.msra.mxu0 %v6637_v59  ;;  %4756 = vmatpush1.bf16.msra.mxu1 %v6638_v1 }
 0xde4   :  { %4694 = vmatprep.subr.bf16.mxu0 %v6639_v9  ;;  %4758 = vmatprep.subr.bf16.mxu1 %v6640_v14 }
 0xde7   :  { %4696 = vmatpush1.bf16.msra.mxu0 %v6763_v27  ;;  %4760 = vmatpush1.bf16.msra.mxu1 %v6764_v2 }
 0xde8   :  { %4698 = vmatprep.subr.bf16.mxu0 %v6765_v55  ;;  %4762 = vmatprep.subr.bf16.mxu1 %v6766_v38 }
 0xdeb   :  { %4700 = vmatpush1.bf16.msra.mxu0 %v6767_v62  ;;  %4764 = vmatpush1.bf16.msra.mxu1 %v6768_v7 }
 0xdec   :  { %4702 = vmatprep.subr.bf16.mxu0 %v6769_v24  ;;  %4766 = vmatprep.subr.bf16.mxu1 %v6770_v25 }
 0xdef   :  { %4704 = vmatpush1.bf16.msra.mxu0 %v6771_v51  ;;  %4768 = vmatpush1.bf16.msra.mxu1 %v6772_v54 }
 0xdf0   :  { %4706 = vmatprep.subr.bf16.mxu0 %v6773_v63  ;;  %4770 = vmatprep.subr.bf16.mxu1 %v6774_v6 }
 0xdf3   :  { %4708 = vmatpush1.bf16.msra.mxu0 %v6775_v34  ;;  %4772 = vmatpush1.bf16.msra.mxu1 %v6776_v40 }
 0xdf4   :  { %4710 = vmatprep.subr.bf16.mxu0 %v6777_v56  ;;  %4774 = vmatprep.subr.bf16.mxu1 %v6778_v58 }
 0xdf7   :  { %4712 = vmatpush1.bf16.msra.mxu0 %v6779_v21  ;;  %4776 = vmatpush1.bf16.msra.mxu1 %v6780_v0 }
 0xe8c   :  { %v2787_v28 = vpop.f32.mrb[28].mxu0  ;;  %v2858_v30 = vpop.f32.mrb[28].mxu1 }
 0xe8d   :  { %v2788_v13 = vadd.f32 %v2787_v28, %v6781_v8  ;;  %v2789_v41 = vpop.f32.mrb[29].mxu0  ;;  %v2860_v44 = vpop.f32.mrb[29].mxu1  ;;  %v2859_v11 = vadd.f32 %v2858_v30, %v6034_v16 }
 0xe8e   :  { %v2790_v17 = vadd.f32 %v2789_v41, %v6678_v47  ;;  %v2861_v48 = vadd.f32 %v2860_v44, %v6029_v12 }
 0xe8f   :  { %v3171_v23 = vmul.f32 -1.442695, %v2788_v13 }
 0xe90   :  { %v3172_v42 = vmul.f32 -1.442695, %v2790_v17  ;;  %v3173_v4 = vmul.f32 -1.442695, %v2861_v48 }
 0xe91   :  { %5010 = vpow2.f32 %v3171_v23 }
 0xe92   :  { %5012 = vpow2.f32 %v3172_v42 }
 0xe93   :  { %5014 = vpow2.f32 %v3173_v4 }
 0xe94   :  { %5016 = vtanh.f32 %v2859_v11 }
 0xe9b   :  { %v5011_v39 = vpop.eup %5010 }
 0xe9c   :  { %v5013_v50 = vpop.eup %5012  ;;  %v2866_v57 = vadd.f32 1.0, %v5011_v39 }
 0xe9d   :  { %v2872_v61 = vadd.f32 1.0, %v5013_v50  ;;  %v5015_v26 = vpop.eup %5014 }
 0xe9e   :  { %5018 = vrcp.f32 %v2866_v57  ;;  %v5017_v31 = vpop.eup %5016  ;;  %v2879_v36 = vadd.f32 1.0, %v5015_v26 }
 0xe9f   :  { %5020 = vrcp.f32 %v2872_v61 }
 0xea0   :  { %5022 = vrcp.f32 %v2879_v36 }
 0xea8   :  { %v5019_v20 = vpop.eup %5018 }
 0xea9   :  { %v5021_v35 = vpop.eup %5020  ;;  %v2883_v32 = vmul.f32 %v5019_v20, %v5017_v31 }
 0xeaa   :  { %v2882_v59 = vmul.f32 %v5021_v35, %v6400_v60  ;;  %v5023_v9 = vpop.eup %5022 }
 0xeac   :  { %v2884_v1 = vadd.f32 %v2883_v32, %v2882_v59 }
 0xeae   :  { %5024 = vtanh.f32 %v2884_v1 }
 0xeb8   :  { %v5025_v14 = vpop.eup %5024 }
 0xeb9   :  { %v2886_v46 = vmul.f32 %v5025_v14, %v5023_v9 }
 0xebb   :  { %2888 = vst [vmem:[#allocation9 + $0xc] sm:$0x3] %v2886_v46  ;;  %2955 = vmatmul.mubr.f32.vlgmr.msra.gmra.mrb[30].mxu0 %v2886_v46  ;;  %3026 = vmatmul.mubr.f32.vlgmr.msra.gmra.mrb[30].mxu1 %v2886_v46 }
 0xf8e   :  { %v2956_v45 = vpop.f32.mrb[30].mxu0  ;;  %v3027_v52 = vpop.f32.mrb[30].mxu1 }
 0xf8f   :  { %v2957_v18 = vadd.f32 %v2956_v45, %v6781_v8  ;;  %v2958_v37 = vpop.f32.mrb[31].mxu0  ;;  %v3029_v5 = vpop.f32.mrb[31].mxu1  ;;  %v3028_v29 = vadd.f32 %v3027_v52, %v6034_v16 }
 0xf90   :  { %v2959_v33 = vadd.f32 %v2958_v37, %v6678_v47  ;;  %v3030_v22 = vadd.f32 %v3029_v5, %v6029_v12 }
 0xf91   :  { %v3174_v19 = vmul.f32 -1.442695, %v2957_v18 }
 0xf92   :  { %v3175_v10 = vmul.f32 -1.442695, %v2959_v33  ;;  %v3176_v53 = vmul.f32 -1.442695, %v3030_v22 }
 0xf93   :  { %5026 = vpow2.f32 %v3174_v19 }
 0xf94   :  { %5028 = vpow2.f32 %v3175_v10 }
 0xf95   :  { %5030 = vpow2.f32 %v3176_v53 }
 0xf96   :  { %5032 = vtanh.f32 %v3028_v29 }
 0xf9d   :  { %v5027_v60 = vpop.eup %5026 }
 0xf9e   :  { %v5029_v43 = vpop.eup %5028  ;;  %v3035_v15 = vadd.f32 1.0, %v5027_v60 }
 0xf9f   :  { %v3041_v3 = vadd.f32 1.0, %v5029_v43  ;;  %v5031_v49 = vpop.eup %5030 }
 0xfa0   :  { %5034 = vrcp.f32 %v3035_v15  ;;  %v5033_v27 = vpop.eup %5032  ;;  %v3048_v38 = vadd.f32 1.0, %v5031_v49 }
 0xfa1   :  { %5036 = vrcp.f32 %v3041_v3 }
 0xfa2   :  { %5038 = vrcp.f32 %v3048_v38 }
 0xfaa   :  { %v5035_v47 = vpop.eup %5034 }
 0xfab   :  { %v5037_v2 = vpop.eup %5036  ;;  %v3052_v55 = vmul.f32 %v5035_v47, %v5033_v27 }
 0xfac   :  { %v3051_v62 = vmul.f32 %v5037_v2, %v2884_v1  ;;  %v5039_v12 = vpop.eup %5038 }
 0xfae   :  { %v3053_v7 = vadd.f32 %v3052_v55, %v3051_v62 }
 0xfb0   :  { %3061 = vst [vmem:[#allocation12 + $0x2] sm:$0x3] %v3053_v7  ;;  %5040 = vtanh.f32 %v3053_v7 }
 0xfba   :  { %v5041_v16 = vpop.eup %5040 }
 0xfbb   :  { %v3055_v24 = vmul.f32 %v5041_v16, %v5039_v12 }
 0xfbd   :  { %3057 = vst [vmem:[#allocation9 + $0xe] sm:$0x3] %v3055_v24  ;;  %3059 = vst [vmem:[#allocation10 + $0x2] sm:$0x3] %v3055_v24 }
 0xfbe   :  { %5119 = shalt.err (!%p5116_p0)
}
 0xfbf   :  { %s5120_s23 = scalar_lea.hbm %s6541_s8, 64 }
 0xfc0   :  { %p5121_p1 = scmp.ne.s32.totalorder %s6541_s8, %s5120_s23  ;;  %p5124_p2 = scmp.lt.u32.totalorder %s5120_s23, %s6541_s8 }
 0xfc2   :  { %p5126_p3 = pnand %p5124_p2, %p5121_p1 }
 0xfc4   :  { %5129 = shalt.err (!%p5126_p3)
}
 0xfc5   :  { %3085 = dma.vmem_to_hbm [thread:$0]  %s3080_s13, 64, %s6541_s8, [#allocation11], %s5184_s20, %s5184_s20, %s5186_s1  }
 0xfc6   :  { %s5130_s27 = scalar_lea.vmem %s6474_s15, 256  ;;  %p5135_p5 = scmp.lt.s32.totalorder %s6474_s15, %s6474_s15 }
 0xfc7   :  { %p5131_p4 = scmp.ne.s32.totalorder %s6474_s15, %s5130_s27  ;;  %p5136_p6 = scmp.lt.s32.totalorder %s5130_s27, %s5130_s27 }
 0xfc9   :  { %p5137_p7 = por %p5136_p6, %p5135_p5 }
 0xfcb   :  { %p5138_p8 = pnand %p5137_p7, %p5131_p4 }
 0xfcd   :  { %5141 = shalt.err (!%p5138_p8)
}
 0xfce   :  { %s5142_s29 = scalar_lea.hbm %s6540_s7, 256 }
 0xfcf   :  { %p5143_p9 = scmp.ne.s32.totalorder %s6540_s7, %s5142_s29  ;;  %p5146_p10 = scmp.lt.u32.totalorder %s5142_s29, %s6540_s7 }
 0xfd1   :  { %p5148_p11 = pnand %p5146_p10, %p5143_p9 }
 0xfd3   :  { %5151 = shalt.err (!%p5148_p11)
}
 0xfd4   :  { %3073 = dma.vmem_to_hbm [thread:$0]  %s6474_s15, 256, %s6540_s7, [#allocation5], %s5184_s20, %s5184_s20, %s5186_s1  }
 0xfd5   :  { %s5152_s10 = scalar_lea.vmem %s6476_s17, 64  ;;  %p5157_p13 = scmp.lt.s32.totalorder %s6476_s17, %s6476_s17 }
 0xfd6   :  { %p5153_p12 = scmp.ne.s32.totalorder %s6476_s17, %s5152_s10  ;;  %p5158_p0 = scmp.lt.s32.totalorder %s5152_s10, %s5152_s10 }
 0xfd8   :  { %p5159_p1 = por %p5158_p0, %p5157_p13 }
 0xfda   :  { %p5160_p2 = pnand %p5159_p1, %p5153_p12 }
 0xfdc   :  { %5163 = shalt.err (!%p5160_p2)
}
 0xfdd   :  { %s5164_s14 = scalar_lea.hbm %s6542_s9, 64 }
 0xfde   :  { %p5165_p3 = scmp.ne.s32.totalorder %s6542_s9, %s5164_s14  ;;  %p5168_p4 = scmp.lt.u32.totalorder %s5164_s14, %s6542_s9 }
 0xfe0   :  { %p5170_p5 = pnand %p5168_p4, %p5165_p3 }
 0xfe2   :  { %5173 = shalt.err (!%p5170_p5)
}
 0xfe3   :  { %3097 = dma.vmem_to_hbm [thread:$0]  %s6476_s17, 64, %s6542_s9, [#allocation11], %s5184_s20, %s5184_s20, %s5186_s1  }
 0xfe4   :  { %5178 = dma.done.wait [#allocation5], 256  }
 0xfe5   :  { %5179 = vsyncadd [#allocation5], 4294967040 }
 0xfe6   :  { %5180 = dma.done.wait [#allocation11], 128  }
 0xfe7   :  { %5181 = vsyncadd [#allocation11], 4294967168 }
 0xfe8   :  { %3107 = vsyncpa [#allocation4], 1 }
 0xfe9   :  { %3108 = vsyncpa [#allocation7], 1 }
 0xfea   :  { %3109 = vsyncpa [#allocation5], 1 }
 0xfeb   :  { %3110 = vsyncpa [#allocation11], 1 }

</bundles_post_ra>
